<compile_context>
chip_gen: v7x
topology: tpu7x:2x2x1
jax: 0.10.0
libtpu: 0.0.40
codegen_flags: <defaults>
</compile_context>

<pallas_src>
import functools

import numpy as np
import jax
import jax.numpy as jnp
from jax import lax
from jax.experimental import pallas as pl
from jax.experimental.pallas import tpu as pltpu


# ------------------- constant matrices (trace-time, numpy -> jnp consts) -------------------

def _build_pool_matrix(H, W, pool_sizes):
    """(N, P) matrix s.t. x_flat (C, N) @ M == concat of exact adaptive-avg-pools."""
    N = H * W
    cols = []
    for oh, ow in pool_sizes:
        assert H % oh == 0 and W % ow == 0, "adaptive pool must be exact (divisible sizes)"
        wh, ww = H // oh, W // ow
        m = np.zeros((N, oh * ow), np.float32)
        inv = 1.0 / (wh * ww)
        for y in range(H):
            for x in range(W):
                m[y * W + x, (y // wh) * ow + (x // ww)] = inv
        cols.append(m)
    return np.concatenate(cols, axis=1)                     # (N, P)


def _build_shift_matrices(H, W):
    """9 (N, N) 0/1 matrices: (x (C, N) @ S[t]) == x shifted by 3x3 tap t (zero padded)."""
    N = H * W
    S = np.zeros((9, N, N), np.float32)
    for ky in range(3):
        for kx in range(3):
            t = ky * 3 + kx
            for y in range(H):
                sy = y + ky - 1
                if not 0 <= sy < H:
                    continue
                for x in range(W):
                    sx = x + kx - 1
                    if 0 <= sx < W:
                        S[t, sy * W + sx, y * W + x] = 1.0
    return S                                                 # (9, N, N)


# ---------------------------------- Pallas kernels ----------------------------------

def _qv_pool_kernel(x_ref, w_ref, pm_ref, q_ref, pool_ref):
    """One (source, batch) per grid step: qv = W @ x; emit q (bf16) and pooled qv (f32)."""
    qv = jnp.dot(w_ref[0], x_ref[0, 0], preferred_element_type=jnp.float32)   # (2C, N) f32
    C = q_ref.shape[2]
    q_ref[0, 0] = qv[:C].astype(q_ref.dtype)                                  # lane-dense N
    pool_ref[0, 0] = jnp.dot(qv.astype(pm_ref.dtype), pm_ref[...],
                             preferred_element_type=jnp.float32)              # (2C, P)


def qv_project_and_pool(x2, w2, pool_mat):
    """x2: (2, B, C, N) bf16, w2: (2, 2C, C) bf16, pool_mat: (N, P) bf16
    -> q (2, B, C, N) bf16 channel-first, pooled qv (2, B, 2C, P) f32 channel-first."""
    S, B, C, N = x2.shape
    C2 = w2.shape[1]
    P = pool_mat.shape[1]
    cost = pl.CostEstimate(
        flops=2 * S * B * (C2 * C * N + C2 * N * P),
        transcendentals=0,
        bytes_accessed=(x2.size + w2.size + pool_mat.size) * 2
        + S * B * C * N * 2 + S * B * C2 * P * 4)
    return pl.pallas_call(
        _qv_pool_kernel,
        out_shape=(jax.ShapeDtypeStruct((S, B, C, N), jnp.bfloat16),
                   jax.ShapeDtypeStruct((S, B, C2, P), jnp.float32)),
        grid=(S, B),
        in_specs=[pl.BlockSpec((1, 1, C, N), lambda s, b: (s, b, 0, 0)),
                  pl.BlockSpec((1, C2, C), lambda s, b: (s, 0, 0)),
                  pl.BlockSpec((N, P), lambda s, b: (0, 0))],
        out_specs=(pl.BlockSpec((1, 1, C, N), lambda s, b: (s, b, 0, 0)),
                   pl.BlockSpec((1, 1, C2, P), lambda s, b: (s, b, 0, 0))),
        compiler_params=pltpu.CompilerParams(
            dimension_semantics=("parallel", "parallel")),
        cost_estimate=cost,
    )(x2, w2, pool_mat)


def _attn_out_kernel(scale, num_heads, q_ref, k_ref, v_ref, wblk_ref, wdw_ref,
                     wpw_ref, shift_ref, o_ref, att_ref):
    """One (branch, batch) per grid step: attention + aggregation + out_h (dw3x3 + pw1x1).

    q_ref:    (1, 1, heads, dh, N) bf16  per-head channel-first queries (dim_head-major)
    k_ref:    (1, 1, heads, P, dh) bf16  per-head channel-last keys (head-major channels)
    v_ref:    (1, 1, heads, dh, P) bf16  per-head channel-first values
    wblk_ref: (C, C) bf16   block-diagonal aggregation weight (constant across grid)
    wdw_ref:  (C, 9) f32    depthwise 3x3 taps of out_h
    wpw_ref:  (C, C) bf16   pointwise 1x1 of out_h
    shift_ref:(9, N, N) bf16  constant 3x3 shift matrices
    o_ref:    (1, 1, C, N) f32  final channel-first output (flattened NCHW), lane-dense
    att_ref:  (C, N) bf16 VMEM scratch (head-major attention features)
    """
    dh = q_ref.shape[3]
    bf = att_ref.dtype
    # --- per-head attention with transposed scores: all dots are plain (M,K)@(K,N),
    #     results land directly in channel-first scratch slices (bounded live ranges).
    for h in range(num_heads):
        q = q_ref[0, 0, h] * scale                                   # (dh, N) bf16
        s_t = jnp.dot(k_ref[0, 0, h], q,
                      preferred_element_type=jnp.float32)            # (P, N) f32
        s_t = s_t - jnp.max(s_t, axis=0, keepdims=True)              # softmax over P (f32)
        p = jnp.exp(s_t)
        denom = jnp.sum(p, axis=0, keepdims=True)
        p = p * pl.reciprocal(denom, approx=True)                    # EUP, not a VALU divide
        o = jnp.dot(v_ref[0, 0, h], p.astype(bf),
                    preferred_element_type=jnp.float32)              # (dh, N) f32
        att_ref[h * dh:(h + 1) * dh, :] = o.astype(bf)

    att = att_ref[...]                                               # (C, N) bf16 head-major
    # --- block-diagonal global aggregation: channels come out dim_head-major (= module's
    #     'b (dim_head heads) h w' order), so the conv tail works on the right channels.
    agg = jnp.dot(wblk_ref[...], att, preferred_element_type=jnp.float32)
    agg_b = agg.astype(bf)
    # --- out_h depthwise 3x3 via 9 constant shift matmuls, then pointwise 1x1.
    d = jnp.zeros_like(agg)
    for t in range(9):
        d = d + wdw_ref[:, t:t + 1] * jnp.dot(agg_b, shift_ref[t],
                                              preferred_element_type=jnp.float32)
    o_ref[0, 0] = jnp.dot(wpw_ref[...], d.astype(bf),
                          preferred_element_type=jnp.float32)        # (C, N) lane-dense


def fused_attention_out(q, k, v, wblk, wdw, wpw, shifts, scale, num_heads):
    """-> (2, B, C, N) f32 final out_h features, channel-first (already flattened NCHW)."""
    S, B, heads, dh, N = q.shape
    P = k.shape[3]
    C = heads * dh
    cost = pl.CostEstimate(
        flops=S * B * (heads * 4 * P * dh * N + 4 * C * C * N + 18 * C * N * N),
        transcendentals=S * B * heads * (P * N + N),
        bytes_accessed=(q.size + k.size + v.size + wblk.size + wpw.size + shifts.size) * 2
        + wdw.size * 4 + S * B * C * N * 4)
    kern = functools.partial(_attn_out_kernel, scale, num_heads)
    return pl.pallas_call(
        kern,
        out_shape=jax.ShapeDtypeStruct((S, B, C, N), jnp.float32),
        grid=(S, B),
        in_specs=[pl.BlockSpec((1, 1, heads, dh, N), lambda s, b: (s, b, 0, 0, 0)),
                  pl.BlockSpec((1, 1, heads, P, dh), lambda s, b: (s, b, 0, 0, 0)),
                  pl.BlockSpec((1, 1, heads, dh, P), lambda s, b: (s, b, 0, 0, 0)),
                  pl.BlockSpec((C, C), lambda s, b: (0, 0)),
                  pl.BlockSpec((C, 9), lambda s, b: (0, 0)),
                  pl.BlockSpec((C, C), lambda s, b: (0, 0)),
                  pl.BlockSpec((9, N, N), lambda s, b: (0, 0, 0))],
        out_specs=pl.BlockSpec((1, 1, C, N), lambda s, b: (s, b, 0, 0)),
        scratch_shapes=[pltpu.VMEM((C, N), jnp.bfloat16)],
        compiler_params=pltpu.CompilerParams(
            dimension_semantics=("parallel", "parallel")),
        cost_estimate=cost,
    )(q, k, v, wblk, wdw, wpw, shifts)


# ------------------------------------ XLA glue ------------------------------------

# TODO(synk): per-scale depthwise refinement convs and LayerNorm stay in XLA glue (tiny
# tensors, off the hot path).
def depthwise3x3_nchw(x, w, b=None):
    C = x.shape[1]
    out = lax.conv_general_dilated(
        x, w[:, None, :, :], window_strides=(1, 1), padding=((1, 1), (1, 1)),
        dimension_numbers=("NCHW", "OIHW", "NCHW"), feature_group_count=C)
    if b is not None:
        out = out + b[None, :, None, None]
    return out


def layernorm_channels_first(x, gamma, beta, eps=1e-5):
    """LayerNorm over the channel axis of a channel-first (M, C, P) tensor."""
    mu = jnp.mean(x, axis=1, keepdims=True)
    var = jnp.mean((x - mu) ** 2, axis=1, keepdims=True)
    return (x - mu) / jnp.sqrt(var + eps) * gamma[None, :, None] + beta[None, :, None]


# ------------------------------------- forward -------------------------------------

def glo_skip_attention_forward(params, h_fea, l_fea,
                               pool_ratios=(1, 2, 3, 6), num_heads=2):
    B, C, H, W = h_fea.shape
    Bl, Cl, Hl, Wl = l_fea.shape
    assert Bl == B and Cl == C and C % num_heads == 0
    # TODO(synk): the reference only needs Hl*Wl == H*W; we require identical spatial dims
    # so both branches share the pooling / shift matrices.
    assert (Hl, Wl) == (H, W)
    N = H * W
    dh = C // num_heads
    scale = dh ** (-0.5)
    bf = jnp.bfloat16

    pool_sizes = [(round(H / pr), round(W / pr)) for pr in pool_ratios]
    pool_mat = jnp.asarray(_build_pool_matrix(H, W, pool_sizes), bf)       # (N, P)
    shifts = jnp.asarray(_build_shift_matrices(H, W), bf)                  # (9, N, N)

    # ---- qv 1x1 conv fused with the multi-scale average pooling (Pallas, grid=(2, B)) ----
    x2 = jnp.stack([h_fea.reshape(B, C, N), l_fea.reshape(B, C, N)]).astype(bf)
    w2 = jnp.stack([params["w_qv_h"], params["w_qv_l"]]).astype(bf)        # (2, 2C, C)
    q_cf, pooled = qv_project_and_pool(x2, w2, pool_mat)
    # q_cf: (2, B, C, N) bf16 channel-first; pooled: (2, B, 2C, P) f32 = [q-pool | v-pool].

    # ---- per-scale depthwise refinement + shared LayerNorm (tiny, XLA glue) ----
    P = pooled.shape[-1]
    pooled4 = pooled.reshape(2 * B * 2, C, P)                              # (s, b, {q,v}) rows
    parts, off = [], 0
    for i, (oh, ow) in enumerate(pool_sizes):
        sz = oh * ow
        pc = pooled4[:, :, off:off + sz].reshape(-1, C, oh, ow)
        pc = pc + depthwise3x3_nchw(pc, params["d_conv_w"][i], params["d_conv_b"][i])
        parts.append(pc.reshape(-1, C, sz))
        off += sz
    refined = jnp.concatenate(parts, axis=2)                               # (4B, C, P)
    refined = layernorm_channels_first(refined, params["norm_g"], params["norm_b"])
    refined = refined.reshape(2, B, 2, num_heads, dh, P)                   # head-major chans

    # keys channel-last (P, dh) per head, values channel-first (dh, P) per head
    k_stack = refined[:, :, 0].swapaxes(-1, -2).astype(bf)                 # (2, B, heads, P, dh)
    v_stack = refined[:, :, 1].astype(bf)                                  # (2, B, heads, dh, P)

    # queries: 'b (dim_head heads) n -> b heads dim_head n' (dim_head-major channel split,
    # as in the reference); branches are crossed: branch 0 (-> outh) = l-queries with the
    # h-pooled keys/values, branch 1 (-> outl) = h-queries with the l-pooled ones.
    q_heads = q_cf.reshape(2, B, dh, num_heads, N).transpose(0, 1, 3, 2, 4)  # (2,B,heads,dh,N)
    q_stack = jnp.stack([q_heads[1], q_heads[0]])                          # bf16, no extra cast

    # ---- constant aggregation weight.  In the reference, global_tokens_to_qk starts with
    # LayerNorm(1) over a size-1 axis, so its output equals ln1_b for any input: w_attn is
    # input-independent and the global-token query row is dead compute.  Build the (C, C)
    # block-diagonal weight directly from the parameters (exactly equivalent). ----
    g = jax.nn.gelu(params["ln1_b"][0], approximate=False)
    y = g * jnp.sum(params["gconv_w"], axis=1) + params["gconv_b"]         # (2C,)
    y = y.reshape(num_heads, 2 * dh)
    w_q = y[:, :dh] * scale
    w_k = y[:, dh:]
    w_attn = jax.nn.softmax(w_q[:, :, None] * w_k[:, None, :], axis=-1)    # (heads, dh, dh)
    wblk = jnp.einsum("hij,hg->jghi", w_attn,
                      jnp.eye(num_heads, dtype=w_attn.dtype)).reshape(C, C)
    # wblk[j*heads + h, h*dh + i] == w_attn[h, i, j]: maps head-major attention channels to
    # the module's dim_head-major output channel order.

    wdw = params["outh_dw_w"].reshape(C, 9).astype(jnp.float32)            # out_h depthwise taps
    wpw = params["outh_pw_w"].astype(bf)                                   # out_h pointwise 1x1

    # ---- attention + aggregation + out_h (depthwise 3x3 + pointwise 1x1), one kernel ----
    out = fused_attention_out(q_stack, k_stack, v_stack, wblk.astype(bf),
                              wdw, wpw, shifts, scale, num_heads)          # (2, B, C, N) f32
    out = out.reshape(2, B, C, H, W)                                       # already NCHW
    return out[0], out[1]


# --------------------------------- parameter init ---------------------------------

def init_params(key, dim, num_heads, n_pools):
    ks = jax.random.split(key, 14)

    def n(k, shape, s=0.1):
        return s * jax.random.normal(k, shape, jnp.float32)

    return {
        "w_qv_h": n(ks[0], (2 * dim, dim)),                 # Conv2d(dim, 2*dim, 1), bias=False
        "w_qv_l": n(ks[1], (2 * dim, dim)),
        "d_conv_w": n(ks[2], (n_pools, dim, 3, 3)),         # depthwise refinement convs
        "d_conv_b": n(ks[3], (n_pools, dim)),
        "norm_g": 1.0 + n(ks[4], (dim,)),                   # LayerNorm(dim)
        "norm_b": n(ks[5], (dim,)),
        # Dead under the reference semantics: LayerNorm(1) of the global token collapses to
        # ln1_b, so the tokens (and ln1_g) never influence the output.  Kept for fidelity.
        "global_tokensh": jax.random.normal(ks[6], (dim,), jnp.float32),
        "global_tokensl": jax.random.normal(ks[7], (dim,), jnp.float32),
        "ln1_g": 1.0 + n(ks[8], (1,)),                      # LayerNorm(1) (gamma unused)
        "ln1_b": n(ks[9], (1,)),
        "gconv_w": n(ks[10], (2 * dim, dim)),               # Conv1d(dim, 2*dim, 1)
        "gconv_b": n(ks[11], (2 * dim,)),
        "outh_dw_w": n(ks[12], (dim, 3, 3)),                # out_h depthwise 3x3, bias=False
        "outh_pw_w": n(ks[13], (dim, dim)),                 # out_h pointwise 1x1, bias=False
    }


# -------------------------------------- main --------------------------------------

if __name__ == "__main__":
    key = jax.random.PRNGKey(0)
    B, C, H, W = 2, 32, 12, 12          # H, W divisible by pooled sizes (12, 6, 4, 2)
    num_heads = 2
    pool_ratios = (1, 2, 3, 6)

    kp, kh_, kl_ = jax.random.split(key, 3)
    params = init_params(kp, C, num_heads, len(pool_ratios))
    h_fea = jax.random.normal(kh_, (B, C, H, W), jnp.float32)
    l_fea = jax.random.normal(kl_, (B, C, H, W), jnp.float32)

    fwd = jax.jit(functools.partial(glo_skip_attention_forward,
                                    pool_ratios=pool_ratios, num_heads=num_heads))
    outh, outl = fwd(params, h_fea, l_fea)
    jax.block_until_ready((outh, outl))

    assert outh.shape == (B, C, H, W), outh.shape
    assert outl.shape == (B, C, H, W), outl.shape
    print("KERNEL_OK")
</pallas_src>

<mosaic_0001>
module attributes {stable_mosaic.version = 11 : i64} {
  func.func @_qv_pool_kernel(%arg0: i32, %arg1: i32, %arg2: memref<1x1x32x144xbf16, #tpu.memory_space<vmem>>, %arg3: memref<1x64x32xbf16, #tpu.memory_space<vmem>>, %arg4: memref<144x200xbf16, #tpu.memory_space<vmem>>, %arg5: memref<1x1x32x144xbf16, #tpu.memory_space<vmem>>, %arg6: memref<1x1x64x200xf32, #tpu.memory_space<vmem>>) attributes {dimension_semantics = [#tpu.dimension_semantics<parallel>, #tpu.dimension_semantics<parallel>], iteration_bounds = array<i64: 2, 2>, scalar_prefetch = 0 : i64, scratch_operands = 0 : i64, tpu.core_type = #tpu.core_type<tc>, window_params = [{transform_indices = @transform_0, window_bounds = array<i64: 1, 1, 32, 144>}, {transform_indices = @transform_1, window_bounds = array<i64: 1, 64, 32>}, {pipeline_mode = #tpu.pipeline_mode<synchronous>, transform_indices = @transform_2, window_bounds = array<i64: 144, 200>}, {transform_indices = @transform_3, window_bounds = array<i64: 1, 1, 32, 144>}, {transform_indices = @transform_4, window_bounds = array<i64: 1, 1, 64, 200>}]} {
    %c0 = arith.constant 0 : index
    %c0_0 = arith.constant 0 : index
    %c0_1 = arith.constant 0 : index
    %0 = vector.load %arg3[%c0, %c0_0, %c0_1] : memref<1x64x32xbf16, #tpu.memory_space<vmem>>, vector<1x64x32xbf16>
    %1 = vector.shape_cast %0 : vector<1x64x32xbf16> to vector<64x32xbf16>
    %c0_2 = arith.constant 0 : index
    %c0_3 = arith.constant 0 : index
    %c0_4 = arith.constant 0 : index
    %c0_5 = arith.constant 0 : index
    %2 = vector.load %arg2[%c0_2, %c0_3, %c0_4, %c0_5] : memref<1x1x32x144xbf16, #tpu.memory_space<vmem>>, vector<1x1x32x144xbf16>
    %3 = vector.shape_cast %2 : vector<1x1x32x144xbf16> to vector<32x144xbf16>
    %cst = arith.constant dense<0.000000e+00> : vector<64x144xf32>
    %4 = tpu.matmul %1, %3, %cst {dimension_numbers = #tpu.dot_dimension_numbers<[1], [0], [0], [1], [0, 0, 1, 1], [], []>} : vector<64x32xbf16>, vector<32x144xbf16>, vector<64x144xf32> -> vector<64x144xf32>
    %5 = vector.extract_strided_slice %4 {offsets = [0, 0], sizes = [32, 144], strides = [1, 1]} : vector<64x144xf32> to vector<32x144xf32>
    %6 = arith.truncf %5 : vector<32x144xf32> to vector<32x144xbf16>
    %c0_6 = arith.constant 0 : index
    %c0_7 = arith.constant 0 : index
    %c0_8 = arith.constant 0 : index
    %c0_9 = arith.constant 0 : index
    %7 = vector.load %arg5[%c0_6, %c0_7, %c0_8, %c0_9] : memref<1x1x32x144xbf16, #tpu.memory_space<vmem>>, vector<1x1x32x144xbf16>
    %8 = vector.shape_cast %7 : vector<1x1x32x144xbf16> to vector<32x144xbf16>
    %9 = vector.shape_cast %6 : vector<32x144xbf16> to vector<1x1x32x144xbf16>
    tpu.vector_store %arg5[%c0_6, %c0_7, %c0_8, %c0_9], %9 {strides = array<i32>} : memref<1x1x32x144xbf16, #tpu.memory_space<vmem>>, vector<1x1x32x144xbf16>,
    %10 = arith.truncf %4 : vector<64x144xf32> to vector<64x144xbf16>
    %c0_10 = arith.constant 0 : index
    %c0_11 = arith.constant 0 : index
    %11 = vector.load %arg4[%c0_10, %c0_11] : memref<144x200xbf16, #tpu.memory_space<vmem>>, vector<144x200xbf16>
    %cst_12 = arith.constant dense<0.000000e+00> : vector<64x200xf32>
    %12 = tpu.matmul %10, %11, %cst_12 {dimension_numbers = #tpu.dot_dimension_numbers<[1], [0], [0], [1], [0, 0, 1, 1], [], []>} : vector<64x144xbf16>, vector<144x200xbf16>, vector<64x200xf32> -> vector<64x200xf32>
    %c0_13 = arith.constant 0 : index
    %c0_14 = arith.constant 0 : index
    %c0_15 = arith.constant 0 : index
    %c0_16 = arith.constant 0 : index
    %13 = vector.load %arg6[%c0_13, %c0_14, %c0_15, %c0_16] : memref<1x1x64x200xf32, #tpu.memory_space<vmem>>, vector<1x1x64x200xf32>
    %14 = vector.shape_cast %13 : vector<1x1x64x200xf32> to vector<64x200xf32>
    %15 = vector.shape_cast %12 : vector<64x200xf32> to vector<1x1x64x200xf32>
    tpu.vector_store %arg6[%c0_13, %c0_14, %c0_15, %c0_16], %15 {strides = array<i32>} : memref<1x1x64x200xf32, #tpu.memory_space<vmem>>, vector<1x1x64x200xf32>,
    return
  }
  func.func @transform_0(%arg0: i32, %arg1: i32) -> (i32, i32, i32, i32) {
    %c0_i32 = arith.constant 0 : i32
    %c0_i32_0 = arith.constant 0 : i32
    %c0_i32_1 = arith.constant 0 : i32
    return %arg0, %arg1, %c0_i32, %c0_i32_0 : i32, i32, i32, i32
  }
  func.func @transform_1(%arg0: i32, %arg1: i32) -> (i32, i32, i32) {
    %c0_i32 = arith.constant 0 : i32
    %c0_i32_0 = arith.constant 0 : i32
    %c0_i32_1 = arith.constant 0 : i32
    return %arg0, %c0_i32, %c0_i32_0 : i32, i32, i32
  }
  func.func @transform_2(%arg0: i32, %arg1: i32) -> (i32, i32) {
    %c0_i32 = arith.constant 0 : i32
    %c0_i32_0 = arith.constant 0 : i32
    %c0_i32_1 = arith.constant 0 : i32
    return %c0_i32, %c0_i32_0 : i32, i32
  }
  func.func @transform_3(%arg0: i32, %arg1: i32) -> (i32, i32, i32, i32) {
    %c0_i32 = arith.constant 0 : i32
    %c0_i32_0 = arith.constant 0 : i32
    %c0_i32_1 = arith.constant 0 : i32
    return %arg0, %arg1, %c0_i32, %c0_i32_0 : i32, i32, i32, i32
  }
  func.func @transform_4(%arg0: i32, %arg1: i32) -> (i32, i32, i32, i32) {
    %c0_i32 = arith.constant 0 : i32
    %c0_i32_0 = arith.constant 0 : i32
    %c0_i32_1 = arith.constant 0 : i32
    return %arg0, %arg1, %c0_i32, %c0_i32_0 : i32, i32, i32, i32
  }
}

module attributes {stable_mosaic.version = 11 : i64} {
  func.func @_attn_out_kernel(%arg0: i32, %arg1: i32, %arg2: memref<1x1x2x16x144xbf16, #tpu.memory_space<vmem>>, %arg3: memref<1x1x2x200x16xbf16, #tpu.memory_space<vmem>>, %arg4: memref<1x1x2x16x200xbf16, #tpu.memory_space<vmem>>, %arg5: memref<32x32xbf16, #tpu.memory_space<vmem>>, %arg6: memref<32x9xf32, #tpu.memory_space<vmem>>, %arg7: memref<32x32xbf16, #tpu.memory_space<vmem>>, %arg8: memref<9x144x144xbf16, #tpu.memory_space<vmem>>, %arg9: memref<1x1x32x144xf32, #tpu.memory_space<vmem>>, %arg10: memref<32x144xbf16, #tpu.memory_space<vmem>>) attributes {dimension_semantics = [#tpu.dimension_semantics<parallel>, #tpu.dimension_semantics<parallel>], iteration_bounds = array<i64: 2, 2>, scalar_prefetch = 0 : i64, scratch_operands = 1 : i64, tpu.core_type = #tpu.core_type<tc>, window_params = [{transform_indices = @transform_0, window_bounds = array<i64: 1, 1, 2, 16, 144>}, {transform_indices = @transform_1, window_bounds = array<i64: 1, 1, 2, 200, 16>}, {transform_indices = @transform_2, window_bounds = array<i64: 1, 1, 2, 16, 200>}, {pipeline_mode = #tpu.pipeline_mode<synchronous>, transform_indices = @transform_3, window_bounds = array<i64: 32, 32>}, {pipeline_mode = #tpu.pipeline_mode<synchronous>, transform_indices = @transform_4, window_bounds = array<i64: 32, 9>}, {pipeline_mode = #tpu.pipeline_mode<synchronous>, transform_indices = @transform_5, window_bounds = array<i64: 32, 32>}, {pipeline_mode = #tpu.pipeline_mode<synchronous>, transform_indices = @transform_6, window_bounds = array<i64: 9, 144, 144>}, {transform_indices = @transform_7, window_bounds = array<i64: 1, 1, 32, 144>}]} {
    %c0 = arith.constant 0 : index
    %c0_0 = arith.constant 0 : index
    %c0_1 = arith.constant 0 : index
    %c0_2 = arith.constant 0 : index
    %c0_3 = arith.constant 0 : index
    %0 = vector.load %arg2[%c0, %c0_0, %c0_1, %c0_2, %c0_3] : memref<1x1x2x16x144xbf16, #tpu.memory_space<vmem>>, vector<1x1x1x16x144xbf16>
    %1 = vector.shape_cast %0 : vector<1x1x1x16x144xbf16> to vector<16x144xbf16>
    %cst = arith.constant 2.500000e-01 : bf16
    %2 = vector.broadcast %cst : bf16 to vector<16x144xbf16>
    %3 = arith.mulf %1, %2 : vector<16x144xbf16>
    %c0_4 = arith.constant 0 : index
    %c0_5 = arith.constant 0 : index
    %c0_6 = arith.constant 0 : index
    %c0_7 = arith.constant 0 : index
    %c0_8 = arith.constant 0 : index
    %4 = vector.load %arg3[%c0_4, %c0_5, %c0_6, %c0_7, %c0_8] : memref<1x1x2x200x16xbf16, #tpu.memory_space<vmem>>, vector<1x1x1x200x16xbf16>
    %5 = vector.shape_cast %4 : vector<1x1x1x200x16xbf16> to vector<200x16xbf16>
    %cst_9 = arith.constant dense<0.000000e+00> : vector<200x144xf32>
    %6 = tpu.matmul %5, %3, %cst_9 {dimension_numbers = #tpu.dot_dimension_numbers<[1], [0], [0], [1], [0, 0, 1, 1], [], []>} : vector<200x16xbf16>, vector<16x144xbf16>, vector<200x144xf32> -> vector<200x144xf32>
    %cst_10 = arith.constant dense<0xFF800000> : vector<144xf32>
    %7 = vector.multi_reduction <maximumf>, %6, %cst_10 [0] : vector<200x144xf32> to vector<144xf32>
    %8 = vector.shape_cast %7 : vector<144xf32> to vector<1x144xf32>
    %9 = vector.broadcast %8 : vector<1x144xf32> to vector<200x144xf32>
    %10 = arith.subf %6, %9 : vector<200x144xf32>
    %11 = math.exp %10 : vector<200x144xf32>
    %cst_11 = arith.constant dense<0.000000e+00> : vector<144xf32>
    %12 = vector.multi_reduction <add>, %11, %cst_11 [0] : vector<200x144xf32> to vector<144xf32>
    %13 = vector.shape_cast %12 : vector<144xf32> to vector<1x144xf32>
    %14 = tpu.reciprocal %13 {approx = true} : vector<1x144xf32> -> vector<1x144xf32>
    %15 = vector.broadcast %14 : vector<1x144xf32> to vector<200x144xf32>
    %16 = arith.mulf %11, %15 : vector<200x144xf32>
    %c0_12 = arith.constant 0 : index
    %c0_13 = arith.constant 0 : index
    %c0_14 = arith.constant 0 : index
    %c0_15 = arith.constant 0 : index
    %c0_16 = arith.constant 0 : index
    %17 = vector.load %arg4[%c0_12, %c0_13, %c0_14, %c0_15, %c0_16] : memref<1x1x2x16x200xbf16, #tpu.memory_space<vmem>>, vector<1x1x1x16x200xbf16>
    %18 = vector.shape_cast %17 : vector<1x1x1x16x200xbf16> to vector<16x200xbf16>
    %19 = arith.truncf %16 : vector<200x144xf32> to vector<200x144xbf16>
    %cst_17 = arith.constant dense<0.000000e+00> : vector<16x144xf32>
    %20 = tpu.matmul %18, %19, %cst_17 {dimension_numbers = #tpu.dot_dimension_numbers<[1], [0], [0], [1], [0, 0, 1, 1], [], []>} : vector<16x200xbf16>, vector<200x144xbf16>, vector<16x144xf32> -> vector<16x144xf32>
    %21 = arith.truncf %20 : vector<16x144xf32> to vector<16x144xbf16>
    %c0_18 = arith.constant 0 : index
    %c0_19 = arith.constant 0 : index
    %22 = vector.load %arg10[%c0_18, %c0_19] : memref<32x144xbf16, #tpu.memory_space<vmem>>, vector<16x144xbf16>
    tpu.vector_store %arg10[%c0_18, %c0_19], %21 {strides = array<i32>} : memref<32x144xbf16, #tpu.memory_space<vmem>>, vector<16x144xbf16>,
    %c0_20 = arith.constant 0 : index
    %c0_21 = arith.constant 0 : index
    %c1 = arith.constant 1 : index
    %c0_22 = arith.constant 0 : index
    %c0_23 = arith.constant 0 : index
    %23 = vector.load %arg2[%c0_20, %c0_21, %c1, %c0_22, %c0_23] : memref<1x1x2x16x144xbf16, #tpu.memory_space<vmem>>, vector<1x1x1x16x144xbf16>
    %24 = vector.shape_cast %23 : vector<1x1x1x16x144xbf16> to vector<16x144xbf16>
    %cst_24 = arith.constant 2.500000e-01 : bf16
    %25 = vector.broadcast %cst_24 : bf16 to vector<16x144xbf16>
    %26 = arith.mulf %24, %25 : vector<16x144xbf16>
    %c0_25 = arith.constant 0 : index
    %c0_26 = arith.constant 0 : index
    %c1_27 = arith.constant 1 : index
    %c0_28 = arith.constant 0 : index
    %c0_29 = arith.constant 0 : index
    %27 = vector.load %arg3[%c0_25, %c0_26, %c1_27, %c0_28, %c0_29] : memref<1x1x2x200x16xbf16, #tpu.memory_space<vmem>>, vector<1x1x1x200x16xbf16>
    %28 = vector.shape_cast %27 : vector<1x1x1x200x16xbf16> to vector<200x16xbf16>
    %cst_30 = arith.constant dense<0.000000e+00> : vector<200x144xf32>
    %29 = tpu.matmul %28, %26, %cst_30 {dimension_numbers = #tpu.dot_dimension_numbers<[1], [0], [0], [1], [0, 0, 1, 1], [], []>} : vector<200x16xbf16>, vector<16x144xbf16>, vector<200x144xf32> -> vector<200x144xf32>
    %cst_31 = arith.constant dense<0xFF800000> : vector<144xf32>
    %30 = vector.multi_reduction <maximumf>, %29, %cst_31 [0] : vector<200x144xf32> to vector<144xf32>
    %31 = vector.shape_cast %30 : vector<144xf32> to vector<1x144xf32>
    %32 = vector.broadcast %31 : vector<1x144xf32> to vector<200x144xf32>
    %33 = arith.subf %29, %32 : vector<200x144xf32>
    %34 = math.exp %33 : vector<200x144xf32>
    %cst_32 = arith.constant dense<0.000000e+00> : vector<144xf32>
    %35 = vector.multi_reduction <add>, %34, %cst_32 [0] : vector<200x144xf32> to vector<144xf32>
    %36 = vector.shape_cast %35 : vector<144xf32> to vector<1x144xf32>
    %37 = tpu.reciprocal %36 {approx = true} : vector<1x144xf32> -> vector<1x144xf32>
    %38 = vector.broadcast %37 : vector<1x144xf32> to vector<200x144xf32>
    %39 = arith.mulf %34, %38 : vector<200x144xf32>
    %c0_33 = arith.constant 0 : index
    %c0_34 = arith.constant 0 : index
    %c1_35 = arith.constant 1 : index
    %c0_36 = arith.constant 0 : index
    %c0_37 = arith.constant 0 : index
    %40 = vector.load %arg4[%c0_33, %c0_34, %c1_35, %c0_36, %c0_37] : memref<1x1x2x16x200xbf16, #tpu.memory_space<vmem>>, vector<1x1x1x16x200xbf16>
    %41 = vector.shape_cast %40 : vector<1x1x1x16x200xbf16> to vector<16x200xbf16>
    %42 = arith.truncf %39 : vector<200x144xf32> to vector<200x144xbf16>
    %cst_38 = arith.constant dense<0.000000e+00> : vector<16x144xf32>
    %43 = tpu.matmul %41, %42, %cst_38 {dimension_numbers = #tpu.dot_dimension_numbers<[1], [0], [0], [1], [0, 0, 1, 1], [], []>} : vector<16x200xbf16>, vector<200x144xbf16>, vector<16x144xf32> -> vector<16x144xf32>
    %44 = arith.truncf %43 : vector<16x144xf32> to vector<16x144xbf16>
    %c16 = arith.constant 16 : index
    %c0_39 = arith.constant 0 : index
    %45 = vector.load %arg10[%c16, %c0_39] : memref<32x144xbf16, #tpu.memory_space<vmem>>, vector<16x144xbf16>
    tpu.vector_store %arg10[%c16, %c0_39], %44 {strides = array<i32>} : memref<32x144xbf16, #tpu.memory_space<vmem>>, vector<16x144xbf16>,
    %c0_40 = arith.constant 0 : index
    %c0_41 = arith.constant 0 : index
    %46 = vector.load %arg10[%c0_40, %c0_41] : memref<32x144xbf16, #tpu.memory_space<vmem>>, vector<32x144xbf16>
    %c0_42 = arith.constant 0 : index
    %c0_43 = arith.constant 0 : index
    %47 = vector.load %arg5[%c0_42, %c0_43] : memref<32x32xbf16, #tpu.memory_space<vmem>>, vector<32x32xbf16>
    %cst_44 = arith.constant dense<0.000000e+00> : vector<32x144xf32>
    %48 = tpu.matmul %47, %46, %cst_44 {dimension_numbers = #tpu.dot_dimension_numbers<[1], [0], [0], [1], [0, 0, 1, 1], [], []>} : vector<32x32xbf16>, vector<32x144xbf16>, vector<32x144xf32> -> vector<32x144xf32>
    %49 = arith.truncf %48 : vector<32x144xf32> to vector<32x144xbf16>
    %cst_45 = arith.constant 0.000000e+00 : f32
    %50 = vector.broadcast %cst_45 : f32 to vector<32x144xf32>
    %c0_46 = arith.constant 0 : index
    %c0_47 = arith.constant 0 : index
    %51 = vector.load %arg6[%c0_46, %c0_47] : memref<32x9xf32, #tpu.memory_space<vmem>>, vector<32x1xf32>
    %c0_48 = arith.constant 0 : index
    %c0_49 = arith.constant 0 : index
    %c0_50 = arith.constant 0 : index
    %52 = vector.load %arg8[%c0_48, %c0_49, %c0_50] : memref<9x144x144xbf16, #tpu.memory_space<vmem>>, vector<1x144x144xbf16>
    %53 = vector.shape_cast %52 : vector<1x144x144xbf16> to vector<144x144xbf16>
    %cst_51 = arith.constant dense<0.000000e+00> : vector<32x144xf32>
    %54 = tpu.matmul %49, %53, %cst_51 {dimension_numbers = #tpu.dot_dimension_numbers<[1], [0], [0], [1], [0, 0, 1, 1], [], []>} : vector<32x144xbf16>, vector<144x144xbf16>, vector<32x144xf32> -> vector<32x144xf32>
    %55 = vector.broadcast %51 : vector<32x1xf32> to vector<32x144xf32>
    %56 = arith.mulf %55, %54 : vector<32x144xf32>
    %57 = arith.addf %50, %56 : vector<32x144xf32>
    %c0_52 = arith.constant 0 : index
    %c1_53 = arith.constant 1 : index
    %58 = vector.load %arg6[%c0_52, %c1_53] : memref<32x9xf32, #tpu.memory_space<vmem>>, vector<32x1xf32>
    %c1_54 = arith.constant 1 : index
    %c0_55 = arith.constant 0 : index
    %c0_56 = arith.constant 0 : index
    %59 = vector.load %arg8[%c1_54, %c0_55, %c0_56] : memref<9x144x144xbf16, #tpu.memory_space<vmem>>, vector<1x144x144xbf16>
    %60 = vector.shape_cast %59 : vector<1x144x144xbf16> to vector<144x144xbf16>
    %cst_57 = arith.constant dense<0.000000e+00> : vector<32x144xf32>
    %61 = tpu.matmul %49, %60, %cst_57 {dimension_numbers = #tpu.dot_dimension_numbers<[1], [0], [0], [1], [0, 0, 1, 1], [], []>} : vector<32x144xbf16>, vector<144x144xbf16>, vector<32x144xf32> -> vector<32x144xf32>
    %62 = vector.broadcast %58 : vector<32x1xf32> to vector<32x144xf32>
    %63 = arith.mulf %62, %61 : vector<32x144xf32>
    %64 = arith.addf %57, %63 : vector<32x144xf32>
    %c0_58 = arith.constant 0 : index
    %c2 = arith.constant 2 : index
    %65 = vector.load %arg6[%c0_58, %c2] : memref<32x9xf32, #tpu.memory_space<vmem>>, vector<32x1xf32>
    %c2_59 = arith.constant 2 : index
    %c0_60 = arith.constant 0 : index
    %c0_61 = arith.constant 0 : index
    %66 = vector.load %arg8[%c2_59, %c0_60, %c0_61] : memref<9x144x144xbf16, #tpu.memory_space<vmem>>, vector<1x144x144xbf16>
    %67 = vector.shape_cast %66 : vector<1x144x144xbf16> to vector<144x144xbf16>
    %cst_62 = arith.constant dense<0.000000e+00> : vector<32x144xf32>
    %68 = tpu.matmul %49, %67, %cst_62 {dimension_numbers = #tpu.dot_dimension_numbers<[1], [0], [0], [1], [0, 0, 1, 1], [], []>} : vector<32x144xbf16>, vector<144x144xbf16>, vector<32x144xf32> -> vector<32x144xf32>
    %69 = vector.broadcast %65 : vector<32x1xf32> to vector<32x144xf32>
    %70 = arith.mulf %69, %68 : vector<32x144xf32>
    %71 = arith.addf %64, %70 : vector<32x144xf32>
    %c0_63 = arith.constant 0 : index
    %c3 = arith.constant 3 : index
    %72 = vector.load %arg6[%c0_63, %c3] : memref<32x9xf32, #tpu.memory_space<vmem>>, vector<32x1xf32>
    %c3_64 = arith.constant 3 : index
    %c0_65 = arith.constant 0 : index
    %c0_66 = arith.constant 0 : index
    %73 = vector.load %arg8[%c3_64, %c0_65, %c0_66] : memref<9x144x144xbf16, #tpu.memory_space<vmem>>, vector<1x144x144xbf16>
    %74 = vector.shape_cast %73 : vector<1x144x144xbf16> to vector<144x144xbf16>
    %cst_67 = arith.constant dense<0.000000e+00> : vector<32x144xf32>
    %75 = tpu.matmul %49, %74, %cst_67 {dimension_numbers = #tpu.dot_dimension_numbers<[1], [0], [0], [1], [0, 0, 1, 1], [], []>} : vector<32x144xbf16>, vector<144x144xbf16>, vector<32x144xf32> -> vector<32x144xf32>
    %76 = vector.broadcast %72 : vector<32x1xf32> to vector<32x144xf32>
    %77 = arith.mulf %76, %75 : vector<32x144xf32>
    %78 = arith.addf %71, %77 : vector<32x144xf32>
    %c0_68 = arith.constant 0 : index
    %c4 = arith.constant 4 : index
    %79 = vector.load %arg6[%c0_68, %c4] : memref<32x9xf32, #tpu.memory_space<vmem>>, vector<32x1xf32>
    %c4_69 = arith.constant 4 : index
    %c0_70 = arith.constant 0 : index
    %c0_71 = arith.constant 0 : index
    %80 = vector.load %arg8[%c4_69, %c0_70, %c0_71] : memref<9x144x144xbf16, #tpu.memory_space<vmem>>, vector<1x144x144xbf16>
    %81 = vector.shape_cast %80 : vector<1x144x144xbf16> to vector<144x144xbf16>
    %cst_72 = arith.constant dense<0.000000e+00> : vector<32x144xf32>
    %82 = tpu.matmul %49, %81, %cst_72 {dimension_numbers = #tpu.dot_dimension_numbers<[1], [0], [0], [1], [0, 0, 1, 1], [], []>} : vector<32x144xbf16>, vector<144x144xbf16>, vector<32x144xf32> -> vector<32x144xf32>
    %83 = vector.broadcast %79 : vector<32x1xf32> to vector<32x144xf32>
    %84 = arith.mulf %83, %82 : vector<32x144xf32>
    %85 = arith.addf %78, %84 : vector<32x144xf32>
    %c0_73 = arith.constant 0 : index
    %c5 = arith.constant 5 : index
    %86 = vector.load %arg6[%c0_73, %c5] : memref<32x9xf32, #tpu.memory_space<vmem>>, vector<32x1xf32>
    %c5_74 = arith.constant 5 : index
    %c0_75 = arith.constant 0 : index
    %c0_76 = arith.constant 0 : index
    %87 = vector.load %arg8[%c5_74, %c0_75, %c0_76] : memref<9x144x144xbf16, #tpu.memory_space<vmem>>, vector<1x144x144xbf16>
    %88 = vector.shape_cast %87 : vector<1x144x144xbf16> to vector<144x144xbf16>
    %cst_77 = arith.constant dense<0.000000e+00> : vector<32x144xf32>
    %89 = tpu.matmul %49, %88, %cst_77 {dimension_numbers = #tpu.dot_dimension_numbers<[1], [0], [0], [1], [0, 0, 1, 1], [], []>} : vector<32x144xbf16>, vector<144x144xbf16>, vector<32x144xf32> -> vector<32x144xf32>
    %90 = vector.broadcast %86 : vector<32x1xf32> to vector<32x144xf32>
    %91 = arith.mulf %90, %89 : vector<32x144xf32>
    %92 = arith.addf %85, %91 : vector<32x144xf32>
    %c0_78 = arith.constant 0 : index
    %c6 = arith.constant 6 : index
    %93 = vector.load %arg6[%c0_78, %c6] : memref<32x9xf32, #tpu.memory_space<vmem>>, vector<32x1xf32>
    %c6_79 = arith.constant 6 : index
    %c0_80 = arith.constant 0 : index
    %c0_81 = arith.constant 0 : index
    %94 = vector.load %arg8[%c6_79, %c0_80, %c0_81] : memref<9x144x144xbf16, #tpu.memory_space<vmem>>, vector<1x144x144xbf16>
    %95 = vector.shape_cast %94 : vector<1x144x144xbf16> to vector<144x144xbf16>
    %cst_82 = arith.constant dense<0.000000e+00> : vector<32x144xf32>
    %96 = tpu.matmul %49, %95, %cst_82 {dimension_numbers = #tpu.dot_dimension_numbers<[1], [0], [0], [1], [0, 0, 1, 1], [], []>} : vector<32x144xbf16>, vector<144x144xbf16>, vector<32x144xf32> -> vector<32x144xf32>
    %97 = vector.broadcast %93 : vector<32x1xf32> to vector<32x144xf32>
    %98 = arith.mulf %97, %96 : vector<32x144xf32>
    %99 = arith.addf %92, %98 : vector<32x144xf32>
    %c0_83 = arith.constant 0 : index
    %c7 = arith.constant 7 : index
    %100 = vector.load %arg6[%c0_83, %c7] : memref<32x9xf32, #tpu.memory_space<vmem>>, vector<32x1xf32>
    %c7_84 = arith.constant 7 : index
    %c0_85 = arith.constant 0 : index
    %c0_86 = arith.constant 0 : index
    %101 = vector.load %arg8[%c7_84, %c0_85, %c0_86] : memref<9x144x144xbf16, #tpu.memory_space<vmem>>, vector<1x144x144xbf16>
    %102 = vector.shape_cast %101 : vector<1x144x144xbf16> to vector<144x144xbf16>
    %cst_87 = arith.constant dense<0.000000e+00> : vector<32x144xf32>
    %103 = tpu.matmul %49, %102, %cst_87 {dimension_numbers = #tpu.dot_dimension_numbers<[1], [0], [0], [1], [0, 0, 1, 1], [], []>} : vector<32x144xbf16>, vector<144x144xbf16>, vector<32x144xf32> -> vector<32x144xf32>
    %104 = vector.broadcast %100 : vector<32x1xf32> to vector<32x144xf32>
    %105 = arith.mulf %104, %103 : vector<32x144xf32>
    %106 = arith.addf %99, %105 : vector<32x144xf32>
    %c0_88 = arith.constant 0 : index
    %c8 = arith.constant 8 : index
    %107 = vector.load %arg6[%c0_88, %c8] : memref<32x9xf32, #tpu.memory_space<vmem>>, vector<32x1xf32>
    %c8_89 = arith.constant 8 : index
    %c0_90 = arith.constant 0 : index
    %c0_91 = arith.constant 0 : index
    %108 = vector.load %arg8[%c8_89, %c0_90, %c0_91] : memref<9x144x144xbf16, #tpu.memory_space<vmem>>, vector<1x144x144xbf16>
    %109 = vector.shape_cast %108 : vector<1x144x144xbf16> to vector<144x144xbf16>
    %cst_92 = arith.constant dense<0.000000e+00> : vector<32x144xf32>
    %110 = tpu.matmul %49, %109, %cst_92 {dimension_numbers = #tpu.dot_dimension_numbers<[1], [0], [0], [1], [0, 0, 1, 1], [], []>} : vector<32x144xbf16>, vector<144x144xbf16>, vector<32x144xf32> -> vector<32x144xf32>
    %111 = vector.broadcast %107 : vector<32x1xf32> to vector<32x144xf32>
    %112 = arith.mulf %111, %110 : vector<32x144xf32>
    %113 = arith.addf %106, %112 : vector<32x144xf32>
    %c0_93 = arith.constant 0 : index
    %c0_94 = arith.constant 0 : index
    %114 = vector.load %arg7[%c0_93, %c0_94] : memref<32x32xbf16, #tpu.memory_space<vmem>>, vector<32x32xbf16>
    %115 = arith.truncf %113 : vector<32x144xf32> to vector<32x144xbf16>
    %cst_95 = arith.constant dense<0.000000e+00> : vector<32x144xf32>
    %116 = tpu.matmul %114, %115, %cst_95 {dimension_numbers = #tpu.dot_dimension_numbers<[1], [0], [0], [1], [0, 0, 1, 1], [], []>} : vector<32x32xbf16>, vector<32x144xbf16>, vector<32x144xf32> -> vector<32x144xf32>
    %c0_96 = arith.constant 0 : index
    %c0_97 = arith.constant 0 : index
    %c0_98 = arith.constant 0 : index
    %c0_99 = arith.constant 0 : index
    %117 = vector.load %arg9[%c0_96, %c0_97, %c0_98, %c0_99] : memref<1x1x32x144xf32, #tpu.memory_space<vmem>>, vector<1x1x32x144xf32>
    %118 = vector.shape_cast %117 : vector<1x1x32x144xf32> to vector<32x144xf32>
    %119 = vector.shape_cast %116 : vector<32x144xf32> to vector<1x1x32x144xf32>
    tpu.vector_store %arg9[%c0_96, %c0_97, %c0_98, %c0_99], %119 {strides = array<i32>} : memref<1x1x32x144xf32, #tpu.memory_space<vmem>>, vector<1x1x32x144xf32>,
    return
  }
  func.func @transform_0(%arg0: i32, %arg1: i32) -> (i32, i32, i32, i32, i32) {
    %c0_i32 = arith.constant 0 : i32
    %c0_i32_0 = arith.constant 0 : i32
    %c0_i32_1 = arith.constant 0 : i32
    %c0_i32_2 = arith.constant 0 : i32
    return %arg0, %arg1, %c0_i32, %c0_i32_0, %c0_i32_1 : i32, i32, i32, i32, i32
  }
  func.func @transform_1(%arg0: i32, %arg1: i32) -> (i32, i32, i32, i32, i32) {
    %c0_i32 = arith.constant 0 : i32
    %c0_i32_0 = arith.constant 0 : i32
    %c0_i32_1 = arith.constant 0 : i32
    %c0_i32_2 = arith.constant 0 : i32
    return %arg0, %arg1, %c0_i32, %c0_i32_0, %c0_i32_1 : i32, i32, i32, i32, i32
  }
  func.func @transform_2(%arg0: i32, %arg1: i32) -> (i32, i32, i32, i32, i32) {
    %c0_i32 = arith.constant 0 : i32
    %c0_i32_0 = arith.constant 0 : i32
    %c0_i32_1 = arith.constant 0 : i32
    %c0_i32_2 = arith.constant 0 : i32
    return %arg0, %arg1, %c0_i32, %c0_i32_0, %c0_i32_1 : i32, i32, i32, i32, i32
  }
  func.func @transform_3(%arg0: i32, %arg1: i32) -> (i32, i32) {
    %c0_i32 = arith.constant 0 : i32
    %c0_i32_0 = arith.constant 0 : i32
    %c0_i32_1 = arith.constant 0 : i32
    return %c0_i32, %c0_i32_0 : i32, i32
  }
  func.func @transform_4(%arg0: i32, %arg1: i32) -> (i32, i32) {
    %c0_i32 = arith.constant 0 : i32
    %c0_i32_0 = arith.constant 0 : i32
    %c0_i32_1 = arith.constant 0 : i32
    return %c0_i32, %c0_i32_0 : i32, i32
  }
  func.func @transform_5(%arg0: i32, %arg1: i32) -> (i32, i32) {
    %c0_i32 = arith.constant 0 : i32
    %c0_i32_0 = arith.constant 0 : i32
    %c0_i32_1 = arith.constant 0 : i32
    return %c0_i32, %c0_i32_0 : i32, i32
  }
  func.func @transform_6(%arg0: i32, %arg1: i32) -> (i32, i32, i32) {
    %c0_i32 = arith.constant 0 : i32
    %c0_i32_0 = arith.constant 0 : i32
    %c0_i32_1 = arith.constant 0 : i32
    %c0_i32_2 = arith.constant 0 : i32
    return %c0_i32, %c0_i32_0, %c0_i32_1 : i32, i32, i32
  }
  func.func @transform_7(%arg0: i32, %arg1: i32) -> (i32, i32, i32, i32) {
    %c0_i32 = arith.constant 0 : i32
    %c0_i32_0 = arith.constant 0 : i32
    %c0_i32_1 = arith.constant 0 : i32
    return %arg0, %arg1, %c0_i32, %c0_i32_0 : i32, i32, i32, i32
  }
}

</mosaic_0001>

<bundles_post_ra>
// kernel: glo_skip_attention_forward.2
= control target key start
LH: loop header
LB: loop body
LE: loop exit
PB: predicated region body
PF: predicated region fallthrough
CT: control target
= control target key end

     0   :  { %s1045_s15 = smov 0   ;;  %s1047_s16 = smov 0   ;;  %s1222_s0 = inlined_call_operand.vmem [shape: bf16[2,2,32,144], index: 0, kind: input, shape index: {}]   ;;  %s1223_s1 = inlined_call_operand.vmem [shape: bf16[2,64,32], index: 1, kind: input, shape index: {}]   ;;  %s1224_s2 = inlined_call_operand.vmem [shape: bf16[144,200], index: 2, kind: input, shape index: {}]   ;;  %s1225_s3 = inlined_call_operand.vmem [shape: bf16[2,2,32,144], index: 3, kind: output, shape index: {0}]   ;;  %s1226_s4 = inlined_call_operand.vmem [shape: f32[2,2,64,200], index: 4, kind: output, shape index: {1}]  }
   0x1   :  { %s1049_s17 = smov 0   ;;  %s1051_s18 = smov 0  }
   0x2   :  { %s1053_s19 = smov 0  }
   0x3 LB: > { %s24_s20 = sadd.s32 1, %s1009_s17  ;;  %s27_s21 = sadd.s32 1, %s1013_s18  ;;  %s1017_s19 = sphi %s1053_s19, %s15_s19   ;;  %s1013_s18 = sphi %s1051_s18, %s1232_s18   ;;  %s1009_s17 = sphi %s1049_s17, %s1231_s17   ;;  %s1005_s16 = sphi %s1047_s16, %s1230_s16   ;;  %s1001_s15 = sphi %s1045_s15, %s1229_s15  }
   0x4   : > { %p25_p0 = scmp.ge.s32.totalorder %s24_s20, 2  ;;  %p826_p1 = scmp.ge.s32.totalorder %s1017_s19, 1 }
   0x5   : > { %p197_p2 = scmp.lt.s32.totalorder %s1017_s19, 5 }
   0x6   : > { %s1234_s20 = smov (%p25_p0, %s24_s20), 0  ;;  %s1236_s21 = smov (!%p25_p0, %s27_s21), %s1013_s18 }
   0x7   : > { %p198_p3 = pnand %p826_p1, %p197_p2  ;;  %p29_p4 = scmp.ge.s32.totalorder %s1236_s21, 2 }
   0x8   : > { %p245_p5 = scmp.lt.s32.totalorder (!%p198_p3), %s1005_s16, 1  ;;  %p247_p6 = scmp.lt.s32.totalorder (!%p198_p3), %s1001_s15, 1  ;;  %v1019_v0 = vmov (!%p198_p3), 0   ;;  %v954_v1 = vld [vmem:[%s1224_s2 + $0x4] ss:$8 sps:$4 sm:$0xff] (!%p198_p3)   ;;  %vm330_vm0 = vcmask (!%p198_p3), 261120  }
   0x9   : > { %s1238_s21 = smov (%p29_p4, %s1236_s21), 0  ;;  %201 = sbr.rel (%p198_p3) target bundleno = 489 (0x1e9), region = 32 }
   0xa   : > { %375 = vmatprep.mubr.bf16.mxu0 (!%p198_p3), %v1019_v0  ;;  %v952_v2 = vld [vmem:[%s1224_s2] ss:$8 sps:$4 sm:$0xff] (!%p198_p3)   ;;  %v957_v3 = vld [vmem:[%s1224_s2 + $0x14] ss:$8 sps:$4 sm:$0xff] (!%p198_p3)   ;;  %883 = vmatprep.subr.bf16.mxu1 (!%p198_p3), %v954_v1  ;;  %v955_v4 = vld [vmem:[%s1224_s2 + $0x10] ss:$8 sps:$4 sm:$0xff] (!%p198_p3)  }
   0xb   : > { %892 = vmatpush1.bf16.msra.mxu1 (!%p198_p3), %v952_v2  ;;  %v960_v5 = vld [vmem:[%s1224_s2 + $0x24] ss:$8 sps:$4 sm:$0xff] (!%p198_p3)   ;;  %v958_v6 = vld [vmem:[%s1224_s2 + $0x20] ss:$8 sps:$4 sm:$0xff] (!%p198_p3)   ;;  %v963_v10 = vld [vmem:[%s1224_s2 + $0x34] ss:$8 sps:$4 sm:$0xff] (!%p198_p3)  }
   0xc   : > { %884 = vmatprep.subr.bf16.mxu1 (!%p198_p3), %v957_v3  ;;  %v961_v13 = vld [vmem:[%s1224_s2 + $0x30] ss:$8 sps:$4 sm:$0xff] (!%p198_p3)   ;;  %v966_v14 = vld [vmem:[%s1224_s2 + $0x44] ss:$8 sps:$4 sm:$0xff] (!%p198_p3)   ;;  %v964_v15 = vld [vmem:[%s1224_s2 + $0x40] ss:$8 sps:$4 sm:$0xff] (!%p198_p3)  }
   0xd   : > { %v969_v16 = vld [vmem:[%s1224_s2 + $0x54] ss:$8 sps:$4 sm:$0xff] (!%p198_p3)   ;;  %v967_v18 = vld [vmem:[%s1224_s2 + $0x50] ss:$8 sps:$4 sm:$0xff] (!%p198_p3)   ;;  %v972_v19 = vld [vmem:[%s1224_s2 + $0x64] ss:$8 sps:$4 sm:$0xff] (!%p198_p3)  }
   0xe   : > { %v970_v20 = vld [vmem:[%s1224_s2 + $0x60] ss:$8 sps:$4 sm:$0xff] (!%p198_p3)   ;;  %v975_v21 = vld [vmem:[%s1224_s2 + $0x74] ss:$8 sps:$4 sm:$0xff] (!%p198_p3)   ;;  %v973_v23 = vld [vmem:[%s1224_s2 + $0x70] ss:$8 sps:$4 sm:$0xff] (!%p198_p3)  }
   0xf   : > { %893 = vmatpush1.bf16.msra.mxu1 (!%p198_p3), %v955_v4  ;;  %v978_v25 = vld [vmem:[%s1224_s2 + $0x84] ss:$8 sps:$4 sm:$0xff] (!%p198_p3)   ;;  %v976_v26 = vld [vmem:[%s1224_s2 + $0x80] ss:$8 sps:$4 sm:$0xff] (!%p198_p3)   ;;  %vm440_vm1 = vcmask (!%p198_p3), 1043456   ;;  %vm441_vm2 = vcmask (!%p198_p3), 130052  }
  0x10   : > { %s1240_s16 = smov (!%p245_p5, %s1005_s16), 1  ;;  %s1242_s15 = smov (!%p247_p6, %s1001_s15), 1  ;;  %885 = vmatprep.subr.bf16.mxu1 %v960_v5  ;;  %vm1161_vm3 = vmor %vm441_vm2, %vm440_vm1  ;;  %vm559_vm4 = vcmask 130048   ;;  %vm646_vm5 = vcmask 588800  }
  0x11   : > { %s828_s28 = sshll.u32 %s1240_s16, 4  ;;  %s878_s29 = sshll.u32 %s1240_s16, 5 }
  0x12   : > { %s827_s30 = sshll.u32 %s1242_s15, 3  ;;  %s1088_s7 = scalar_lea.vmem %s1223_s1, %s878_s29 }
  0x13   : > { %s1096_s12 = sadd.s32 %s828_s28, %s827_s30  ;;  %s835_s13 = sshll.u32 %s1242_s15, 4  ;;  %894 = vmatpush1.bf16.msra.mxu1 %v958_v6  ;;  %v948_v12 = vld [vmem:[%s1088_s7] sm:$0xff]   ;;  %v949_v17 = vld [vmem:[%s1088_s7 + $0x8] sm:$0xff]   ;;  %v950_v22 = vld [vmem:[%s1088_s7 + $0x10] sm:$0xff]  }
  0x14   : > { %s829_s14 = sshll.u32 %s1096_s12, 2  ;;  %s1099_s16 = sadd.s32 %s878_s29, %s835_s13  ;;  %886 = vmatprep.subr.bf16.mxu1 %v963_v10  ;;  %v951_v24 = vld [vmem:[%s1088_s7 + $0x18] sm:$0xff]  }
  0x15   : > { %s253_s24 = scalar_lea.vmem %s1222_s0, %s829_s14  ;;  %s267_s9 = scalar_lea.vmem %s1225_s3, %s829_s14 }
  0x16   : > { %v942_v7 = vld [vmem:[%s253_s24 + $0x4] ss:$8 sps:$4 sm:$0xff]   ;;  %v944_v8 = vld [vmem:[%s253_s24] ss:$8 sps:$4 sm:$0xff]   ;;  %v945_v9 = vld [vmem:[%s253_s24 + $0x14] ss:$8 sps:$4 sm:$0xff]  }
  0x17   : > { %343 = vmatprep.subr.bf16.mxu0 %v942_v7  ;;  %v947_v11 = vld [vmem:[%s253_s24 + $0x10] ss:$8 sps:$4 sm:$0xff]   ;;  %895 = vmatpush1.bf16.msra.mxu1 %v961_v13  ;;  %s837_s12 = sshll.u32 %s1099_s16, 3 }
  0x18   : > { %344 = vmatpush1.bf16.msra.mxu0 %v944_v8  ;;  %887 = vmatprep.subr.bf16.mxu1 %v966_v14  ;;  %s1181_s11 = scalar_lea.vmem %s1226_s4, %s837_s12 }
  0x19   : > { %345 = vmatprep.subr.bf16.mxu0 %v945_v9 }
  0x1b   : > { %896 = vmatpush1.bf16.msra.mxu1 %v964_v15 }
  0x1c   : > { %346 = vmatpush1.bf16.msra.mxu0 %v947_v11  ;;  %888 = vmatprep.subr.bf16.mxu1 %v969_v16 }
  0x1d   : > { %572 = vmatprep.subr.bf16.mxu0 %v954_v1 }
  0x1f   : > { %846 = vmatmul.mubr.msk.bf16.vlgmr.msra.gmra.mrb[0].mxu0 %vm330_vm0, %v948_v12  ;;  %897 = vmatpush1.bf16.msra.mxu1 %v967_v18 }
  0x20   : > { %385 = vmatprep.mubr.bf16.mxu0 %v1019_v0  ;;  %573 = vmatpush1.bf16.msra.mxu0 %v952_v2 }
  0x21   : > { %574 = vmatprep.subr.bf16.mxu0 %v957_v3  ;;  %889 = vmatprep.subr.bf16.mxu1 %v972_v19 }
  0x23   : > { %898 = vmatpush1.bf16.msra.mxu1 %v970_v20 }
  0x24   : > { %575 = vmatpush1.bf16.msra.mxu0 %v955_v4  ;;  %890 = vmatprep.subr.bf16.mxu1 %v975_v21 }
  0x25   : > { %576 = vmatprep.subr.bf16.mxu0 %v960_v5 }
  0x27   : > { %847 = vmatmul.mubr.msk.bf16.gmra.mrb[4].mxu0 %vm330_vm0, %v949_v17  ;;  %899 = vmatpush1.bf16.msra.mxu1 %v973_v23 }
  0x28   : > { %395 = vmatprep.mubr.bf16.mxu0 %v1019_v0  ;;  %577 = vmatpush1.bf16.msra.mxu0 %v958_v6 }
  0x29   : > { %578 = vmatprep.subr.bf16.mxu0 %v963_v10  ;;  %891 = vmatprep.subr.bf16.mxu1 %v978_v25 }
  0x2b   : > { %900 = vmatpush1.bf16.msra.mxu1 %v976_v26 }
  0x2c   : > { %579 = vmatpush1.bf16.msra.mxu0 %v961_v13 }
  0x2d   : > { %580 = vmatprep.subr.bf16.mxu0 %v966_v14 }
  0x2f   : > { %848 = vmatmul.mubr.msk.bf16.gmra.mrb[8].mxu0 %vm330_vm0, %v950_v22 }
  0x30   : > { %405 = vmatprep.mubr.bf16.mxu0 %v1019_v0  ;;  %581 = vmatpush1.bf16.msra.mxu0 %v964_v15 }
  0x31   : > { %582 = vmatprep.subr.bf16.mxu0 %v969_v16 }
  0x34   : > { %583 = vmatpush1.bf16.msra.mxu0 %v967_v18 }
  0x35   : > { %584 = vmatprep.subr.bf16.mxu0 %v972_v19 }
  0x37   : > { %849 = vmatmul.mubr.msk.bf16.gmra.mrb[12].mxu0 %vm330_vm0, %v951_v24 }
  0x38   : > { %585 = vmatpush1.bf16.msra.mxu0 %v970_v20 }
  0x39   : > { %586 = vmatprep.subr.bf16.mxu0 %v975_v21 }
  0x3c   : > { %587 = vmatpush1.bf16.msra.mxu0 %v973_v23 }
  0x3d   : > { %588 = vmatprep.subr.bf16.mxu0 %v978_v25 }
  0x40   : > { %589 = vmatpush1.bf16.msra.mxu0 %v976_v26 }
  0xf2   : > { %v377_v27 = vpop.f32.mrb[0].mxu0 }
  0xf3   : > { %v379_v28 = vpop.f32.mrb[1].mxu0 }
  0xf4   : > { %v879_v30 = vpack.c.bf16 %v379_v28, %v377_v27  ;;  %v381_v31 = vpop.f32.mrb[2].mxu0 }
  0xf5   : > { %v416_v32 = vpack.c.bf16 %v381_v31, %v377_v27  ;;  %v383_v33 = vpop.f32.mrb[3].mxu0 }
  0xf6   : > { %443 = vst.msk [vmem:[%s267_s9] sm:$0xff] %vm1161_vm3, %v879_v30  ;;  %v417_v34 = vpack.c.bf16 %v383_v33, %v379_v28  ;;  %v880_v35 = vpack.c.bf16 %v383_v33, %v381_v31 }
  0xf8   : > { %444 = vst.msk [vmem:[%s267_s9 + $0x8] sm:$0xff] %vm1161_vm3, %v880_v35  ;;  %872 = vmatprep.mubr.msk.bf16.mxu0 %vm559_vm4, %v417_v34 }
  0xf9   : > { %605 = vmatmul.mubr.bf16.vlgmr.msra.gmra.mrb[16].mxu0 %v416_v32 }
  0xfa   : > { %v387_v36 = vpop.f32.mrb[4].mxu0 }
  0xfb   : > { %v389_v37 = vpop.f32.mrb[5].mxu0 }
  0xfc   : > { %v881_v38 = vpack.c.bf16 %v389_v37, %v387_v36  ;;  %v391_v39 = vpop.f32.mrb[6].mxu0 }
  0xfd   : > { %v418_v40 = vpack.c.bf16 %v391_v39, %v387_v36  ;;  %v393_v41 = vpop.f32.mrb[7].mxu0 }
  0xfe   : > { %445 = vst.msk [vmem:[%s267_s9 + $0x10] sm:$0xff] %vm1161_vm3, %v881_v38  ;;  %v882_v42 = vpack.c.bf16 %v393_v41, %v391_v39  ;;  %v419_v43 = vpack.c.bf16 %v393_v41, %v389_v37 }
 0x100   : > { %446 = vst.msk [vmem:[%s267_s9 + $0x18] sm:$0xff] %vm1161_vm3, %v882_v42  ;;  %873 = vmatprep.mubr.msk.bf16.mxu1 %vm559_vm4, %v419_v43 }
 0x101   : > { %615 = vmatmul.mubr.bf16.vlgmr.msra.gmra.mrb[0].mxu1 %v418_v40 }
 0x102   : > { %v397_v44 = vpop.f32.mrb[8].mxu0 }
 0x103   : > { %v399_v45 = vpop.f32.mrb[9].mxu0 }
 0x104   : > { %v401_v46 = vpop.f32.mrb[10].mxu0 }
 0x105   : > { %v447_v47 = vpack.c.bf16 %v401_v46, %v397_v44  ;;  %v403_v48 = vpop.f32.mrb[11].mxu0 }
 0x106   : > { %v448_v49 = vpack.c.bf16 %v403_v48, %v399_v45 }
 0x108   : > { %874 = vmatprep.mubr.msk.bf16.mxu1 %vm559_vm4, %v448_v49 }
 0x109   : > { %625 = vmatmul.mubr.bf16.gmra.mrb[4].mxu1 %v447_v47 }
 0x10a   : > { %v407_v50 = vpop.f32.mrb[12].mxu0 }
 0x10b   : > { %v409_v51 = vpop.f32.mrb[13].mxu0 }
 0x10c   : > { %v411_v52 = vpop.f32.mrb[14].mxu0 }
 0x10d   : > { %v449_v53 = vpack.c.bf16 %v411_v52, %v407_v50  ;;  %v413_v54 = vpop.f32.mrb[15].mxu0 }
 0x10e   : > { %v450_v55 = vpack.c.bf16 %v413_v54, %v409_v51 }
 0x110   : > { %875 = vmatprep.mubr.msk.bf16.mxu1 %vm559_vm4, %v450_v55 }
 0x111   : > { %635 = vmatmul.mubr.bf16.gmra.mrb[8].mxu1 %v449_v53 }
 0x1cc   : > { %v606_v56 = vpop.f32.mrb[16].mxu0 }
 0x1cd   : > { %645 = vst [vmem:[%s1181_s11] sm:$0xff] %v606_v56  ;;  %v608_v57 = vpop.f32.mrb[17].mxu0 }
 0x1ce   : > { %647 = vst.msk [vmem:[%s1181_s11 + $0x8] sm:$0xff] %vm646_vm5, %v608_v57  ;;  %v610_v58 = vpop.f32.mrb[18].mxu0 }
 0x1cf   : > { %648 = vst [vmem:[%s1181_s11 + $0x10] sm:$0xff] %v610_v58  ;;  %v612_v59 = vpop.f32.mrb[19].mxu0 }
 0x1d0   : > { %649 = vst.msk [vmem:[%s1181_s11 + $0x18] sm:$0xff] %vm646_vm5, %v612_v59 }
 0x1d4   : > { %v616_v60 = vpop.f32.mrb[0].mxu1 }
 0x1d5   : > { %650 = vst [vmem:[%s1181_s11 + $0x20] sm:$0xff] %v616_v60  ;;  %v618_v61 = vpop.f32.mrb[1].mxu1 }
 0x1d6   : > { %651 = vst.msk [vmem:[%s1181_s11 + $0x28] sm:$0xff] %vm646_vm5, %v618_v61  ;;  %v620_v62 = vpop.f32.mrb[2].mxu1 }
 0x1d7   : > { %652 = vst [vmem:[%s1181_s11 + $0x30] sm:$0xff] %v620_v62  ;;  %v622_v63 = vpop.f32.mrb[3].mxu1 }
 0x1d8   : > { %653 = vst.msk [vmem:[%s1181_s11 + $0x38] sm:$0xff] %vm646_vm5, %v622_v63 }
 0x1dc   : > { %v626_v0 = vpop.f32.mrb[4].mxu1 }
 0x1dd   : > { %654 = vst [vmem:[%s1181_s11 + $0x40] sm:$0xff] %v626_v0  ;;  %v628_v1 = vpop.f32.mrb[5].mxu1 }
 0x1de   : > { %655 = vst.msk [vmem:[%s1181_s11 + $0x48] sm:$0xff] %vm646_vm5, %v628_v1  ;;  %v630_v2 = vpop.f32.mrb[6].mxu1 }
 0x1df   : > { %656 = vst [vmem:[%s1181_s11 + $0x50] sm:$0xff] %v630_v2  ;;  %v632_v3 = vpop.f32.mrb[7].mxu1 }
 0x1e0   : > { %657 = vst.msk [vmem:[%s1181_s11 + $0x58] sm:$0xff] %vm646_vm5, %v632_v3 }
 0x1e4   : > { %v636_v4 = vpop.f32.mrb[8].mxu1 }
 0x1e5   : > { %658 = vst [vmem:[%s1181_s11 + $0x60] sm:$0xff] %v636_v4  ;;  %v638_v5 = vpop.f32.mrb[9].mxu1 }
 0x1e6   : > { %659 = vst.msk [vmem:[%s1181_s11 + $0x68] sm:$0xff] %vm646_vm5, %v638_v5  ;;  %v640_v6 = vpop.f32.mrb[10].mxu1 }
 0x1e7   : > { %660 = vst [vmem:[%s1181_s11 + $0x70] sm:$0xff] %v640_v6  ;;  %v642_v7 = vpop.f32.mrb[11].mxu1 }
 0x1e8   : > { %661 = vst.msk [vmem:[%s1181_s11 + $0x78] sm:$0xff] %vm646_vm5, %v642_v7 }
 0x1e9 PF: > { %s15_s19 = sadd.s32 1, %s1017_s19   ;;  %s1229_s15 = smov %s1009_s17 }
 0x1ea   : > { %p12_p7 = scmp.ge.s32.totalorder %s15_s19, 6   ;;  %s1230_s16 = smov %s1013_s18 }
 0x1eb   : > { %s1231_s17 = smov %s1234_s20  ;;  %s1232_s18 = smov %s1238_s21 }
 0x1ec   :  { %14 = sbr.rel (!%p12_p7) target bundleno = 3 (0x3), region = 77 }

// kernel: glo_skip_attention_forward.3
= control target key start
LH: loop header
LB: loop body
LE: loop exit
PB: predicated region body
PF: predicated region fallthrough
CT: control target
= control target key end

     0   :  { %s5083_s24 = smov 0   ;;  %s5085_s25 = smov 0   ;;  %s7310_s0 = inlined_call_operand.vmem [shape: bf16[2,2,2,16,144], index: 0, kind: input, shape index: {}]   ;;  %s7311_s1 = inlined_call_operand.vmem [shape: bf16[2,2,2,200,16], index: 1, kind: input, shape index: {}]   ;;  %s7312_s2 = inlined_call_operand.vmem [shape: bf16[2,2,2,16,200], index: 2, kind: input, shape index: {}]   ;;  %s7313_s3 = inlined_call_operand.vmem [shape: bf16[32,32], index: 3, kind: input, shape index: {}]   ;;  %s7314_s4 = inlined_call_operand.vmem [shape: f32[32,9], index: 4, kind: input, shape index: {}]   ;;  %s7315_s5 = inlined_call_operand.vmem [shape: bf16[32,32], index: 5, kind: input, shape index: {}]   ;;  %s7316_s6 = inlined_call_operand.vmem [shape: bf16[9,144,144], index: 6, kind: input, shape index: {}]   ;;  %s7317_s7 = inlined_call_operand.vmem [shape: f32[2,2,32,144], index: 7, kind: output, shape index: {}]  }
   0x1   :  { %s5087_s26 = smov 0   ;;  %s5089_s27 = smov 0  }
   0x2   :  { %s5091_s28 = smov 0  }
   0x3 LB: > { %s26_s29 = sadd.s32 1, %s5024_s26  ;;  %s29_s30 = sadd.s32 1, %s5028_s27  ;;  %s5032_s28 = sphi %s5091_s28, %s17_s28   ;;  %s5028_s27 = sphi %s5089_s27, %s7460_s27   ;;  %s5024_s26 = sphi %s5087_s26, %s7459_s26   ;;  %s5020_s25 = sphi %s5085_s25, %s7458_s25   ;;  %s5016_s24 = sphi %s5083_s24, %s7457_s24  }
   0x4   : > { %p27_p0 = scmp.ge.s32.totalorder %s26_s29, 2  ;;  %p3992_p1 = scmp.ge.s32.totalorder %s5032_s28, 1 }
   0x5   : > { %p289_p2 = scmp.lt.s32.totalorder %s5032_s28, 5 }
   0x6   : > { %s7462_s29 = smov (%p27_p0, %s26_s29), 0  ;;  %s7464_s30 = smov (!%p27_p0, %s29_s30), %s5028_s27 }
   0x7   : > { %p290_p3 = pnand %p3992_p1, %p289_p2  ;;  %p31_p4 = scmp.ge.s32.totalorder %s7464_s30, 2 }
   0x9   : > { %s7466_s30 = smov (%p31_p4, %s7464_s30), 0  ;;  %293 = sbr.rel (%p290_p3) target bundleno = 2042 (0x7fa), region = 48 }
  0x10   : > { %p347_p5 = scmp.lt.s32.totalorder %s5020_s25, 1  ;;  %p349_p6 = scmp.lt.s32.totalorder %s5016_s24, 1  ;;  %v7318_v0 = vmov 0   ;;  %vm487_vm0 = vcmask 130048   ;;  %vm1097_vm1 = vcmask 588800   ;;  %vm1101_vm2 = vcmask 1043456  }
  0x11   : > { %559 = vmatprep.mubr.bf16.mxu0 %v7318_v0  ;;  %629 = vmatprep.mubr.bf16.mxu1 %v7318_v0  ;;  %vm1943_vm3 = vcmask 261120  }
  0x12   : > { %s7468_s25 = smov (!%p347_p5, %s5020_s25), 1  ;;  %4483 = vset.pattern.permute.xlu0 %v7318_v0  ;;  %s7470_s24 = smov (!%p349_p6, %s5016_s24), 1 }
  0x13   : > { %s3994_s8 = sshll.u32 %s7468_s25, 4  ;;  %s4433_s9 = smul.u32 100, %s7468_s25 }
  0x14   : > { %s3993_s10 = sshll.u32 %s7470_s24, 3  ;;  %s4432_s11 = smul.u32 50, %s7470_s24 }
  0x15   : > { %s5116_s12 = sadd.s32 %s3994_s8, %s3993_s10 }
  0x16   : > { %s3995_s13 = sshll.u32 %s5116_s12, 2  ;;  %s362_s14 = sadd.s32 %s4433_s9, %s4432_s11 }
  0x17   : > { %s5122_s17 = scalar_lea.vmem %s7310_s0, %s3995_s13  ;;  %s3996_s18 = sshll.u32 %s362_s14, 2 }
  0x18   : > { %v385_v1 = vld [vmem:[%s5122_s17] sm:$0xff]  ;;  %v386_v2 = vld [vmem:[%s5122_s17 + $0x8] sm:$0xff]  ;;  %s5129_s21 = scalar_lea.vmem %s7311_s1, %s3996_s18  ;;  %s5141_s24 = scalar_lea.vmem %s7312_s2, %s3995_s13 }
  0x19   : > { %v387_v3 = vmul.bf16 1048592000, %v385_v1  ;;  %v388_v4 = vmul.bf16 1048592000, %v386_v2  ;;  %v4506_v7 = vld [vmem:[%s5129_s21] sm:$0xff]   ;;  %v4509_v8 = vld [vmem:[%s5129_s21 + $0x38] sm:$0xff]  }
  0x1a   : > { %v4507_v9 = vld [vmem:[%s5129_s21 + $0x8] sm:$0xff]   ;;  %v4511_v10 = vld [vmem:[%s5129_s21 + $0x40] sm:$0xff]   ;;  %v4508_v11 = vld [vmem:[%s5129_s21 + $0x10] sm:$0xff]   ;;  %s4002_s25 = sshll.u32 %s5116_s12, 3 }
  0x1b   : > { %v4017_v5 = vcombine.high %v387_v3, %v388_v4  ;;  %v4016_v6 = vcombine.low %v387_v3, %v388_v4  ;;  %v4513_v12 = vld [vmem:[%s5129_s21 + $0x48] sm:$0xff]   ;;  %v4510_v13 = vld [vmem:[%s5129_s21 + $0x18] sm:$0xff]   ;;  %v4515_v14 = vld [vmem:[%s5129_s21 + $0x50] sm:$0xff]   ;;  %s382_s10 = scalar_lea.vmem %s7317_s7, %s4002_s25 }
  0x1c   : > { %v4512_v15 = vld [vmem:[%s5129_s21 + $0x20] sm:$0xff]   ;;  %v4517_v16 = vld [vmem:[%s5129_s21 + $0x58] sm:$0xff]   ;;  %v4514_v17 = vld [vmem:[%s5129_s21 + $0x28] sm:$0xff]  }
  0x1d   : > { %527 = vmatprep.subr.bf16.mxu0 %v4017_v5  ;;  %4430 = vmatprep.subr.bf16.mxu1 %v4017_v5  ;;  %v4518_v18 = vld [vmem:[%s5129_s21 + $0x60] ss:$0 sps:$4 sm:$0xff]   ;;  %v4516_v19 = vld [vmem:[%s5129_s21 + $0x30] sm:$0xff]  }
  0x1e   : > { %528 = vmatpush1.bf16.msra.mxu0 %v4016_v6  ;;  %4431 = vmatpush1.bf16.msra.mxu1 %v4016_v6 }
  0x21   : > { %4018 = vmatmul.mubr.msk.bf16.vlgmr.msra.gmra.mrb[0].mxu0 %vm487_vm0, %v4506_v7  ;;  %4025 = vmatmul.mubr.msk.bf16.vlgmr.msra.gmra.mrb[0].mxu1 %vm487_vm0, %v4509_v8 }
  0x22   : > { %569 = vmatprep.mubr.bf16.mxu0 %v7318_v0  ;;  %639 = vmatprep.mubr.bf16.mxu1 %v7318_v0 }
  0x29   : > { %4019 = vmatmul.mubr.msk.bf16.gmra.mrb[4].mxu0 %vm487_vm0, %v4507_v9  ;;  %4026 = vmatmul.mubr.msk.bf16.gmra.mrb[4].mxu1 %vm487_vm0, %v4511_v10 }
  0x2a   : > { %579 = vmatprep.mubr.bf16.mxu0 %v7318_v0  ;;  %649 = vmatprep.mubr.bf16.mxu1 %v7318_v0 }
  0x31   : > { %4020 = vmatmul.mubr.msk.bf16.gmra.mrb[8].mxu0 %vm487_vm0, %v4508_v11  ;;  %4027 = vmatmul.mubr.msk.bf16.gmra.mrb[8].mxu1 %vm487_vm0, %v4513_v12 }
  0x32   : > { %589 = vmatprep.mubr.bf16.mxu0 %v7318_v0  ;;  %659 = vmatprep.mubr.bf16.mxu1 %v7318_v0 }
  0x39   : > { %4021 = vmatmul.mubr.msk.bf16.gmra.mrb[12].mxu0 %vm487_vm0, %v4510_v13  ;;  %4028 = vmatmul.mubr.msk.bf16.gmra.mrb[12].mxu1 %vm487_vm0, %v4515_v14 }
  0x3a   : > { %599 = vmatprep.mubr.bf16.mxu0 %v7318_v0  ;;  %669 = vmatprep.mubr.bf16.mxu1 %v7318_v0 }
  0x41   : > { %4022 = vmatmul.mubr.msk.bf16.gmra.mrb[16].mxu0 %vm487_vm0, %v4512_v15  ;;  %4029 = vmatmul.mubr.msk.bf16.gmra.mrb[16].mxu1 %vm487_vm0, %v4517_v16 }
  0x42   : > { %609 = vmatprep.mubr.bf16.mxu0 %v7318_v0  ;;  %679 = vmatprep.mubr.bf16.mxu1 %v7318_v0 }
  0x49   : > { %4023 = vmatmul.mubr.msk.bf16.gmra.mrb[20].mxu0 %vm487_vm0, %v4514_v17  ;;  %4030 = vmatmul.mubr.msk.bf16.gmra.mrb[20].mxu1 %vm487_vm0, %v4518_v18 }
  0x4a   : > { %619 = vmatprep.mubr.bf16.mxu0 %v7318_v0 }
  0x51   : > { %4024 = vmatmul.mubr.msk.bf16.gmra.mrb[24].mxu0 %vm487_vm0, %v4516_v19 }
  0xf4   : > { %v5173_v20 = vpop.f32.mrb[0].mxu0  ;;  %v5175_v21 = vpop.f32.mrb[0].mxu1 }
  0xf5   : > { %v5177_v22 = vpop.f32.mrb[1].mxu0  ;;  %v5179_v23 = vpop.f32.mrb[1].mxu1 }
  0xf6   : > { %7353 = vst [vmem:[#allocation3_spill] sm:$0xff] %v5179_v23  ;;  %v5181_v24 = vpop.f32.mrb[2].mxu0  ;;  %v5183_v25 = vpop.f32.mrb[2].mxu1  ;;  %v718_v33 = vsel %vm487_vm0, %v5177_v22, -inf }
  0xf7   : > { %v5185_v26 = vpop.f32.mrb[3].mxu0  ;;  %v5187_v27 = vpop.f32.mrb[3].mxu1 }
  0xf8   : > { %v719_v41 = vsel %vm487_vm0, %v5185_v26, -inf }
  0xfc   : > { %v5189_v28 = vpop.f32.mrb[4].mxu0  ;;  %v5191_v29 = vpop.f32.mrb[4].mxu1 }
  0xfd   : > { %v688_v30 = vmax.f32 %v5173_v20, %v5189_v28  ;;  %v5195_v31 = vpop.f32.mrb[5].mxu0  ;;  %v5197_v32 = vpop.f32.mrb[5].mxu1 }
  0xfe   : > { %v720_v34 = vsel %vm487_vm0, %v5195_v31, -inf  ;;  %v5203_v35 = vpop.f32.mrb[6].mxu0  ;;  %v5205_v36 = vpop.f32.mrb[6].mxu1 }
  0xff   : > { %v721_v37 = vmax.f32 %v718_v33, %v720_v34  ;;  %v689_v38 = vmax.f32 %v5181_v24, %v5203_v35  ;;  %v5209_v39 = vpop.f32.mrb[7].mxu0  ;;  %v5211_v40 = vpop.f32.mrb[7].mxu1 }
 0x100   : > { %v722_v42 = vsel %vm487_vm0, %v5209_v39, -inf }
 0x101   : > { %v723_v43 = vmax.f32 %v719_v41, %v722_v42 }
 0x104   : > { %v5217_v44 = vpop.f32.mrb[8].mxu0  ;;  %v5219_v45 = vpop.f32.mrb[8].mxu1 }
 0x105   : > { %v690_v46 = vmax.f32 %v688_v30, %v5217_v44  ;;  %v5222_v47 = vpop.f32.mrb[9].mxu0  ;;  %v5224_v48 = vpop.f32.mrb[9].mxu1 }
 0x106   : > { %7354 = vst [vmem:[#allocation4_spill] sm:$0xff] %v5224_v48  ;;  %v724_v49 = vsel %vm487_vm0, %v5222_v47, -inf  ;;  %v5228_v50 = vpop.f32.mrb[10].mxu0  ;;  %v5230_v51 = vpop.f32.mrb[10].mxu1 }
 0x107   : > { %v725_v52 = vmax.f32 %v721_v37, %v724_v49  ;;  %v691_v53 = vmax.f32 %v689_v38, %v5228_v50  ;;  %v5233_v54 = vpop.f32.mrb[11].mxu0  ;;  %v5235_v55 = vpop.f32.mrb[11].mxu1 }
 0x108   : > { %7355 = vst [vmem:[#allocation5_spill] sm:$0xff] %v5235_v55  ;;  %v726_v56 = vsel %vm487_vm0, %v5233_v54, -inf }
 0x109   : > { %v727_v57 = vmax.f32 %v723_v43, %v726_v56 }
 0x10c   : > { %v5239_v58 = vpop.f32.mrb[12].mxu0  ;;  %v5241_v59 = vpop.f32.mrb[12].mxu1 }
 0x10d   : > { %v692_v60 = vmax.f32 %v690_v46, %v5239_v58  ;;  %v5244_v61 = vpop.f32.mrb[13].mxu0  ;;  %v5246_v62 = vpop.f32.mrb[13].mxu1 }
 0x10e   : > { %7356 = vst [vmem:[#allocation6_spill] sm:$0xff] %v5246_v62  ;;  %v728_v63 = vsel %vm487_vm0, %v5244_v61, -inf  ;;  %v5250_v1 = vpop.f32.mrb[14].mxu0  ;;  %v5252_v2 = vpop.f32.mrb[14].mxu1 }
 0x10f   : > { %v729_v3 = vmax.f32 %v725_v52, %v728_v63  ;;  %v693_v4 = vmax.f32 %v691_v53, %v5250_v1  ;;  %v5255_v5 = vpop.f32.mrb[15].mxu0  ;;  %v5257_v6 = vpop.f32.mrb[15].mxu1 }
 0x110   : > { %7357 = vst [vmem:[#allocation7_spill] sm:$0xff] %v5257_v6  ;;  %v730_v7 = vsel %vm487_vm0, %v5255_v5, -inf }
 0x111   : > { %v731_v8 = vmax.f32 %v727_v57, %v730_v7 }
 0x114   : > { %v5261_v9 = vpop.f32.mrb[16].mxu0  ;;  %v5263_v10 = vpop.f32.mrb[16].mxu1 }
 0x115   : > { %v694_v11 = vmax.f32 %v692_v60, %v5261_v9  ;;  %v5266_v12 = vpop.f32.mrb[17].mxu0  ;;  %v5268_v13 = vpop.f32.mrb[17].mxu1 }
 0x116   : > { %7358 = vst [vmem:[#allocation8_spill] sm:$0xff] %v5268_v13  ;;  %v732_v14 = vsel %vm487_vm0, %v5266_v12, -inf  ;;  %v5272_v15 = vpop.f32.mrb[18].mxu0  ;;  %v5274_v16 = vpop.f32.mrb[18].mxu1 }
 0x117   : > { %v733_v17 = vmax.f32 %v729_v3, %v732_v14  ;;  %v695_v18 = vmax.f32 %v693_v4, %v5272_v15  ;;  %v5277_v19 = vpop.f32.mrb[19].mxu0  ;;  %v5279_v30 = vpop.f32.mrb[19].mxu1 }
 0x118   : > { %v734_v33 = vsel %vm487_vm0, %v5277_v19, -inf }
 0x119   : > { %v735_v34 = vmax.f32 %v731_v8, %v734_v33 }
 0x11c   : > { %v5283_v37 = vpop.f32.mrb[20].mxu0  ;;  %v5285_v38 = vpop.f32.mrb[20].mxu1 }
 0x11d   : > { %v696_v41 = vmax.f32 %v694_v11, %v5283_v37  ;;  %v5288_v42 = vpop.f32.mrb[21].mxu0  ;;  %v5290_v43 = vpop.f32.mrb[21].mxu1 }
 0x11e   : > { %7359 = vst [vmem:[#allocation9_spill] sm:$0xff] %v5290_v43  ;;  %v736_v46 = vsel %vm487_vm0, %v5288_v42, -inf  ;;  %v5294_v49 = vpop.f32.mrb[22].mxu0  ;;  %v685_v52 = vpop.f32.mrb[22].mxu1 }
 0x11f   : > { %v737_v53 = vmax.f32 %v733_v17, %v736_v46  ;;  %v697_v56 = vmax.f32 %v695_v18, %v5294_v49  ;;  %v5297_v57 = vpop.f32.mrb[23].mxu0  ;;  %v686_v60 = vpop.f32.mrb[23].mxu1 }
 0x120   : > { %v738_v63 = vsel %vm487_vm0, %v5297_v57, -inf }
 0x121   : > { %v739_v3 = vmax.f32 %v735_v34, %v738_v63  ;;  %v744_v34 = vsel %vm487_vm0, %v5179_v23, -inf }
 0x124   : > { %v5301_v4 = vpop.f32.mrb[24].mxu0 }
 0x125   : > { %v698_v7 = vmax.f32 %v696_v41, %v5301_v4  ;;  %v5304_v8 = vpop.f32.mrb[25].mxu0 }
 0x126   : > { %7360 = vst [vmem:[#allocation10_spill] sm:$0xff] %v5304_v8  ;;  %v740_v11 = vsel %vm487_vm0, %v5304_v8, -inf  ;;  %v5308_v14 = vpop.f32.mrb[26].mxu0 }
 0x127   : > { %v700_v17 = vmax.f32 %v698_v7, %v5175_v21  ;;  %v741_v18 = vmax.f32 %v737_v53, %v740_v11  ;;  %v699_v33 = vmax.f32 %v697_v56, %v5308_v14  ;;  %v5312_v46 = vpop.f32.mrb[27].mxu0  ;;  %v746_v7 = vsel %vm487_vm0, %v5187_v27, -inf }
 0x128   : > { %7361 = vst [vmem:[#allocation11_spill] sm:$0xff] %v5312_v46  ;;  %v742_v41 = vsel %vm487_vm0, %v5312_v46, -inf  ;;  %v748_v53 = vsel %vm487_vm0, %v5197_v32, -inf  ;;  %v750_v46 = vsel %vm487_vm0, %v5211_v40, -inf }
 0x129   : > { %v702_v52 = vmax.f32 %v700_v17, %v5191_v29  ;;  %v745_v60 = vmax.f32 %v741_v18, %v744_v34  ;;  %v701_v63 = vmax.f32 %v699_v33, %v5183_v25  ;;  %v743_v0 = vmax.f32 %v739_v3, %v742_v41 }
 0x12a   : > { %v752_v17 = vsel %vm487_vm0, %v5224_v48, -inf  ;;  %v754_v41 = vsel %vm487_vm0, %v5235_v55, -inf }
 0x12b   : > { %v749_v56 = vmax.f32 %v745_v60, %v748_v53  ;;  %v704_v11 = vmax.f32 %v702_v52, %v5219_v45  ;;  %v703_v23 = vmax.f32 %v701_v63, %v5205_v36  ;;  %v747_v8 = vmax.f32 %v743_v0, %v746_v7 }
 0x12c   : > { %v756_v52 = vsel %vm487_vm0, %v5246_v62, -inf  ;;  %v758_v53 = vsel %vm487_vm0, %v5257_v6, -inf }
 0x12d   : > { %v706_v3 = vmax.f32 %v704_v11, %v5241_v59  ;;  %v753_v18 = vmax.f32 %v749_v56, %v752_v17  ;;  %v751_v33 = vmax.f32 %v747_v8, %v750_v46  ;;  %v705_v34 = vmax.f32 %v703_v23, %v5230_v51 }
 0x12e   : > { %v760_v8 = vsel %vm487_vm0, %v5268_v13, -inf  ;;  %v764_v23 = vsel %vm487_vm0, %v5290_v43, -inf }
 0x12f   : > { %v708_v0 = vmax.f32 %v706_v3, %v5263_v10  ;;  %v757_v60 = vmax.f32 %v753_v18, %v756_v52  ;;  %v707_v63 = vmax.f32 %v705_v34, %v5252_v2  ;;  %v755_v7 = vmax.f32 %v751_v33, %v754_v41 }
 0x130   : > { %v762_v3 = vsel %vm487_vm0, %v5279_v30, -inf }
 0x131   : > { %v761_v46 = vmax.f32 %v757_v60, %v760_v8  ;;  %v709_v56 = vmax.f32 %v707_v63, %v5274_v16  ;;  %v759_v11 = vmax.f32 %v755_v7, %v758_v53  ;;  %v710_v17 = vmax.f32 %v708_v0, %v5285_v38 }
 0x133   : > { %v763_v18 = vmax.f32 %v759_v11, %v762_v3  ;;  %v711_v33 = vmax.f32 %v710_v17, %v709_v56  ;;  %v765_v34 = vmax.f32 %v761_v46, %v764_v23 }
 0x135   : > { %v712_v41 = vrot.slane %v711_v33, 4  ;;  %v766_v52 = vmax.f32 %v765_v34, %v763_v18 }
 0x137   : > { %v713_v6 = vmax.f32 %v711_v33, %v712_v41  ;;  %v767_v62 = vrot.slane %v766_v52, 4 }
 0x139   : > { %v714_v13 = vrot.slane %v713_v6, 2  ;;  %v768_v55 = vmax.f32 %v766_v52, %v767_v62 }
 0x13b   : > { %v715_v48 = vmax.f32 %v713_v6, %v714_v13  ;;  %v769_v43 = vrot.slane %v768_v55, 2 }
 0x13d   : > { %v716_v60 = vrot.slane %v715_v48, 1  ;;  %v770_v63 = vmax.f32 %v768_v55, %v769_v43  ;;  %v7370_v43 = vld [vmem:[#allocation9_spill] sm:$0xff] }
 0x13f   : > { %v5348_v8 = vmax.f32 %v715_v48, %v716_v60  ;;  %v771_v34 = vrot.slane %v770_v63, 1 }
 0x141   : > { %v773_v0 = vsub.f32 %v5173_v20, %v5348_v8  ;;  %v775_v7 = vsub.f32 %v5181_v24, %v5348_v8  ;;  %v777_v53 = vsub.f32 %v5189_v28, %v5348_v8  ;;  %v779_v23 = vsub.f32 %v5203_v35, %v5348_v8 }
 0x142   : > { %v781_v62 = vsub.f32 %v5217_v44, %v5348_v8  ;;  %v783_v48 = vsub.f32 %v5228_v50, %v5348_v8  ;;  %v785_v55 = vsub.f32 %v5239_v58, %v5348_v8  ;;  %v787_v20 = vsub.f32 %v5250_v1, %v5348_v8 }
 0x143   : > { %v789_v24 = vsub.f32 %v5261_v9, %v5348_v8  ;;  %v791_v28 = vsub.f32 %v5272_v15, %v5348_v8  ;;  %v793_v35 = vsub.f32 %v5283_v37, %v5348_v8  ;;  %v795_v44 = vsub.f32 %v5294_v49, %v5348_v8  ;;  %v7369_v15 = vld [vmem:[#allocation8_spill] sm:$0xff] }
 0x144   : > { %v797_v50 = vsub.f32 %v5301_v4, %v5348_v8  ;;  %v799_v58 = vsub.f32 %v5308_v14, %v5348_v8  ;;  %v801_v1 = vsub.f32 %v5175_v21, %v5348_v8  ;;  %v803_v6 = vsub.f32 %v5183_v25, %v5348_v8 }
 0x145   : > { %v805_v9 = vsub.f32 %v5191_v29, %v5348_v8  ;;  %v823_v18 = vmul.f32 1.442695, %v773_v0  ;;  %v827_v33 = vmul.f32 1.442695, %v775_v7  ;;  %v831_v41 = vmul.f32 1.442695, %v777_v53 }
 0x146   : > { %v835_v52 = vmul.f32 1.442695, %v779_v23  ;;  %v5400_v60 = vmax.f32 %v770_v63, %v771_v34  ;;  %v839_v56 = vmul.f32 1.442695, %v781_v62  ;;  %v843_v46 = vmul.f32 1.442695, %v783_v48 }
 0x147   : > { %4785 = vpow2.f32 %v823_v18  ;;  %v847_v11 = vmul.f32 1.442695, %v785_v55  ;;  %v851_v53 = vmul.f32 1.442695, %v787_v20  ;;  %v855_v48 = vmul.f32 1.442695, %v789_v24 }
 0x148   : > { %4787 = vpow2.f32 %v827_v33  ;;  %v774_v17 = vsub.f32 %v5177_v22, %v5400_v60  ;;  %v776_v3 = vsub.f32 %v5185_v26, %v5400_v60  ;;  %v778_v0 = vsub.f32 %v5195_v31, %v5400_v60  ;;  %v7362_v20 = vld [vmem:[#allocation10_spill] sm:$0xff]  ;;  %v7364_v34 = vld [vmem:[#allocation3_spill] sm:$0xff]  ;;  %v7365_v18 = vld [vmem:[#allocation4_spill] sm:$0xff] }
 0x149   : > { %4789 = vpow2.f32 %v831_v41  ;;  %v780_v7 = vsub.f32 %v5209_v39, %v5400_v60  ;;  %v782_v63 = vsub.f32 %v5222_v47, %v5400_v60  ;;  %v784_v23 = vsub.f32 %v5233_v54, %v5400_v60  ;;  %v7366_v41 = vld [vmem:[#allocation5_spill] sm:$0xff] }
 0x14a   : > { %4791 = vpow2.f32 %v835_v52  ;;  %v859_v47 = vmul.f32 1.442695, %v791_v28  ;;  %v7367_v52 = vld [vmem:[#allocation6_spill] sm:$0xff]  ;;  %v7368_v28 = vld [vmem:[#allocation7_spill] sm:$0xff]  ;;  %v822_v31 = vsub.f32 %v7370_v43, %v5400_v60  ;;  %v825_v4 = vmul.f32 1.442695, %v774_v17 }
 0x14b   : > { %4793 = vpow2.f32 %v839_v56  ;;  %v818_v56 = vsub.f32 %v7369_v15, %v5400_v60  ;;  %v845_v25 = vmul.f32 1.442695, %v784_v23  ;;  %v7372_v29 = vsub.f32 %v5244_v61, %v5400_v60 }
 0x14c   : > { %4795 = vpow2.f32 %v843_v46  ;;  %v7363_v46 = vld [vmem:[#allocation11_spill] sm:$0xff]  ;;  %v7373_v54 = vsub.f32 %v5219_v45, %v5348_v8  ;;  %v7375_v61 = vsub.f32 %v5230_v51, %v5348_v8 }
 0x14d   : > { %4797 = vpow2.f32 %v847_v11 }
 0x14e   : > { %4799 = vpow2.f32 %v851_v53  ;;  %v863_v53 = vmul.f32 1.442695, %v793_v35  ;;  %v875_v35 = vmul.f32 1.442695, %v799_v58  ;;  %v837_v58 = vmul.f32 1.442695, %v780_v7 }
 0x14f   : > { %4801 = vpow2.f32 %v855_v48  ;;  %v871_v48 = vmul.f32 1.442695, %v797_v50  ;;  %v895_v23 = vmul.f32 1.442695, %v7373_v54 }
 0x150   : > { %4803 = vpow2.f32 %v859_v47  ;;  %v829_v47 = vmul.f32 1.442695, %v776_v3 }
 0x151   : > { %v5424_v62 = vpop.eup %4785  ;;  %4805 = vpow2.f32 %v863_v53  ;;  %v833_v53 = vmul.f32 1.442695, %v778_v0  ;;  %v887_v0 = vmul.f32 1.442695, %v805_v9  ;;  %v849_v9 = vmul.f32 1.442695, %v7372_v29 }
 0x152   : > { %v5432_v33 = vpop.eup %4787 }
 0x153   : > { %v923_v55 = vadd.f32 %v5432_v33, %v5424_v62  ;;  %v5446_v11 = vpop.eup %4789 }
 0x154   : > { %v5459_v22 = vpop.eup %4791 }
 0x155   : > { %v924_v26 = vadd.f32 %v5446_v11, %v923_v55  ;;  %v5467_v13 = vpop.eup %4793  ;;  %v867_v55 = vmul.f32 1.442695, %v795_v44 }
 0x156   : > { %v5476_v37 = vpop.eup %4795 }
 0x157   : > { %v925_v24 = vadd.f32 %v5459_v22, %v924_v26  ;;  %v879_v26 = vmul.f32 1.442695, %v801_v1  ;;  %v5485_v44 = vpop.eup %4797  ;;  %4807 = vpow2.f32 %v867_v55  ;;  %v883_v1 = vmul.f32 1.442695, %v803_v6 }
 0x158   : > { %4809 = vpow2.f32 %v871_v48 }
 0x159   : > { %v926_v39 = vadd.f32 %v5467_v13, %v925_v24  ;;  %v5488_v24 = vpop.eup %4799  ;;  %4811 = vpow2.f32 %v875_v35 }
 0x15a   : > { %4813 = vpow2.f32 %v879_v26  ;;  %v5491_v21 = vpop.eup %4801 }
 0x15b   : > { %v927_v49 = vadd.f32 %v5476_v37, %v926_v39  ;;  %4815 = vpow2.f32 %v825_v4  ;;  %v841_v39 = vmul.f32 1.442695, %v782_v63  ;;  %v5497_v3 = vpop.eup %4803  ;;  %v7371_v63 = vsub.f32 %v5205_v36, %v5348_v8 }
 0x15c   : > { %4817 = vpow2.f32 %v829_v47  ;;  %v5506_v6 = vpop.eup %4805  ;;  %v899_v47 = vmul.f32 1.442695, %v7375_v61 }
 0x15d   : > { %v928_v50 = vadd.f32 %v5485_v44, %v927_v49  ;;  %4819 = vpow2.f32 %v833_v53  ;;  %v891_v55 = vmul.f32 1.442695, %v7371_v63  ;;  %v7374_v49 = vsub.f32 %v5255_v5, %v5400_v60 }
 0x15e   : > { %4821 = vpow2.f32 %v837_v58 }
 0x15f   : > { %v929_v14 = vadd.f32 %v5488_v24, %v928_v50  ;;  %4823 = vpow2.f32 %v883_v1  ;;  %v853_v4 = vmul.f32 1.442695, %v7374_v49  ;;  %v4521_v1 = vld [vmem:[%s5141_s24 + $0x4] ss:$8 sps:$4 sm:$0xff]  }
 0x160   : > { %4825 = vpow2.f32 %v841_v39  ;;  %4034 = vmatprep.mubr.msk.bf16.mxu1 %vm1097_vm1, %v4521_v1 }
 0x161   : > { %v930_v17 = vadd.f32 %v5491_v21, %v929_v14  ;;  %v5515_v35 = vpop.eup %4807  ;;  %4827 = vpow2.f32 %v887_v0  ;;  %v7376_v14 = vsub.f32 %v5266_v12, %v5400_v60 }
 0x162   : > { %v5520_v26 = vpop.eup %4809  ;;  %4829 = vpow2.f32 %v845_v25 }
 0x163   : > { %v931_v7 = vadd.f32 %v5497_v3, %v930_v17  ;;  %v5526_v50 = vpop.eup %4811  ;;  %4831 = vpow2.f32 %v891_v55  ;;  %v857_v58 = vmul.f32 1.442695, %v7376_v14  ;;  %v7377_v17 = vsub.f32 %v5241_v59, %v5348_v8 }
 0x164   : > { %v5531_v53 = vpop.eup %4813  ;;  %4833 = vpow2.f32 %v849_v9  ;;  %v7379_v59 = vsub.f32 %v5252_v2, %v5348_v8  ;;  %v7380_v9 = vsub.f32 %v5288_v42, %v5400_v60  ;;  %v7381_v2 = vsub.f32 %v5263_v10, %v5348_v8 }
 0x165   : > { %v932_v48 = vadd.f32 %v5506_v6, %v931_v7  ;;  %v5538_v5 = vpop.eup %4815  ;;  %4835 = vpow2.f32 %v895_v23  ;;  %v903_v39 = vmul.f32 1.442695, %v7377_v17  ;;  %v7378_v7 = vsub.f32 %v5277_v19, %v5400_v60 }
 0x166   : > { %v5543_v51 = vpop.eup %4817  ;;  %4837 = vpow2.f32 %v853_v4  ;;  %v953_v12 = vsel %vm487_vm0, %v5538_v5, 0.0  ;;  %v907_v55 = vmul.f32 1.442695, %v7379_v59  ;;  %v865_v54 = vmul.f32 1.442695, %v7380_v9 }
 0x167   : > { %v933_v36 = vadd.f32 %v5515_v35, %v932_v48  ;;  %v861_v25 = vmul.f32 1.442695, %v7378_v7  ;;  %v5552_v63 = vpop.eup %4819  ;;  %4839 = vpow2.f32 %v899_v47  ;;  %v954_v48 = vsel %vm487_vm0, %v5543_v51, 0.0 }
 0x168   : > { %v5559_v29 = vpop.eup %4821  ;;  %4841 = vpow2.f32 %v857_v58  ;;  %v955_v23 = vadd.f32 %v954_v48, %v953_v12  ;;  %v911_v49 = vmul.f32 1.442695, %v7381_v2  ;;  %v956_v4 = vsel %vm487_vm0, %v5552_v63, 0.0 }
 0x169   : > { %v934_v45 = vadd.f32 %v5520_v26, %v933_v36  ;;  %v5565_v36 = vpop.eup %4823  ;;  %4843 = vpow2.f32 %v903_v39  ;;  %v7382_v42 = vsub.f32 %v5297_v57, %v5400_v60  ;;  %v7383_v10 = vsub.f32 %v5274_v16, %v5348_v8 }
 0x16a   : > { %v5572_v61 = vpop.eup %4825  ;;  %4845 = vpow2.f32 %v861_v25  ;;  %v957_v14 = vadd.f32 %v956_v4, %v955_v23  ;;  %v958_v17 = vsel %vm487_vm0, %v5559_v29, 0.0  ;;  %v7384_v57 = vsub.f32 %v7362_v20, %v5400_v60 }
 0x16b   : > { %v935_v0 = vadd.f32 %v5526_v50, %v934_v45  ;;  %v869_v45 = vmul.f32 1.442695, %v7382_v42  ;;  %v5578_v58 = vpop.eup %4827  ;;  %4847 = vpow2.f32 %v907_v55  ;;  %v915_v1 = vmul.f32 1.442695, %v7383_v10 }
 0x16c   : > { %v5585_v39 = vpop.eup %4829  ;;  %4849 = vpow2.f32 %v865_v54  ;;  %v873_v7 = vmul.f32 1.442695, %v7384_v57  ;;  %v959_v25 = vadd.f32 %v958_v17, %v957_v14  ;;  %v7385_v16 = vsub.f32 %v5285_v38, %v5348_v8 }
 0x16d   : > { %v936_v19 = vadd.f32 %v5531_v53, %v935_v0  ;;  %v5591_v12 = vpop.eup %4831  ;;  %4851 = vpow2.f32 %v911_v49  ;;  %v960_v55 = vsel %vm487_vm0, %v5572_v61, 0.0  ;;  %v7386_v20 = vsub.f32 %v7363_v46, %v5400_v60 }
 0x16e   : > { %v919_v59 = vmul.f32 1.442695, %v7385_v16  ;;  %v5598_v48 = vpop.eup %4833  ;;  %4853 = vpow2.f32 %v869_v45  ;;  %v961_v54 = vadd.f32 %v960_v55, %v959_v25  ;;  %v962_v38 = vsel %vm487_vm0, %v5585_v39, 0.0 }
 0x16f   : > { %v937_v47 = vadd.f32 %v5565_v36, %v936_v19  ;;  %v877_v9 = vmul.f32 1.442695, %v7386_v20  ;;  %v5604_v23 = vpop.eup %4835  ;;  %4855 = vpow2.f32 %v915_v1  ;;  %v7387_v49 = vsub.f32 %v7364_v34, %v5400_v60 }
 0x170   : > { %v5608_v8 = vpop.eup %4837  ;;  %4857 = vpow2.f32 %v873_v7  ;;  %v964_v46 = vsel %vm487_vm0, %v5598_v48, 0.0  ;;  %v7388_v10 = vsub.f32 %v5187_v27, %v5400_v60  ;;  %v7389_v25 = vsub.f32 %v5197_v32, %v5400_v60 }
 0x171   : > { %v938_v0 = vadd.f32 %v5578_v58, %v937_v47  ;;  %v881_v4 = vmul.f32 1.442695, %v7387_v49  ;;  %v963_v47 = vadd.f32 %v962_v38, %v961_v54  ;;  %v5614_v42 = vpop.eup %4839  ;;  %4859 = vpow2.f32 %v919_v59 }
 0x172   : > { %v5618_v45 = vpop.eup %4841  ;;  %4861 = vpow2.f32 %v877_v9  ;;  %v885_v1 = vmul.f32 1.442695, %v7388_v10  ;;  %v966_v34 = vsel %vm487_vm0, %v5608_v8, 0.0  ;;  %v889_v16 = vmul.f32 1.442695, %v7389_v25 }
 0x173   : > { %v939_v19 = vadd.f32 %v5591_v12, %v938_v0  ;;  %v965_v17 = vadd.f32 %v964_v46, %v963_v47  ;;  %v5624_v0 = vpop.eup %4843  ;;  %4863 = vpow2.f32 %v881_v4  ;;  %v968_v27 = vsel %vm487_vm0, %v5618_v45, 0.0 }
 0x174   : > { %v5628_v57 = vpop.eup %4845  ;;  %4865 = vpow2.f32 %v885_v1  ;;  %v7390_v9 = vsub.f32 %v5211_v40, %v5400_v60  ;;  %v7391_v47 = vsub.f32 %v7365_v18, %v5400_v60 }
 0x175   : > { %v940_v2 = vadd.f32 %v5604_v23, %v939_v19  ;;  %v967_v59 = vadd.f32 %v966_v34, %v965_v17  ;;  %v5634_v55 = vpop.eup %4847  ;;  %v970_v32 = vsel %vm487_vm0, %v5628_v57, 0.0  ;;  %4867 = vpow2.f32 %v889_v16 }
 0x176   : > { %v5638_v19 = vpop.eup %4849  ;;  %v893_v54 = vmul.f32 1.442695, %v7390_v9  ;;  %v897_v46 = vmul.f32 1.442695, %v7391_v47  ;;  %v7392_v34 = vsub.f32 %v7366_v41, %v5400_v60 }
 0x177   : > { %v941_v14 = vadd.f32 %v5614_v42, %v940_v2  ;;  %v969_v38 = vadd.f32 %v968_v27, %v967_v59  ;;  %v5644_v2 = vpop.eup %4851  ;;  %v972_v40 = vsel %vm487_vm0, %v5638_v19, 0.0 }
 0x178   : > { %v5648_v49 = vpop.eup %4853  ;;  %4869 = vpow2.f32 %v893_v54 }
 0x179   : > { %v942_v7 = vadd.f32 %v5624_v0, %v941_v14  ;;  %v971_v14 = vadd.f32 %v970_v32, %v969_v38  ;;  %v5654_v10 = vpop.eup %4855  ;;  %v974_v18 = vsel %vm487_vm0, %v5648_v49, 0.0  ;;  %4871 = vpow2.f32 %v897_v46 }
 0x17a   : > { %v5658_v1 = vpop.eup %4857 }
 0x17b   : > { %v943_v20 = vadd.f32 %v5634_v55, %v942_v7  ;;  %v901_v7 = vmul.f32 1.442695, %v7392_v34  ;;  %v973_v25 = vadd.f32 %v972_v40, %v971_v14  ;;  %v5664_v16 = vpop.eup %4859  ;;  %v976_v41 = vsel %vm487_vm0, %v5658_v1, 0.0 }
 0x17c   : > { %v5668_v59 = vpop.eup %4861 }
 0x17d   : > { %v944_v4 = vadd.f32 %v5644_v2, %v943_v20  ;;  %v7393_v20 = vsub.f32 %v7367_v52, %v5400_v60  ;;  %v975_v54 = vadd.f32 %v974_v18, %v973_v25  ;;  %v5676_v38 = vpop.eup %4863  ;;  %4873 = vpow2.f32 %v901_v7 }
 0x17e   : > { %v978_v46 = vsel %vm487_vm0, %v5668_v59, 0.0  ;;  %v5683_v40 = vpop.eup %4865  ;;  %v980_v7 = vsel %vm487_vm0, %v5676_v38, 0.0  ;;  %v7395_v18 = vsub.f32 %v5279_v30, %v5400_v60 }
 0x17f   : > { %v945_v17 = vadd.f32 %v5654_v10, %v944_v4  ;;  %v905_v9 = vmul.f32 1.442695, %v7393_v20  ;;  %v7394_v4 = vsub.f32 %v7368_v28, %v5400_v60  ;;  %v977_v14 = vadd.f32 %v976_v41, %v975_v54  ;;  %v5690_v25 = vpop.eup %4867 }
 0x180   : > { %v917_v20 = vmul.f32 1.442695, %v7395_v18 }
 0x181   : > { %v946_v27 = vadd.f32 %v5664_v16, %v945_v17  ;;  %v909_v47 = vmul.f32 1.442695, %v7394_v4  ;;  %4875 = vpow2.f32 %v905_v9  ;;  %v913_v17 = vmul.f32 1.442695, %v818_v56 }
 0x182   : > { %v979_v34 = vadd.f32 %v978_v46, %v977_v14  ;;  %v5697_v9 = vpop.eup %4869  ;;  %v921_v56 = vmul.f32 1.442695, %v822_v31 }
 0x183   : > { %v947_v32 = vrot.slane %v946_v27, 4  ;;  %4877 = vpow2.f32 %v909_v47  ;;  %v5704_v4 = vpop.eup %4871  ;;  %v986_v14 = vsel %vm487_vm0, %v5697_v9, 0.0 }
 0x184   : > { %v981_v54 = vadd.f32 %v980_v7, %v979_v34  ;;  %4879 = vpow2.f32 %v913_v17  ;;  %v988_v43 = vsel %vm487_vm0, %v5704_v4, 0.0 }
 0x185   : > { %v948_v52 = vadd.f32 %v947_v32, %v946_v27  ;;  %v982_v27 = vsel %vm487_vm0, %v5683_v40, 0.0  ;;  %v984_v32 = vsel %vm487_vm0, %v5690_v25, 0.0  ;;  %4881 = vpow2.f32 %v917_v20 }
 0x186   : > { %v983_v41 = vadd.f32 %v982_v27, %v981_v54  ;;  %4883 = vpow2.f32 %v921_v56 }
 0x187   : > { %v949_v28 = vrot.slane %v948_v52, 2  ;;  %v5708_v46 = vpop.eup %4873 }
 0x188   : > { %v985_v47 = vadd.f32 %v984_v32, %v983_v41  ;;  %v990_v34 = vsel %vm487_vm0, %v5708_v46, 0.0 }
 0x189   : > { %v950_v15 = vadd.f32 %v949_v28, %v948_v52 }
 0x18a   : > { %v987_v17 = vadd.f32 %v986_v14, %v985_v47 }
 0x18b   : > { %v951_v30 = vrot.slane %v950_v15, 1  ;;  %v5712_v60 = vpop.eup %4875 }
 0x18c   : > { %v989_v31 = vadd.f32 %v988_v43, %v987_v17  ;;  %v992_v18 = vsel %vm487_vm0, %v5712_v60, 0.0 }
 0x18d   : > { %v952_v52 = vadd.f32 %v951_v30, %v950_v15  ;;  %v5716_v7 = vpop.eup %4877 }
 0x18e   : > { %v991_v28 = vadd.f32 %v990_v34, %v989_v31  ;;  %v5720_v20 = vpop.eup %4879  ;;  %v994_v27 = vsel %vm487_vm0, %v5716_v7, 0.0 }
 0x18f   : > { %4885 = vrcp.f32 %v952_v52  ;;  %v5724_v15 = vpop.eup %4881  ;;  %v996_v41 = vsel %vm487_vm0, %v5720_v20, 0.0 }
 0x190   : > { %v993_v54 = vadd.f32 %v992_v18, %v991_v28  ;;  %v5728_v32 = vpop.eup %4883  ;;  %v998_v47 = vsel %vm487_vm0, %v5724_v15, 0.0 }
 0x191   : > { %v1000_v17 = vsel %vm487_vm0, %v5728_v32, 0.0 }
 0x192   : > { %v995_v56 = vadd.f32 %v994_v27, %v993_v54 }
 0x194   : > { %v997_v30 = vadd.f32 %v996_v41, %v995_v56 }
 0x196   : > { %v999_v52 = vadd.f32 %v998_v47, %v997_v30 }
 0x198   : > { %v1001_v43 = vadd.f32 %v1000_v17, %v999_v52 }
 0x199   : > { %v4886_v14 = vpop.eup %4885 }
 0x19a   : > { %v5735_v31 = vmul.f32 %v4886_v14, %v5467_v13  ;;  %v5738_v34 = vmul.f32 %v4886_v14, %v5476_v37  ;;  %v5741_v28 = vmul.f32 %v4886_v14, %v5485_v44  ;;  %v5744_v18 = vmul.f32 %v4886_v14, %v5488_v24 }
 0x19b   : > { %v5747_v54 = vmul.f32 %v4886_v14, %v5491_v21  ;;  %v1002_v27 = vrot.slane %v1001_v43, 4  ;;  %v5752_v41 = vmul.f32 %v4886_v14, %v5497_v3  ;;  %v5755_v13 = vmul.f32 %v4886_v14, %v5506_v6 }
 0x19c   : > { %v5760_v44 = vmul.f32 %v4886_v14, %v5515_v35  ;;  %v5763_v24 = vmul.f32 %v4886_v14, %v5520_v26  ;;  %v5766_v21 = vmul.f32 %v4886_v14, %v5526_v50  ;;  %v5771_v47 = vmul.f32 %v4886_v14, %v5531_v53 }
 0x19d   : > { %v1003_v30 = vadd.f32 %v1002_v27, %v1001_v43  ;;  %v5774_v6 = vmul.f32 %v4886_v14, %v5565_v36  ;;  %v5781_v52 = vmul.f32 %v4886_v14, %v5578_v58  ;;  %v5784_v50 = vmul.f32 %v4886_v14, %v5591_v12 }
 0x19e   : > { %v5789_v43 = vmul.f32 %v4886_v14, %v5604_v23  ;;  %v5792_v36 = vmul.f32 %v4886_v14, %v5614_v42  ;;  %v5797_v26 = vmul.f32 %v4886_v14, %v5624_v0  ;;  %v5800_v58 = vmul.f32 %v4886_v14, %v5634_v55 }
 0x19f   : > { %v1004_v17 = vrot.slane %v1003_v30, 2  ;;  %v5803_v12 = vmul.f32 %v4886_v14, %v5644_v2  ;;  %v5808_v53 = vmul.f32 %v4886_v14, %v5654_v10  ;;  %v5811_v42 = vmul.f32 %v4886_v14, %v5664_v16 }
 0x1a0   : > { %v1010_v2 = vmul.f32 %v4886_v14, %v5424_v62  ;;  %v1014_v10 = vmul.f32 %v4886_v14, %v5446_v11  ;;  %v1016_v23 = vmul.f32 %v4886_v14, %v5459_v22 }
 0x1a1   : > { %v1005_v35 = vadd.f32 %v1004_v17, %v1003_v30  ;;  %v1012_v30 = vmul.f32 %v4886_v14, %v5432_v33 }
 0x1a3   : > { %v1006_v27 = vrot.slane %v1005_v35, 1 }
 0x1a5   : > { %v1007_v3 = vadd.f32 %v1006_v27, %v1005_v35  ;;  %v1062_v35 = vpack.c.bf16 %v1012_v30, %v1010_v2  ;;  %v4527_v30 = vld [vmem:[%s5129_s21 + $0x8c] sm:$0xff]  }
 0x1a7   : > { %4887 = vrcp.f32 %v1007_v3  ;;  %v1064_v3 = vpack.c.bf16 %v1016_v23, %v1014_v10  ;;  %v4529_v10 = vld [vmem:[%s5129_s21 + $0x9c] sm:$0xff]  }
 0x1b1   : > { %v4888_v17 = vpop.eup %4887 }
 0x1b2   : > { %v1011_v16 = vmul.f32 %v4888_v17, %v5538_v5  ;;  %v1013_v37 = vmul.f32 %v4888_v17, %v5543_v51  ;;  %v1015_v0 = vmul.f32 %v4888_v17, %v5552_v63  ;;  %v1017_v56 = vmul.f32 %v4888_v17, %v5559_v29 }
 0x1b3   : > { %v1019_v62 = vmul.f32 %v4888_v17, %v5572_v61  ;;  %v1021_v33 = vmul.f32 %v4888_v17, %v5585_v39  ;;  %v1023_v27 = vmul.f32 %v4888_v17, %v5598_v48  ;;  %v1035_v22 = vmul.f32 %v4888_v17, %v5658_v1 }
 0x1b4   : > { %v1063_v55 = vpack.c.bf16 %v1013_v37, %v1011_v16  ;;  %v1065_v11 = vpack.c.bf16 %v1017_v56, %v1015_v0  ;;  %v1037_v5 = vmul.f32 %v4888_v17, %v5668_v59  ;;  %v1039_v51 = vmul.f32 %v4888_v17, %v5676_v38  ;;  %v4530_v16 = vld [vmem:[%s5129_s21 + $0xa4] sm:$0xff]  }
 0x1b5   : > { %v1025_v63 = vmul.f32 %v4888_v17, %v5608_v8  ;;  %v1041_v29 = vmul.f32 %v4888_v17, %v5683_v40  ;;  %v1043_v14 = vmul.f32 %v4888_v17, %v5690_v25  ;;  %v1045_v61 = vmul.f32 %v4888_v17, %v5697_v9 }
 0x1b6   : > { %1108 = vmatprep.subr.bf16.mxu1 %v1063_v55  ;;  %v1075_v39 = vpack.c.bf16 %v1037_v5, %v1035_v22  ;;  %v1047_v48 = vmul.f32 %v4888_v17, %v5704_v4  ;;  %v1049_v56 = vmul.f32 %v4888_v17, %v5708_v46  ;;  %v1051_v1 = vmul.f32 %v4888_v17, %v5712_v60 }
 0x1b7   : > { %1109 = vmatpush1.bf16.msra.mxu1 %v1062_v35  ;;  %v1077_v59 = vpack.c.bf16 %v1041_v29, %v1039_v51  ;;  %v1079_v37 = vpack.c.bf16 %v1045_v61, %v1043_v14  ;;  %v1053_v38 = vmul.f32 %v4888_v17, %v5716_v7  ;;  %v1055_v8 = vmul.f32 %v4888_v17, %v5720_v20  ;;  %v4531_v35 = vld [vmem:[%s5129_s21 + $0xac] sm:$0xff]  }
 0x1b8   : > { %1110 = vmatprep.subr.bf16.mxu1 %v1065_v11  ;;  %v1067_v23 = vpack.c.bf16 %v1021_v33, %v1019_v62  ;;  %v1081_v40 = vpack.c.bf16 %v1049_v56, %v1047_v48  ;;  %v1057_v25 = vmul.f32 %v4888_v17, %v5724_v15  ;;  %v1059_v9 = vmul.f32 %v4888_v17, %v5728_v32  ;;  %v4533_v62 = vld [vmem:[%s5129_s21 + $0xbc] sm:$0xff]   ;;  %v4534_v33 = vld [vmem:[%s5129_s21 + $0xc4] ss:$0 sps:$4 sm:$0xff]  }
 0x1b9   : > { %v1083_v0 = vpack.c.bf16 %v1053_v38, %v1051_v1  ;;  %v1069_v55 = vpack.c.bf16 %v1025_v63, %v1023_v27  ;;  %v1027_v46 = vmul.f32 %v4888_v17, %v5618_v45  ;;  %v1029_v60 = vmul.f32 %v4888_v17, %v5628_v57 }
 0x1ba   : > { %v1085_v4 = vpack.c.bf16 %v1057_v25, %v1055_v8  ;;  %v7396_v7 = vpack.c.bf16 %v5738_v34, %v5735_v31  ;;  %v1031_v2 = vmul.f32 %v4888_v17, %v5638_v19  ;;  %v1033_v15 = vmul.f32 %v4888_v17, %v5648_v49  ;;  %v4528_v17 = vld [vmem:[%s5129_s21 + $0x94] sm:$0xff]  }
 0x1bb   : > { %1111 = vmatpush1.bf16.msra.mxu1 %v1064_v3  ;;  %v1071_v20 = vpack.c.bf16 %v1029_v60, %v1027_v46  ;;  %v7397_v32 = vpack.c.bf16 %v5744_v18, %v5741_v28  ;;  %v7398_v57 = vpack.c.bf16 %v5752_v41, %v5747_v54  ;;  %v7399_v31 = vpack.c.bf16 %v5760_v44, %v5755_v13  ;;  %v4035_v18 = vld [vmem:[%s5122_s17 + $0x10] sm:$0xff]  ;;  %v4036_v54 = vld [vmem:[%s5122_s17 + $0x18] sm:$0xff] }
 0x1bc   : > { %1112 = vmatprep.subr.bf16.mxu1 %v1067_v23  ;;  %v1073_v45 = vpack.c.bf16 %v1033_v15, %v1031_v2  ;;  %v7400_v19 = vpack.c.bf16 %v5766_v21, %v5763_v24  ;;  %v7401_v49 = vpack.c.bf16 %v5774_v6, %v5771_v47  ;;  %v7402_v34 = vpack.c.bf16 %v5784_v50, %v5781_v52  ;;  %v4519_v52 = vld [vmem:[%s5141_s24] ss:$8 sps:$4 sm:$0xff]   ;;  %v4532_v3 = vld [vmem:[%s5129_s21 + $0xb4] sm:$0xff]  }
 0x1bd   : > { %v7403_v28 = vpack.c.bf16 %v5792_v36, %v5789_v43  ;;  %v7404_v41 = vpack.c.bf16 %v5800_v58, %v5797_v26  ;;  %v1158_v13 = vmul.bf16 1048592000, %v4035_v18  ;;  %v1159_v44 = vmul.bf16 1048592000, %v4036_v54  ;;  %v4523_v36 = vld [vmem:[%s5129_s21 + $0x6c] sm:$0xff]   ;;  %v4524_v58 = vld [vmem:[%s5129_s21 + $0x74] sm:$0xff]  }
 0x1be   : > { %v1087_v24 = vpack.c.bf16 %v1059_v9, %v1059_v9  ;;  %v1086_v21 = vpack.c.bf16 %v5811_v42, %v5811_v42  ;;  %v7405_v47 = vpack.c.bf16 %v5808_v53, %v5803_v12  ;;  %v7406_v43 = vmov 0   ;;  %v4522_v53 = vld [vmem:[%s5129_s21 + $0x64] sm:$0xff]   ;;  %v4525_v12 = vld [vmem:[%s5129_s21 + $0x7c] sm:$0xff]  }
 0x1bf   : > { %1113 = vmatpush1.bf16.msra.mxu1 %v7396_v7  ;;  %v4076_v6 = vcombine.high %v1158_v13, %v1159_v44  ;;  %v4075_v50 = vcombine.low %v1158_v13, %v1159_v44  ;;  %v4526_v42 = vld [vmem:[%s5129_s21 + $0x84] sm:$0xff]  }
 0x1c0   : > { %1114 = vmatprep.subr.bf16.mxu1 %v1069_v55  ;;  %v1103_v26 = vsel %vm1101_vm2, %v1086_v21, 0 }
 0x1c3   : > { %1115 = vmatpush1.bf16.msra.mxu1 %v7397_v32 }
 0x1c4   : > { %1116 = vmatprep.subr.bf16.mxu1 %v1071_v20 }
 0x1c7   : > { %1117 = vmatpush1.bf16.msra.mxu1 %v7398_v57 }
 0x1c8   : > { %1118 = vmatprep.subr.bf16.mxu1 %v1073_v45 }
 0x1cb   : > { %1119 = vmatpush1.bf16.msra.mxu1 %v7399_v31 }
 0x1cc   : > { %1120 = vmatprep.subr.bf16.mxu1 %v1075_v39 }
 0x1cf   : > { %1121 = vmatpush1.bf16.msra.mxu1 %v7400_v19 }
 0x1d0   : > { %1122 = vmatprep.subr.bf16.mxu1 %v1077_v59 }
 0x1d3   : > { %1123 = vmatpush1.bf16.msra.mxu1 %v7401_v49 }
 0x1d4   : > { %1124 = vmatprep.subr.bf16.mxu1 %v1079_v37 }
 0x1d7   : > { %1125 = vmatpush1.bf16.msra.mxu1 %v7402_v34 }
 0x1d8   : > { %1126 = vmatprep.subr.bf16.mxu1 %v1081_v40 }
 0x1db   : > { %1127 = vmatpush1.bf16.msra.mxu1 %v7403_v28 }
 0x1dc   : > { %1128 = vmatprep.subr.bf16.mxu1 %v1083_v0 }
 0x1df   : > { %1129 = vmatpush1.bf16.msra.mxu1 %v7404_v41 }
 0x1e0   : > { %1130 = vmatprep.subr.bf16.mxu1 %v1085_v4 }
 0x1e3   : > { %1131 = vmatpush1.bf16.msra.mxu1 %v7405_v47 }
 0x1e4   : > { %4033 = vmatprep.subr.msk.bf16.mxu1 %vm1101_vm2, %v1087_v24 }
 0x1e7   : > { %1133 = vmatpush1.bf16.msra.mxu1 %v1103_v26 }
 0x1e8   : > { %1298 = vmatprep.subr.bf16.mxu1 %v4076_v6 }
 0x1ea   : > { %1141 = vmatmul.mubr.bf16.vlgmr.msra.gmra.mrb[24].mxu1 %v4519_v52 }
 0x1eb   : > { %1299 = vmatpush1.bf16.msra.mxu1 %v4075_v50  ;;  %1330 = vmatprep.mubr.bf16.mxu1 %v7406_v43 }
 0x1f2   : > { %4077 = vmatmul.mubr.msk.bf16.vlgmr.msra.gmra.mrb[28].mxu1 %vm487_vm0, %v4522_v53 }
 0x1f3   : > { %1340 = vmatprep.mubr.bf16.mxu1 %v7406_v43 }
 0x1fa   : > { %4078 = vmatmul.mubr.msk.bf16.gmra.mrb[32].mxu1 %vm487_vm0, %v4523_v36 }
 0x1fb   : > { %1350 = vmatprep.mubr.bf16.mxu1 %v7406_v43 }
 0x202   : > { %4079 = vmatmul.mubr.msk.bf16.gmra.mrb[36].mxu1 %vm487_vm0, %v4524_v58 }
 0x203   : > { %1360 = vmatprep.mubr.bf16.mxu1 %v7406_v43 }
 0x20a   : > { %4080 = vmatmul.mubr.msk.bf16.gmra.mrb[40].mxu1 %vm487_vm0, %v4525_v12 }
 0x20b   : > { %1370 = vmatprep.mubr.bf16.mxu1 %v7406_v43 }
 0x212   : > { %4081 = vmatmul.mubr.msk.bf16.gmra.mrb[44].mxu1 %vm487_vm0, %v4526_v42 }
 0x213   : > { %1380 = vmatprep.mubr.bf16.mxu1 %v7406_v43 }
 0x21a   : > { %4082 = vmatmul.mubr.msk.bf16.gmra.mrb[48].mxu1 %vm487_vm0, %v4527_v30 }
 0x21b   : > { %1390 = vmatprep.mubr.bf16.mxu1 %v7406_v43 }
 0x222   : > { %4083 = vmatmul.mubr.msk.bf16.gmra.mrb[52].mxu1 %vm487_vm0, %v4528_v17 }
 0x223   : > { %1400 = vmatprep.mubr.bf16.mxu1 %v7406_v43 }
 0x22a   : > { %4084 = vmatmul.mubr.msk.bf16.gmra.mrb[56].mxu1 %vm487_vm0, %v4529_v10 }
 0x22b   : > { %1410 = vmatprep.mubr.bf16.mxu1 %v7406_v43 }
 0x232   : > { %4085 = vmatmul.mubr.msk.bf16.gmra.mrb[60].mxu1 %vm487_vm0, %v4530_v16 }
 0x233   : > { %1420 = vmatprep.mubr.bf16.mxu1 %v7406_v43 }
 0x23a   : > { %4086 = vmatmul.mubr.msk.bf16.gmra.mrb[64].mxu1 %vm487_vm0, %v4531_v35 }
 0x23b   : > { %1430 = vmatprep.mubr.bf16.mxu1 %v7406_v43 }
 0x242   : > { %4087 = vmatmul.mubr.msk.bf16.gmra.mrb[68].mxu1 %vm487_vm0, %v4532_v3 }
 0x243   : > { %1440 = vmatprep.mubr.bf16.mxu1 %v7406_v43 }
 0x24a   : > { %4088 = vmatmul.mubr.msk.bf16.gmra.mrb[72].mxu1 %vm487_vm0, %v4533_v62 }
 0x24b   : > { %1450 = vmatprep.mubr.bf16.mxu1 %v7406_v43 }
 0x252   : > { %4089 = vmatmul.mubr.msk.bf16.gmra.mrb[76].mxu1 %vm487_vm0, %v4534_v33 }
 0x2bd   : > { %v1142_v27 = vpop.f32.mrb[24].mxu1 }
 0x2be   : > { %v1144_v11 = vpop.f32.mrb[25].mxu1 }
 0x2bf   : > { %v1146_v22 = vpop.f32.mrb[26].mxu1 }
 0x2c0   : > { %v1151_v5 = vpack.c.bf16 %v1146_v22, %v1142_v27  ;;  %v1148_v51 = vpop.f32.mrb[27].mxu1 }
 0x2c1   : > { %v1152_v63 = vpack.c.bf16 %v1148_v51, %v1144_v11 }
 0x2c2   : > { %1153 = vst [vmem:[#allocation2] sm:$0xff] %v1151_v5 }
 0x2c3   : > { %1154 = vst.msk [vmem:[#allocation2 + $0x8] sm:$0xff] %vm487_vm0, %v1152_v63 }
 0x2c5   : > { %v5923_v29 = vpop.f32.mrb[28].mxu1 }
 0x2c6   : > { %v5925_v14 = vpop.f32.mrb[29].mxu1 }
 0x2c7   : > { %v5927_v61 = vpop.f32.mrb[30].mxu1  ;;  %v1489_v59 = vsel %vm487_vm0, %v5925_v14, -inf }
 0x2c8   : > { %v5929_v39 = vpop.f32.mrb[31].mxu1 }
 0x2c9   : > { %v1490_v25 = vsel %vm487_vm0, %v5929_v39, -inf }
 0x2cd   : > { %v5931_v48 = vpop.f32.mrb[32].mxu1 }
 0x2ce   : > { %v1459_v56 = vmax.f32 %v5923_v29, %v5931_v48  ;;  %v5935_v1 = vpop.f32.mrb[33].mxu1 }
 0x2cf   : > { %v1491_v37 = vsel %vm487_vm0, %v5935_v1, -inf  ;;  %v5941_v38 = vpop.f32.mrb[34].mxu1 }
 0x2d0   : > { %v1492_v8 = vmax.f32 %v1489_v59, %v1491_v37  ;;  %v1460_v23 = vmax.f32 %v5927_v61, %v5941_v38  ;;  %v5945_v40 = vpop.f32.mrb[35].mxu1 }
 0x2d1   : > { %v1493_v9 = vsel %vm487_vm0, %v5945_v40, -inf }
 0x2d2   : > { %v1494_v0 = vmax.f32 %v1490_v25, %v1493_v9 }
 0x2d5   : > { %v5951_v4 = vpop.f32.mrb[36].mxu1 }
 0x2d6   : > { %v1461_v55 = vmax.f32 %v1459_v56, %v5951_v4  ;;  %v5954_v46 = vpop.f32.mrb[37].mxu1 }
 0x2d7   : > { %v1495_v60 = vsel %vm487_vm0, %v5954_v46, -inf  ;;  %v5958_v7 = vpop.f32.mrb[38].mxu1 }
 0x2d8   : > { %v1496_v20 = vmax.f32 %v1492_v8, %v1495_v60  ;;  %v1462_v2 = vmax.f32 %v1460_v23, %v5958_v7  ;;  %v5961_v15 = vpop.f32.mrb[39].mxu1 }
 0x2d9   : > { %v1497_v32 = vsel %vm487_vm0, %v5961_v15, -inf }
 0x2da   : > { %v1498_v45 = vmax.f32 %v1494_v0, %v1497_v32 }
 0x2dd   : > { %v5965_v57 = vpop.f32.mrb[40].mxu1 }
 0x2de   : > { %v1463_v31 = vmax.f32 %v1461_v55, %v5965_v57  ;;  %v5968_v19 = vpop.f32.mrb[41].mxu1 }
 0x2df   : > { %v1499_v49 = vsel %vm487_vm0, %v5968_v19, -inf  ;;  %v5972_v34 = vpop.f32.mrb[42].mxu1 }
 0x2e0   : > { %v1500_v28 = vmax.f32 %v1496_v20, %v1499_v49  ;;  %v1464_v18 = vmax.f32 %v1462_v2, %v5972_v34  ;;  %v5975_v54 = vpop.f32.mrb[43].mxu1 }
 0x2e1   : > { %v1501_v41 = vsel %vm487_vm0, %v5975_v54, -inf }
 0x2e2   : > { %v1502_v13 = vmax.f32 %v1498_v45, %v1501_v41 }
 0x2e5   : > { %v5979_v44 = vpop.f32.mrb[44].mxu1 }
 0x2e6   : > { %v1465_v24 = vmax.f32 %v1463_v31, %v5979_v44  ;;  %v5982_v21 = vpop.f32.mrb[45].mxu1 }
 0x2e7   : > { %v1503_v47 = vsel %vm487_vm0, %v5982_v21, -inf  ;;  %v5986_v6 = vpop.f32.mrb[46].mxu1 }
 0x2e8   : > { %v1504_v26 = vmax.f32 %v1500_v28, %v1503_v47  ;;  %v1466_v52 = vmax.f32 %v1464_v18, %v5986_v6  ;;  %v5989_v50 = vpop.f32.mrb[47].mxu1 }
 0x2e9   : > { %v1505_v53 = vsel %vm487_vm0, %v5989_v50, -inf }
 0x2ea   : > { %v1506_v36 = vmax.f32 %v1502_v13, %v1505_v53 }
 0x2ed   : > { %v5993_v58 = vpop.f32.mrb[48].mxu1 }
 0x2ee   : > { %v1467_v12 = vmax.f32 %v1465_v24, %v5993_v58  ;;  %v5996_v42 = vpop.f32.mrb[49].mxu1 }
 0x2ef   : > { %v1507_v30 = vsel %vm487_vm0, %v5996_v42, -inf  ;;  %v6000_v17 = vpop.f32.mrb[50].mxu1 }
 0x2f0   : > { %v1508_v10 = vmax.f32 %v1504_v26, %v1507_v30  ;;  %v1468_v16 = vmax.f32 %v1466_v52, %v6000_v17  ;;  %v6003_v35 = vpop.f32.mrb[51].mxu1 }
 0x2f1   : > { %v1509_v3 = vsel %vm487_vm0, %v6003_v35, -inf }
 0x2f2   : > { %v1510_v62 = vmax.f32 %v1506_v36, %v1509_v3 }
 0x2f5   : > { %v6007_v33 = vpop.f32.mrb[52].mxu1 }
 0x2f6   : > { %v1469_v27 = vmax.f32 %v1467_v12, %v6007_v33  ;;  %v6010_v11 = vpop.f32.mrb[53].mxu1 }
 0x2f7   : > { %v1511_v22 = vsel %vm487_vm0, %v6010_v11, -inf  ;;  %v6014_v5 = vpop.f32.mrb[54].mxu1 }
 0x2f8   : > { %v1512_v51 = vmax.f32 %v1508_v10, %v1511_v22  ;;  %v1470_v63 = vmax.f32 %v1468_v16, %v6014_v5  ;;  %v6017_v56 = vpop.f32.mrb[55].mxu1 }
 0x2f9   : > { %v1513_v59 = vsel %vm487_vm0, %v6017_v56, -inf }
 0x2fa   : > { %v1514_v37 = vmax.f32 %v1510_v62, %v1513_v59 }
 0x2fd   : > { %v6021_v8 = vpop.f32.mrb[56].mxu1 }
 0x2fe   : > { %v1471_v23 = vmax.f32 %v1469_v27, %v6021_v8  ;;  %v6024_v25 = vpop.f32.mrb[57].mxu1 }
 0x2ff   : > { %v1515_v9 = vsel %vm487_vm0, %v6024_v25, -inf  ;;  %v6028_v0 = vpop.f32.mrb[58].mxu1 }
 0x300   : > { %v1516_v55 = vmax.f32 %v1512_v51, %v1515_v9  ;;  %v1472_v60 = vmax.f32 %v1470_v63, %v6028_v0  ;;  %v6031_v20 = vpop.f32.mrb[59].mxu1 }
 0x301   : > { %v1517_v2 = vsel %vm487_vm0, %v6031_v20, -inf }
 0x302   : > { %v1518_v32 = vmax.f32 %v1514_v37, %v1517_v2 }
 0x305   : > { %v6035_v45 = vpop.f32.mrb[60].mxu1 }
 0x306   : > { %v1473_v31 = vmax.f32 %v1471_v23, %v6035_v45  ;;  %v6038_v49 = vpop.f32.mrb[61].mxu1 }
 0x307   : > { %v1519_v28 = vsel %vm487_vm0, %v6038_v49, -inf  ;;  %v6042_v18 = vpop.f32.mrb[62].mxu1 }
 0x308   : > { %v1520_v41 = vmax.f32 %v1516_v55, %v1519_v28  ;;  %v1474_v13 = vmax.f32 %v1472_v60, %v6042_v18  ;;  %v6045_v24 = vpop.f32.mrb[63].mxu1 }
 0x309   : > { %7407 = vst [vmem:[#allocation10_spill] sm:$0xff] %v6045_v24  ;;  %v1521_v47 = vsel %vm487_vm0, %v6045_v24, -inf }
 0x30a   : > { %v1522_v26 = vmax.f32 %v1518_v32, %v1521_v47 }
 0x30d   : > { %v6049_v52 = vpop.f32.mrb[64].mxu1 }
 0x30e   : > { %v1475_v53 = vmax.f32 %v1473_v31, %v6049_v52  ;;  %v6052_v36 = vpop.f32.mrb[65].mxu1 }
 0x30f   : > { %7408 = vst [vmem:[#allocation11_spill] sm:$0xff] %v6052_v36  ;;  %v1523_v12 = vsel %vm487_vm0, %v6052_v36, -inf  ;;  %v6056_v30 = vpop.f32.mrb[66].mxu1 }
 0x310   : > { %v1524_v10 = vmax.f32 %v1520_v41, %v1523_v12  ;;  %v1476_v16 = vmax.f32 %v1474_v13, %v6056_v30  ;;  %v6059_v3 = vpop.f32.mrb[67].mxu1 }
 0x311   : > { %7409 = vst [vmem:[#allocation3_spill] sm:$0xff] %v6059_v3  ;;  %v1525_v62 = vsel %vm487_vm0, %v6059_v3, -inf }
 0x312   : > { %v1526_v27 = vmax.f32 %v1522_v26, %v1525_v62 }
 0x315   : > { %v6063_v22 = vpop.f32.mrb[68].mxu1 }
 0x316   : > { %v1477_v51 = vmax.f32 %v1475_v53, %v6063_v22  ;;  %v6066_v63 = vpop.f32.mrb[69].mxu1 }
 0x317   : > { %7410 = vst [vmem:[#allocation4_spill] sm:$0xff] %v6066_v63  ;;  %v1527_v59 = vsel %vm487_vm0, %v6066_v63, -inf  ;;  %v6070_v37 = vpop.f32.mrb[70].mxu1 }
 0x318   : > { %v1528_v23 = vmax.f32 %v1524_v10, %v1527_v59  ;;  %v1478_v9 = vmax.f32 %v1476_v16, %v6070_v37  ;;  %v6073_v55 = vpop.f32.mrb[71].mxu1 }
 0x319   : > { %7411 = vst [vmem:[#allocation5_spill] sm:$0xff] %v6073_v55  ;;  %v1529_v60 = vsel %vm487_vm0, %v6073_v55, -inf }
 0x31a   : > { %v1530_v2 = vmax.f32 %v1526_v27, %v1529_v60 }
 0x31d   : > { %v6077_v32 = vpop.f32.mrb[72].mxu1 }
 0x31e   : > { %v1479_v31 = vmax.f32 %v1477_v51, %v6077_v32  ;;  %v6080_v28 = vpop.f32.mrb[73].mxu1 }
 0x31f   : > { %7412 = vst [vmem:[#allocation6_spill] sm:$0xff] %v6080_v28  ;;  %v1531_v41 = vsel %vm487_vm0, %v6080_v28, -inf  ;;  %v6084_v13 = vpop.f32.mrb[74].mxu1 }
 0x320   : > { %v1532_v47 = vmax.f32 %v1528_v23, %v1531_v41  ;;  %v1480_v26 = vmax.f32 %v1478_v9, %v6084_v13  ;;  %v6087_v53 = vpop.f32.mrb[75].mxu1 }
 0x321   : > { %7413 = vst [vmem:[#allocation7_spill] sm:$0xff] %v6087_v53  ;;  %v1533_v12 = vsel %vm487_vm0, %v6087_v53, -inf }
 0x322   : > { %v1534_v10 = vmax.f32 %v1530_v2, %v1533_v12 }
 0x325   : > { %v6091_v16 = vpop.f32.mrb[76].mxu1 }
 0x326   : > { %v1481_v62 = vmax.f32 %v1479_v31, %v6091_v16  ;;  %v6094_v27 = vpop.f32.mrb[77].mxu1 }
 0x327   : > { %v1535_v51 = vsel %vm487_vm0, %v6094_v27, -inf  ;;  %v1456_v59 = vpop.f32.mrb[78].mxu1 }
 0x328   : > { %v1482_v60 = vmax.f32 %v1481_v62, %v1480_v26  ;;  %v1536_v23 = vmax.f32 %v1532_v47, %v1535_v51  ;;  %v1457_v41 = vpop.f32.mrb[79].mxu1 }
 0x32a   : > { %v1483_v9 = vrot.slane %v1482_v60, 4  ;;  %v1537_v43 = vmax.f32 %v1536_v23, %v1534_v10 }
 0x32c   : > { %v1484_v28 = vmax.f32 %v1482_v60, %v1483_v9  ;;  %v1538_v55 = vrot.slane %v1537_v43, 4 }
 0x32e   : > { %v1485_v63 = vrot.slane %v1484_v28, 2  ;;  %v1539_v53 = vmax.f32 %v1537_v43, %v1538_v55 }
 0x330   : > { %v1486_v2 = vmax.f32 %v1484_v28, %v1485_v63  ;;  %v1540_v12 = vrot.slane %v1539_v53, 2 }
 0x332   : > { %v1487_v3 = vrot.slane %v1486_v2, 1  ;;  %v1541_v31 = vmax.f32 %v1539_v53, %v1540_v12 }
 0x334   : > { %v6098_v36 = vmax.f32 %v1486_v2, %v1487_v3  ;;  %v1542_v2 = vrot.slane %v1541_v31, 1 }
 0x336   : > { %v1544_v24 = vsub.f32 %v5923_v29, %v6098_v36  ;;  %v1546_v26 = vsub.f32 %v5927_v61, %v6098_v36  ;;  %v1548_v47 = vsub.f32 %v5931_v48, %v6098_v36  ;;  %v1550_v10 = vsub.f32 %v5941_v38, %v6098_v36 }
 0x337   : > { %v1552_v43 = vsub.f32 %v5951_v4, %v6098_v36  ;;  %v1554_v3 = vsub.f32 %v5958_v7, %v6098_v36  ;;  %v1556_v63 = vsub.f32 %v5965_v57, %v6098_v36  ;;  %v1558_v29 = vsub.f32 %v5972_v34, %v6098_v36 }
 0x338   : > { %v1560_v61 = vsub.f32 %v5979_v44, %v6098_v36  ;;  %v1562_v48 = vsub.f32 %v5986_v6, %v6098_v36  ;;  %v1564_v38 = vsub.f32 %v5993_v58, %v6098_v36  ;;  %v1566_v4 = vsub.f32 %v6000_v17, %v6098_v36 }
 0x339   : > { %v1568_v7 = vsub.f32 %v6007_v33, %v6098_v36  ;;  %v1570_v57 = vsub.f32 %v6014_v5, %v6098_v36  ;;  %v1572_v34 = vsub.f32 %v6021_v8, %v6098_v36  ;;  %v1574_v44 = vsub.f32 %v6028_v0, %v6098_v36 }
 0x33a   : > { %v1576_v6 = vsub.f32 %v6035_v45, %v6098_v36  ;;  %v1594_v41 = vmul.f32 1.442695, %v1544_v24  ;;  %v1598_v9 = vmul.f32 1.442695, %v1546_v26  ;;  %v1602_v12 = vmul.f32 1.442695, %v1548_v47 }
 0x33b   : > { %v1606_v53 = vmul.f32 1.442695, %v1550_v10  ;;  %v6150_v62 = vmax.f32 %v1541_v31, %v1542_v2  ;;  %v1610_v51 = vmul.f32 1.442695, %v1552_v43  ;;  %v1614_v28 = vmul.f32 1.442695, %v1554_v3 }
 0x33c   : > { %4889 = vpow2.f32 %v1594_v41  ;;  %v1618_v59 = vmul.f32 1.442695, %v1556_v63  ;;  %v1622_v47 = vmul.f32 1.442695, %v1558_v29  ;;  %v1626_v3 = vmul.f32 1.442695, %v1560_v61 }
 0x33d   : > { %4891 = vpow2.f32 %v1598_v9  ;;  %v1545_v60 = vsub.f32 %v5925_v14, %v6150_v62  ;;  %v1547_v23 = vsub.f32 %v5929_v39, %v6150_v62  ;;  %v1549_v24 = vsub.f32 %v5935_v1, %v6150_v62  ;;  %v7417_v41 = vld [vmem:[#allocation4_spill] sm:$0xff]  ;;  %v7419_v39 = vld [vmem:[#allocation6_spill] sm:$0xff]  ;;  %v7420_v14 = vld [vmem:[#allocation7_spill] sm:$0xff] }
 0x33e   : > { %4893 = vpow2.f32 %v1602_v12  ;;  %v1551_v26 = vsub.f32 %v5945_v40, %v6150_v62  ;;  %v1553_v31 = vsub.f32 %v5954_v46, %v6150_v62  ;;  %v1555_v10 = vsub.f32 %v5961_v15, %v6150_v62  ;;  %v7414_v12 = vld [vmem:[#allocation10_spill] sm:$0xff] }
 0x33f   : > { %4895 = vpow2.f32 %v1606_v53  ;;  %v1630_v9 = vmul.f32 1.442695, %v1562_v48  ;;  %v7418_v48 = vld [vmem:[#allocation5_spill] sm:$0xff]  ;;  %v1589_v29 = vsub.f32 %v7419_v39, %v6150_v62  ;;  %v1593_v40 = vsub.f32 %v6094_v27, %v6150_v62 }
 0x340   : > { %4897 = vpow2.f32 %v1610_v51  ;;  %v7416_v51 = vld [vmem:[#allocation3_spill] sm:$0xff]  ;;  %v1596_v33 = vmul.f32 1.442695, %v1545_v60  ;;  %v1616_v0 = vmul.f32 1.442695, %v1555_v10  ;;  %v7422_v45 = vsub.f32 %v5968_v19, %v6150_v62 }
 0x341   : > { %4899 = vpow2.f32 %v1614_v28  ;;  %v7415_v28 = vld [vmem:[#allocation11_spill] sm:$0xff]  ;;  %v7423_v15 = vsub.f32 %v6049_v52, %v6098_v36  ;;  %v7425_v19 = vsub.f32 %v6056_v30, %v6098_v36 }
 0x342   : > { %4901 = vpow2.f32 %v1618_v59 }
 0x343   : > { %4903 = vpow2.f32 %v1622_v47  ;;  %v1634_v47 = vmul.f32 1.442695, %v1564_v38  ;;  %v1646_v38 = vmul.f32 1.442695, %v1570_v57  ;;  %v1608_v57 = vmul.f32 1.442695, %v1551_v26 }
 0x344   : > { %4905 = vpow2.f32 %v1626_v3  ;;  %v1642_v3 = vmul.f32 1.442695, %v1568_v7  ;;  %v1666_v10 = vmul.f32 1.442695, %v7423_v15 }
 0x345   : > { %4907 = vpow2.f32 %v1630_v9 }
 0x346   : > { %v6174_v43 = vpop.eup %4889  ;;  %4909 = vpow2.f32 %v1634_v47  ;;  %v1604_v47 = vmul.f32 1.442695, %v1549_v24  ;;  %v1658_v24 = vmul.f32 1.442695, %v1576_v6  ;;  %v1620_v6 = vmul.f32 1.442695, %v7422_v45 }
 0x347   : > { %v6182_v53 = vpop.eup %4891 }
 0x348   : > { %v1694_v2 = vadd.f32 %v6182_v53, %v6174_v43  ;;  %v6196_v59 = vpop.eup %4893 }
 0x349   : > { %v6209_v55 = vpop.eup %4895 }
 0x34a   : > { %v1695_v1 = vadd.f32 %v6196_v59, %v1694_v2  ;;  %v6217_v46 = vpop.eup %4897  ;;  %v1638_v2 = vmul.f32 1.442695, %v1566_v4 }
 0x34b   : > { %v6226_v58 = vpop.eup %4899 }
 0x34c   : > { %v1696_v61 = vadd.f32 %v6209_v55, %v1695_v1  ;;  %v1650_v1 = vmul.f32 1.442695, %v1572_v34  ;;  %v6235_v4 = vpop.eup %4901  ;;  %4911 = vpow2.f32 %v1638_v2  ;;  %v1654_v34 = vmul.f32 1.442695, %v1574_v44 }
 0x34d   : > { %4913 = vpow2.f32 %v1642_v3  ;;  %v6238_v9 = vpop.eup %4903 }
 0x34e   : > { %v1697_v63 = vadd.f32 %v6217_v46, %v1696_v61  ;;  %v1600_v61 = vmul.f32 1.442695, %v1547_v23  ;;  %4915 = vpow2.f32 %v1646_v38  ;;  %v6241_v8 = vpop.eup %4905 }
 0x34f   : > { %4917 = vpow2.f32 %v1650_v1  ;;  %v6247_v23 = vpop.eup %4907 }
 0x350   : > { %v1698_v17 = vadd.f32 %v6226_v58, %v1697_v63  ;;  %4919 = vpow2.f32 %v1596_v33  ;;  %v1612_v63 = vmul.f32 1.442695, %v1553_v31  ;;  %v6256_v44 = vpop.eup %4909  ;;  %v7421_v31 = vsub.f32 %v6042_v18, %v6098_v36 }
 0x351   : > { %4921 = vpow2.f32 %v1600_v61  ;;  %v1670_v61 = vmul.f32 1.442695, %v7425_v19 }
 0x352   : > { %v1699_v7 = vadd.f32 %v6235_v4, %v1698_v17  ;;  %4923 = vpow2.f32 %v1604_v47  ;;  %v1662_v2 = vmul.f32 1.442695, %v7421_v31  ;;  %v7424_v17 = vsub.f32 %v5975_v54, %v6150_v62 }
 0x353   : > { %4925 = vpow2.f32 %v1608_v57  ;;  %v7427_v54 = vsub.f32 %v6063_v22, %v6098_v36  ;;  %v7429_v22 = vsub.f32 %v6070_v37, %v6098_v36  ;;  %v7431_v37 = vsub.f32 %v6077_v32, %v6098_v36 }
 0x354   : > { %v1700_v5 = vadd.f32 %v6238_v9, %v1699_v7  ;;  %4927 = vpow2.f32 %v1654_v34  ;;  %v1624_v33 = vmul.f32 1.442695, %v7424_v17  ;;  %v7433_v32 = vsub.f32 %v6084_v13, %v6098_v36 }
 0x355   : > { %4929 = vpow2.f32 %v1612_v63  ;;  %v4537_v63 = vld [vmem:[%s5141_s24 + $0x14] ss:$8 sps:$4 sm:$0xff]   ;;  %v1682_v17 = vmul.f32 1.442695, %v7431_v37  ;;  %v7435_v13 = vsub.f32 %v6091_v16, %v6098_v36 }
 0x356   : > { %v1701_v60 = vadd.f32 %v6241_v8, %v1700_v5  ;;  %v6265_v38 = vpop.eup %4911  ;;  %4931 = vpow2.f32 %v1658_v24  ;;  %v7426_v5 = vsub.f32 %v5982_v21, %v6150_v62  ;;  %4095 = vmatprep.mubr.msk.bf16.mxu0 %vm1097_vm1, %v4537_v63 }
 0x357   : > { %v6270_v1 = vpop.eup %4913  ;;  %4933 = vpow2.f32 %v1616_v0 }
 0x358   : > { %v1702_v26 = vadd.f32 %v6247_v23, %v1701_v60  ;;  %v6276_v7 = vpop.eup %4915  ;;  %4935 = vpow2.f32 %v1662_v2  ;;  %v1628_v57 = vmul.f32 1.442695, %v7426_v5  ;;  %v1674_v60 = vmul.f32 1.442695, %v7427_v54 }
 0x359   : > { %v6281_v47 = vpop.eup %4917  ;;  %4937 = vpow2.f32 %v1620_v6  ;;  %v1678_v2 = vmul.f32 1.442695, %v7429_v22  ;;  %v7430_v6 = vsub.f32 %v5996_v42, %v6150_v62  ;;  %v7432_v42 = vsub.f32 %v6003_v35, %v6150_v62 }
 0x35a   : > { %v1703_v3 = vadd.f32 %v6256_v44, %v1702_v26  ;;  %v6287_v34 = vpop.eup %4919  ;;  %4939 = vpow2.f32 %v1666_v10  ;;  %v7428_v26 = vsub.f32 %v5989_v50, %v6150_v62  ;;  %v1686_v54 = vmul.f32 1.442695, %v7433_v32 }
 0x35b   : > { %v6293_v24 = vpop.eup %4921  ;;  %4941 = vpow2.f32 %v1624_v33  ;;  %v1724_v21 = vsel %vm487_vm0, %v6287_v34, 0.0  ;;  %v1636_v15 = vmul.f32 1.442695, %v7430_v6  ;;  %v7434_v35 = vsub.f32 %v6010_v11, %v6150_v62 }
 0x35c   : > { %v1704_v18 = vadd.f32 %v6265_v38, %v1703_v3  ;;  %v1632_v0 = vmul.f32 1.442695, %v7428_v26  ;;  %v6301_v31 = vpop.eup %4923  ;;  %4943 = vpow2.f32 %v1670_v61  ;;  %v1725_v3 = vsel %vm487_vm0, %v6293_v24, 0.0 }
 0x35d   : > { %v6309_v45 = vpop.eup %4925  ;;  %4945 = vpow2.f32 %v1628_v57  ;;  %v1726_v10 = vadd.f32 %v1725_v3, %v1724_v21  ;;  %v1727_v33 = vsel %vm487_vm0, %v6301_v31, 0.0  ;;  %v1644_v26 = vmul.f32 1.442695, %v7434_v35 }
 0x35e   : > { %v1705_v52 = vadd.f32 %v6270_v1, %v1704_v18  ;;  %v6315_v18 = vpop.eup %4927  ;;  %4947 = vpow2.f32 %v1674_v60  ;;  %v1729_v60 = vsel %vm487_vm0, %v6309_v45, 0.0  ;;  %v1690_v22 = vmul.f32 1.442695, %v7435_v13 }
 0x35f   : > { %v6322_v19 = vpop.eup %4929  ;;  %4949 = vpow2.f32 %v1632_v0  ;;  %v1728_v5 = vadd.f32 %v1727_v33, %v1726_v10  ;;  %v7436_v11 = vsub.f32 %v6017_v56, %v6150_v62  ;;  %v7438_v32 = vsub.f32 %v6031_v20, %v6150_v62 }
 0x360   : > { %v1706_v30 = vadd.f32 %v6276_v7, %v1705_v52  ;;  %v1640_v52 = vmul.f32 1.442695, %v7432_v42  ;;  %v6328_v57 = vpop.eup %4931  ;;  %4951 = vpow2.f32 %v1678_v2  ;;  %v1731_v2 = vsel %vm487_vm0, %v6322_v19, 0.0 }
 0x361   : > { %v6335_v63 = vpop.eup %4933  ;;  %4953 = vpow2.f32 %v1636_v15  ;;  %v1730_v0 = vadd.f32 %v1729_v60, %v1728_v5  ;;  %v1648_v6 = vmul.f32 1.442695, %v7436_v11 }
 0x362   : > { %v1707_v50 = vadd.f32 %v6281_v47, %v1706_v30  ;;  %v6341_v21 = vpop.eup %4935  ;;  %4955 = vpow2.f32 %v1682_v17  ;;  %v1733_v36 = vsel %vm487_vm0, %v6335_v63, 0.0  ;;  %v7437_v17 = vsub.f32 %v6024_v25, %v6150_v62 }
 0x363   : > { %v6348_v3 = vpop.eup %4937  ;;  %4957 = vpow2.f32 %v1640_v52  ;;  %v1732_v15 = vadd.f32 %v1731_v2, %v1730_v0  ;;  %v7439_v0 = vsub.f32 %v6038_v49, %v6150_v62 }
 0x364   : > { %v1708_v61 = vadd.f32 %v6315_v18, %v1707_v50  ;;  %v6354_v10 = vpop.eup %4939  ;;  %4959 = vpow2.f32 %v1686_v54  ;;  %v1652_v33 = vmul.f32 1.442695, %v7437_v17  ;;  %v1735_v56 = vsel %vm487_vm0, %v6348_v3, 0.0 }
 0x365   : > { %v6358_v16 = vpop.eup %4941  ;;  %4961 = vpow2.f32 %v1644_v26  ;;  %v1656_v54 = vmul.f32 1.442695, %v7438_v32  ;;  %v1660_v13 = vmul.f32 1.442695, %v7439_v0 }
 0x366   : > { %v1709_v30 = vadd.f32 %v6328_v57, %v1708_v61  ;;  %v1734_v61 = vadd.f32 %v1733_v36, %v1732_v15  ;;  %v6364_v42 = vpop.eup %4943  ;;  %4963 = vpow2.f32 %v1690_v22  ;;  %v1737_v25 = vsel %vm487_vm0, %v6358_v16, 0.0 }
 0x367   : > { %v6368_v52 = vpop.eup %4945  ;;  %4965 = vpow2.f32 %v1648_v6  ;;  %v7440_v6 = vsub.f32 %v7414_v12, %v6150_v62 }
 0x368   : > { %v1710_v50 = vadd.f32 %v6341_v21, %v1709_v30  ;;  %v1736_v60 = vadd.f32 %v1735_v56, %v1734_v61  ;;  %v6374_v30 = vpop.eup %4947  ;;  %4967 = vpow2.f32 %v1652_v33  ;;  %v1739_v20 = vsel %vm487_vm0, %v6368_v52, 0.0 }
 0x369   : > { %v6378_v35 = vpop.eup %4949  ;;  %4969 = vpow2.f32 %v1656_v54  ;;  %v1664_v15 = vmul.f32 1.442695, %v7440_v6  ;;  %v7441_v61 = vsub.f32 %v7415_v28, %v6150_v62 }
 0x36a   : > { %v1711_v37 = vadd.f32 %v6354_v10, %v1710_v50  ;;  %v1738_v22 = vadd.f32 %v1737_v25, %v1736_v60  ;;  %v6384_v2 = vpop.eup %4951  ;;  %v1741_v49 = vsel %vm487_vm0, %v6378_v35, 0.0  ;;  %4971 = vpow2.f32 %v1660_v13 }
 0x36b   : > { %v6388_v50 = vpop.eup %4953  ;;  %v1668_v56 = vmul.f32 1.442695, %v7441_v61  ;;  %4973 = vpow2.f32 %v1664_v15  ;;  %v7442_v25 = vsub.f32 %v7416_v51, %v6150_v62 }
 0x36c   : > { %v1712_v5 = vadd.f32 %v6364_v42, %v1711_v37  ;;  %v1740_v36 = vadd.f32 %v1739_v20, %v1738_v22  ;;  %v6394_v37 = vpop.eup %4955  ;;  %v1743_v12 = vsel %vm487_vm0, %v6388_v50, 0.0 }
 0x36d   : > { %v6398_v17 = vpop.eup %4957  ;;  %4975 = vpow2.f32 %v1668_v56 }
 0x36e   : > { %v1713_v26 = vadd.f32 %v6374_v30, %v1712_v5  ;;  %v1742_v5 = vadd.f32 %v1741_v49, %v1740_v36  ;;  %v6404_v32 = vpop.eup %4959  ;;  %v1745_v28 = vsel %vm487_vm0, %v6398_v17, 0.0 }
 0x36f   : > { %v6408_v54 = vpop.eup %4961 }
 0x370   : > { %v1714_v11 = vadd.f32 %v6384_v2, %v1713_v26  ;;  %v1672_v26 = vmul.f32 1.442695, %v7442_v25  ;;  %v1744_v0 = vadd.f32 %v1743_v12, %v1742_v5  ;;  %v6414_v13 = vpop.eup %4963  ;;  %v1747_v51 = vsel %vm487_vm0, %v6408_v54, 0.0 }
 0x371   : > { %v6418_v22 = vpop.eup %4965 }
 0x372   : > { %v1715_v33 = vadd.f32 %v6394_v37, %v1714_v11  ;;  %v7443_v11 = vsub.f32 %v7417_v41, %v6150_v62  ;;  %v1746_v15 = vadd.f32 %v1745_v28, %v1744_v0  ;;  %v6426_v36 = vpop.eup %4967  ;;  %4977 = vpow2.f32 %v1672_v26 }
 0x373   : > { %v1749_v56 = vsel %vm487_vm0, %v6418_v22, 0.0  ;;  %v6433_v12 = vpop.eup %4969  ;;  %v1751_v26 = vsel %vm487_vm0, %v6426_v36, 0.0  ;;  %v7445_v28 = vsub.f32 %v7420_v14, %v6150_v62 }
 0x374   : > { %v1716_v60 = vadd.f32 %v6404_v32, %v1715_v33  ;;  %v1676_v6 = vmul.f32 1.442695, %v7443_v11  ;;  %v7444_v33 = vsub.f32 %v7418_v48, %v6150_v62  ;;  %v1748_v5 = vadd.f32 %v1747_v51, %v1746_v15  ;;  %v6440_v0 = vpop.eup %4971 }
 0x375   : > { %v1688_v11 = vmul.f32 1.442695, %v7445_v28 }
 0x376   : > { %v1717_v20 = vadd.f32 %v6414_v13, %v1716_v60  ;;  %v1680_v61 = vmul.f32 1.442695, %v7444_v33  ;;  %4979 = vpow2.f32 %v1676_v6  ;;  %v1684_v60 = vmul.f32 1.442695, %v1589_v29  ;;  %v6447_v6 = vpop.eup %4973 }
 0x377   : > { %v1750_v25 = vadd.f32 %v1749_v56, %v1748_v5  ;;  %v1692_v29 = vmul.f32 1.442695, %v1593_v40  ;;  %v6454_v33 = vpop.eup %4975  ;;  %v1757_v5 = vsel %vm487_vm0, %v6447_v6, 0.0 }
 0x378   : > { %v1718_v49 = vrot.slane %v1717_v20, 4  ;;  %4981 = vpow2.f32 %v1680_v61  ;;  %v1759_v27 = vsel %vm487_vm0, %v6454_v33, 0.0 }
 0x379   : > { %v1752_v15 = vadd.f32 %v1751_v26, %v1750_v25  ;;  %4983 = vpow2.f32 %v1684_v60 }
 0x37a   : > { %v1719_v41 = vadd.f32 %v1718_v49, %v1717_v20  ;;  %v1753_v20 = vsel %vm487_vm0, %v6433_v12, 0.0  ;;  %v1755_v49 = vsel %vm487_vm0, %v6440_v0, 0.0  ;;  %4985 = vpow2.f32 %v1688_v11 }
 0x37b   : > { %v1754_v51 = vadd.f32 %v1753_v20, %v1752_v15  ;;  %4987 = vpow2.f32 %v1692_v29 }
 0x37c   : > { %v1720_v48 = vrot.slane %v1719_v41, 2  ;;  %v6458_v56 = vpop.eup %4977 }
 0x37d   : > { %v1756_v61 = vadd.f32 %v1755_v49, %v1754_v51  ;;  %v1761_v25 = vsel %vm487_vm0, %v6458_v56, 0.0 }
 0x37e   : > { %v1721_v39 = vadd.f32 %v1720_v48, %v1719_v41 }
 0x37f   : > { %v1758_v60 = vadd.f32 %v1757_v5, %v1756_v61 }
 0x380   : > { %v1722_v14 = vrot.slane %v1721_v39, 1  ;;  %v6462_v62 = vpop.eup %4979 }
 0x381   : > { %v1760_v40 = vadd.f32 %v1759_v27, %v1758_v60  ;;  %v1763_v28 = vsel %vm487_vm0, %v6462_v62, 0.0 }
 0x382   : > { %v1723_v41 = vadd.f32 %v1722_v14, %v1721_v39  ;;  %v6466_v26 = vpop.eup %4981 }
 0x383   : > { %v1762_v48 = vadd.f32 %v1761_v25, %v1760_v40  ;;  %v6470_v11 = vpop.eup %4983  ;;  %v1765_v20 = vsel %vm487_vm0, %v6466_v26, 0.0 }
 0x384   : > { %4989 = vrcp.f32 %v1723_v41  ;;  %v6474_v39 = vpop.eup %4985  ;;  %v1767_v51 = vsel %vm487_vm0, %v6470_v11, 0.0 }
 0x385   : > { %v1764_v15 = vadd.f32 %v1763_v28, %v1762_v48  ;;  %v6478_v49 = vpop.eup %4987  ;;  %v1769_v61 = vsel %vm487_vm0, %v6474_v39, 0.0 }
 0x386   : > { %v1771_v60 = vsel %vm487_vm0, %v6478_v49, 0.0 }
 0x387   : > { %v1766_v29 = vadd.f32 %v1765_v20, %v1764_v15 }
 0x389   : > { %v1768_v14 = vadd.f32 %v1767_v51, %v1766_v29 }
 0x38b   : > { %v1770_v41 = vadd.f32 %v1769_v61, %v1768_v14 }
 0x38d   : > { %v1772_v27 = vadd.f32 %v1771_v60, %v1770_v41 }
 0x38e   : > { %v4990_v5 = vpop.eup %4989 }
 0x38f   : > { %v6485_v40 = vmul.f32 %v4990_v5, %v6217_v46  ;;  %v6488_v25 = vmul.f32 %v4990_v5, %v6226_v58  ;;  %v6491_v48 = vmul.f32 %v4990_v5, %v6235_v4  ;;  %v6494_v28 = vmul.f32 %v4990_v5, %v6238_v9 }
 0x390   : > { %v6497_v15 = vmul.f32 %v4990_v5, %v6241_v8  ;;  %v1773_v20 = vrot.slane %v1772_v27, 4  ;;  %v6502_v51 = vmul.f32 %v4990_v5, %v6247_v23  ;;  %v6505_v46 = vmul.f32 %v4990_v5, %v6256_v44 }
 0x391   : > { %v6510_v4 = vmul.f32 %v4990_v5, %v6265_v38  ;;  %v6513_v9 = vmul.f32 %v4990_v5, %v6270_v1  ;;  %v6516_v8 = vmul.f32 %v4990_v5, %v6276_v7  ;;  %v6521_v61 = vmul.f32 %v4990_v5, %v6281_v47 }
 0x392   : > { %v1774_v14 = vadd.f32 %v1773_v20, %v1772_v27  ;;  %v6524_v44 = vmul.f32 %v4990_v5, %v6315_v18  ;;  %v6531_v41 = vmul.f32 %v4990_v5, %v6328_v57  ;;  %v6534_v7 = vmul.f32 %v4990_v5, %v6341_v21 }
 0x393   : > { %v6539_v27 = vmul.f32 %v4990_v5, %v6354_v10  ;;  %v6542_v18 = vmul.f32 %v4990_v5, %v6364_v42  ;;  %v6547_v1 = vmul.f32 %v4990_v5, %v6374_v30  ;;  %v6550_v57 = vmul.f32 %v4990_v5, %v6384_v2 }
 0x394   : > { %v1775_v60 = vrot.slane %v1774_v14, 2  ;;  %v6553_v21 = vmul.f32 %v4990_v5, %v6394_v37  ;;  %v6558_v47 = vmul.f32 %v4990_v5, %v6404_v32  ;;  %v6561_v42 = vmul.f32 %v4990_v5, %v6414_v13 }
 0x395   : > { %v1781_v37 = vmul.f32 %v4990_v5, %v6174_v43  ;;  %v1785_v32 = vmul.f32 %v4990_v5, %v6196_v59  ;;  %v1787_v10 = vmul.f32 %v4990_v5, %v6209_v55 }
 0x396   : > { %v1776_v38 = vadd.f32 %v1775_v60, %v1774_v14  ;;  %v1783_v14 = vmul.f32 %v4990_v5, %v6182_v53 }
 0x398   : > { %v1777_v20 = vrot.slane %v1776_v38, 1 }
 0x39a   : > { %v1778_v23 = vadd.f32 %v1777_v20, %v1776_v38  ;;  %v1834_v38 = vpack.c.bf16 %v1783_v14, %v1781_v37 }
 0x39c   : > { %4991 = vrcp.f32 %v1778_v23  ;;  %v1836_v23 = vpack.c.bf16 %v1787_v10, %v1785_v32  ;;  %v4573_v32 = vld [vmem:[%s7316_s6 + $0xe0] ss:$8 sps:$4 sm:$0xff]  }
 0x3a6   : > { %v4992_v60 = vpop.eup %4991 }
 0x3a7   : > { %v1782_v13 = vmul.f32 %v4992_v60, %v6287_v34  ;;  %v1784_v58 = vmul.f32 %v4992_v60, %v6293_v24  ;;  %v1786_v30 = vmul.f32 %v4992_v60, %v6301_v31  ;;  %v1788_v29 = vmul.f32 %v4992_v60, %v6309_v45 }
 0x3a8   : > { %v1790_v43 = vmul.f32 %v4992_v60, %v6322_v19  ;;  %v1792_v53 = vmul.f32 %v4992_v60, %v6335_v63  ;;  %v1794_v20 = vmul.f32 %v4992_v60, %v6348_v3  ;;  %v1806_v55 = vmul.f32 %v4992_v60, %v6408_v54 }
 0x3a9   : > { %v1835_v2 = vpack.c.bf16 %v1784_v58, %v1782_v13  ;;  %v1837_v59 = vpack.c.bf16 %v1788_v29, %v1786_v30  ;;  %v1808_v34 = vmul.f32 %v4992_v60, %v6418_v22  ;;  %v1810_v24 = vmul.f32 %v4992_v60, %v6426_v36  ;;  %v4581_v13 = vld [vmem:[%s7316_s6 + $0xf4] ss:$8 sps:$4 sm:$0xff]  }
 0x3aa   : > { %v1796_v31 = vmul.f32 %v4992_v60, %v6358_v16  ;;  %v1812_v45 = vmul.f32 %v4992_v60, %v6433_v12  ;;  %v1814_v5 = vmul.f32 %v4992_v60, %v6440_v0  ;;  %v1816_v19 = vmul.f32 %v4992_v60, %v6447_v6 }
 0x3ab   : > { %1878 = vmatprep.subr.bf16.mxu0 %v1835_v2  ;;  %v1847_v63 = vpack.c.bf16 %v1808_v34, %v1806_v55  ;;  %v1818_v3 = vmul.f32 %v4992_v60, %v6454_v33  ;;  %v1820_v29 = vmul.f32 %v4992_v60, %v6458_v56  ;;  %v1822_v54 = vmul.f32 %v4992_v60, %v6462_v62 }
 0x3ac   : > { %1879 = vmatpush1.bf16.msra.mxu0 %v1834_v38  ;;  %v1849_v22 = vpack.c.bf16 %v1812_v45, %v1810_v24  ;;  %v1851_v58 = vpack.c.bf16 %v1816_v19, %v1814_v5  ;;  %v1824_v36 = vmul.f32 %v4992_v60, %v6466_v26  ;;  %v1826_v16 = vmul.f32 %v4992_v60, %v6470_v11  ;;  %v4579_v38 = vld [vmem:[%s7316_s6 + $0xf0] ss:$8 sps:$4 sm:$0xff]   ;;  %v4538_v5 = vld [vmem:[%s7313_s3] sm:$0xff]  }
 0x3ad   : > { %1880 = vmatprep.subr.bf16.mxu0 %v1837_v59  ;;  %v1839_v10 = vpack.c.bf16 %v1792_v53, %v1790_v43  ;;  %v1853_v12 = vpack.c.bf16 %v1820_v29, %v1818_v3  ;;  %v1828_v0 = vmul.f32 %v4992_v60, %v6474_v39  ;;  %v1830_v6 = vmul.f32 %v4992_v60, %v6478_v49  ;;  %v4585_v43 = vld [vmem:[%s7316_s6 + $0x100] ss:$8 sps:$4 sm:$0xff]   ;;  %v4552_v3 = vld [vmem:[%s7316_s6 + $0x10] ss:$8 sps:$4 sm:$0xff]   ;;  %v4560_v29 = vld [vmem:[%s7316_s6 + $0x24] ss:$8 sps:$4 sm:$0xff]  }
 0x3ae   : > { %v1855_v30 = vpack.c.bf16 %v1824_v36, %v1822_v54  ;;  %v1841_v2 = vpack.c.bf16 %v1796_v31, %v1794_v20  ;;  %v1798_v56 = vmul.f32 %v4992_v60, %v6368_v52  ;;  %v1800_v62 = vmul.f32 %v4992_v60, %v6378_v35  ;;  %v4551_v31 = vld [vmem:[%s7316_s6 + $0x4] ss:$8 sps:$4 sm:$0xff]   ;;  %v4549_v19 = vld [vmem:[%s7316_s6] ss:$8 sps:$4 sm:$0xff]   ;;  %v4561_v36 = vld [vmem:[%s7316_s6 + $0x30] ss:$8 sps:$4 sm:$0xff]  }
 0x3af   : > { %v1857_v33 = vpack.c.bf16 %v1828_v0, %v1826_v16  ;;  %v7446_v26 = vpack.c.bf16 %v6488_v25, %v6485_v40  ;;  %v1802_v37 = vmul.f32 %v4992_v60, %v6388_v50  ;;  %v1804_v39 = vmul.f32 %v4992_v60, %v6398_v17  ;;  %v4575_v60 = vld [vmem:[%s7316_s6 + $0xe4] ss:$8 sps:$4 sm:$0xff]   ;;  %v4570_v0 = vld [vmem:[%s7316_s6 + $0x50] ss:$8 sps:$4 sm:$0xff]  }
 0x3b0   : > { %1881 = vmatpush1.bf16.msra.mxu0 %v1836_v23  ;;  %v1843_v11 = vpack.c.bf16 %v1800_v62, %v1798_v56  ;;  %v7447_v49 = vpack.c.bf16 %v6494_v28, %v6491_v48  ;;  %v7448_v52 = vpack.c.bf16 %v6502_v51, %v6497_v15  ;;  %v7449_v35 = vpack.c.bf16 %v6510_v4, %v6505_v46  ;;  %v4535_v4 = vld [vmem:[%s5141_s24 + $0x10] ss:$8 sps:$4 sm:$0xff]   ;;  %v4587_v23 = vld [vmem:[%s7316_s6 + $0x104] ss:$8 sps:$4 sm:$0xff]   ;;  %v4588_v56 = vld [vmem:[%s7316_s6 + $0x80] ss:$8 sps:$4 sm:$0xff]  }
 0x3b1   : > { %1882 = vmatprep.subr.bf16.mxu0 %v1839_v10  ;;  %v1845_v14 = vpack.c.bf16 %v1804_v39, %v1802_v37  ;;  %v7450_v50 = vpack.c.bf16 %v6516_v8, %v6513_v9  ;;  %v7451_v17 = vpack.c.bf16 %v6524_v44, %v6521_v61  ;;  %v7452_v40 = vpack.c.bf16 %v6534_v7, %v6531_v41  ;;  %v1926_v9 = vld [vmem:[#allocation2 + $0x8] sm:$0xff]  ;;  %v4993_v8 = vld [vmem:[#allocation2] sm:$0xff]  ;;  %v4540_v44 = vld [vmem:[%s7316_s6 + $0x90] ss:$8 sps:$4 sm:$0xff]  }
 0x3b2   : > { %v7453_v25 = vpack.c.bf16 %v6542_v18, %v6539_v27  ;;  %v7454_v48 = vpack.c.bf16 %v6550_v57, %v6547_v1  ;;  %v1859_v28 = vpack.c.bf16 %v1830_v6, %v1830_v6  ;;  %v1858_v15 = vpack.c.bf16 %v6561_v42, %v6561_v42  ;;  %v4542_v1 = vld [vmem:[%s7316_s6 + $0x94] ss:$8 sps:$4 sm:$0xff]   ;;  %v4545_v41 = vld [vmem:[%s7316_s6 + $0xa4] ss:$8 sps:$4 sm:$0xff]   ;;  %v4543_v7 = vld [vmem:[%s7316_s6 + $0xa0] ss:$8 sps:$4 sm:$0xff]  }
 0x3b3   : > { %v7455_v51 = vpack.c.bf16 %v6558_v47, %v6553_v21  ;;  %v7456_v61 = vmov 0   ;;  %2323 = vmatprep.subr.bf16.mxu1 %v4542_v1  ;;  %v4548_v47 = vld [vmem:[%s7316_s6 + $0xb4] ss:$8 sps:$4 sm:$0xff]   ;;  %v4546_v27 = vld [vmem:[%s7316_s6 + $0xb0] ss:$8 sps:$4 sm:$0xff]   ;;  %v4539_v54 = vld [vmem:[%s7313_s3 + $0x8] sm:$0xff]  }
 0x3b4   : > { %1883 = vmatpush1.bf16.msra.mxu0 %v7446_v26  ;;  %v1873_v46 = vsel %vm1101_vm2, %v1858_v15, 0  ;;  %2324 = vmatpush1.bf16.msra.mxu1 %v4540_v44  ;;  %v4557_v18 = vld [vmem:[%s7316_s6 + $0xc4] ss:$8 sps:$4 sm:$0xff]   ;;  %v4555_v57 = vld [vmem:[%s7316_s6 + $0xc0] ss:$8 sps:$4 sm:$0xff]   ;;  %v5038_v15 = vmov 4  }
 0x3b5   : > { %1884 = vmatprep.subr.bf16.mxu0 %v1841_v2  ;;  %2325 = vmatprep.subr.bf16.mxu1 %v4545_v41  ;;  %v4569_v21 = vld [vmem:[%s7316_s6 + $0xd4] ss:$8 sps:$4 sm:$0xff]   ;;  %v4567_v42 = vld [vmem:[%s7316_s6 + $0xd0] ss:$8 sps:$4 sm:$0xff]   ;;  %v4566_v16 = vld [vmem:[%s7316_s6 + $0x44] ss:$8 sps:$4 sm:$0xff]  }
 0x3b6   : > { %v4564_v10 = vld [vmem:[%s7316_s6 + $0x40] ss:$8 sps:$4 sm:$0xff]   ;;  %v4578_v6 = vld [vmem:[%s7316_s6 + $0x64] ss:$8 sps:$4 sm:$0xff]   ;;  %v4582_v2 = vld [vmem:[%s7316_s6 + $0x70] ss:$8 sps:$4 sm:$0xff]  }
 0x3b7   : > { %v4590_v62 = vld [vmem:[%s7316_s6 + $0x84] ss:$8 sps:$4 sm:$0xff]   ;;  %v4591_v26 = vld [vmem:[%s7316_s6 + $0x110] ss:$8 sps:$4 sm:$0xff]   ;;  %v4599_v39 = vld [vmem:[%s7316_s6 + $0x1b4] ss:$8 sps:$4 sm:$0xff]  }
 0x3b8   : > { %1885 = vmatpush1.bf16.msra.mxu0 %v7447_v49  ;;  %2326 = vmatpush1.bf16.msra.mxu1 %v4543_v7  ;;  %v4596_v37 = vld [vmem:[%s7316_s6 + $0x124] ss:$8 sps:$4 sm:$0xff]   ;;  %v4602_v44 = vld [vmem:[%s7316_s6 + $0x134] ss:$8 sps:$4 sm:$0xff]   ;;  %v4600_v7 = vld [vmem:[%s7316_s6 + $0x130] ss:$8 sps:$4 sm:$0xff]  }
 0x3b9   : > { %1886 = vmatprep.subr.bf16.mxu0 %v1843_v11  ;;  %2327 = vmatprep.subr.bf16.mxu1 %v4548_v47  ;;  %v4593_v11 = vld [vmem:[%s7316_s6 + $0x114] ss:$8 sps:$4 sm:$0xff]   ;;  %v6759_v49 = vld [vmem:[%s7314_s4] sm:$0xff] }
 0x3ba   : > { %2180 = vperm.xlu0 %4483, %v6759_v49   ;;  %v4605_v1 = vld [vmem:[%s7316_s6 + $0x1c4] ss:$8 sps:$4 sm:$0xff]   ;;  %v4603_v47 = vld [vmem:[%s7316_s6 + $0x1c0] ss:$8 sps:$4 sm:$0xff]  }
 0x3bc   : > { %1887 = vmatpush1.bf16.msra.mxu0 %v7448_v52  ;;  %2328 = vmatpush1.bf16.msra.mxu1 %v4546_v27  ;;  %v6766_v52 = vld [vmem:[%s7314_s4 + $0x8] sm:$0xff] }
 0x3bd   : > { %1888 = vmatprep.subr.bf16.mxu0 %v1845_v14  ;;  %2329 = vmatprep.subr.bf16.mxu1 %v4557_v18  ;;  %v5035_v14 = vmov 1   ;;  %v4608_v18 = vld [vmem:[%s7316_s6 + $0x144] ss:$8 sps:$4 sm:$0xff]  }
 0x3be   : > { %4484 = vset.pattern.permute.xlu1 %v5035_v14  ;;  %2185 = vperm.xlu0 %4483, %v6766_v52  }
 0x3bf   : > { %2377 = vperm.xlu1 %4484, %v6759_v49  }
 0x3c0   : > { %1889 = vmatpush1.bf16.msra.mxu0 %v7449_v35  ;;  %2330 = vmatpush1.bf16.msra.mxu1 %v4555_v57  ;;  %v5036_v35 = vmov 2   ;;  %v4611_v57 = vld [vmem:[%s7316_s6 + $0x1d4] ss:$8 sps:$4 sm:$0xff]  }
 0x3c1   : > { %1890 = vmatprep.subr.bf16.mxu0 %v1847_v63  ;;  %2331 = vmatprep.subr.bf16.mxu1 %v4569_v21  ;;  %v4554_v63 = vld [vmem:[%s7316_s6 + $0x14] ss:$8 sps:$4 sm:$0xff]  }
 0x3c3   : > { %2381 = vperm.xlu1 %4484, %v6766_v52  }
 0x3c4   : > { %1891 = vmatpush1.bf16.msra.mxu0 %v7450_v50  ;;  %2332 = vmatpush1.bf16.msra.mxu1 %v4567_v42  ;;  %v6774_v50 = vld [vmem:[%s7314_s4 + $0x10] sm:$0xff] }
 0x3c5   : > { %1892 = vmatprep.subr.bf16.mxu0 %v1849_v22  ;;  %2333 = vmatprep.subr.bf16.mxu1 %v4575_v60  ;;  %v4558_v22 = vld [vmem:[%s7316_s6 + $0x20] ss:$8 sps:$4 sm:$0xff]  }
 0x3c7   : > { %4485 = vset.pattern.permute.xlu1 %v5036_v35 }
 0x3c8   : > { %1893 = vmatpush1.bf16.msra.mxu0 %v7451_v17  ;;  %2334 = vmatpush1.bf16.msra.mxu1 %v4573_v32  ;;  %v6782_v17 = vld [vmem:[%s7314_s4 + $0x18] sm:$0xff] }
 0x3c9   : > { %1894 = vmatprep.subr.bf16.mxu0 %v1851_v58  ;;  %2335 = vmatprep.subr.bf16.mxu1 %v4581_v13  ;;  %v4563_v58 = vld [vmem:[%s7316_s6 + $0x34] ss:$8 sps:$4 sm:$0xff]   ;;  %v4606_v13 = vld [vmem:[%s7316_s6 + $0x140] ss:$8 sps:$4 sm:$0xff]  }
 0x3ca   : > { %2575 = vperm.xlu1 %4485, %v6766_v52   ;;  %2195 = vperm.xlu0 %4483, %v6782_v17  }
 0x3cc   : > { %1895 = vmatpush1.bf16.msra.mxu0 %v7452_v40  ;;  %2336 = vmatpush1.bf16.msra.mxu1 %v4579_v38  ;;  %v5037_v40 = vmov 3   ;;  %v4609_v38 = vld [vmem:[%s7316_s6 + $0x1d0] ss:$8 sps:$4 sm:$0xff]  }
 0x3cd   : > { %1896 = vmatprep.subr.bf16.mxu0 %v1853_v12  ;;  %2337 = vmatprep.subr.bf16.mxu1 %v4587_v23  ;;  %v4572_v12 = vld [vmem:[%s7316_s6 + $0x54] ss:$8 sps:$4 sm:$0xff]  }
 0x3ce   : > { %4486 = vset.pattern.permute.xlu1 %v7456_v61  ;;  %4487 = vset.pattern.permute.xlu0 %v5036_v35  ;;  %v4614_v23 = vld [vmem:[%s7316_s6 + $0x154] ss:$8 sps:$4 sm:$0xff]  }
 0x3cf   : > { %2190 = vperm.xlu1 %4486, %v6774_v50   ;;  %2571 = vperm.xlu0 %4487, %v6759_v49  }
 0x3d0   : > { %1897 = vmatpush1.bf16.msra.mxu0 %v7453_v25  ;;  %2338 = vmatpush1.bf16.msra.mxu1 %v4585_v43  ;;  %v4617_v43 = vld [vmem:[%s7316_s6 + $0x1e4] ss:$8 sps:$4 sm:$0xff]  }
 0x3d1   : > { %1898 = vmatprep.subr.bf16.mxu0 %v1855_v30  ;;  %v4576_v30 = vld [vmem:[%s7316_s6 + $0x60] ss:$8 sps:$4 sm:$0xff]   ;;  %2339 = vmatprep.subr.bf16.mxu1 %v4593_v11  ;;  %v4656_v11 = vld [vmem:[%s7316_s6 + $0x254] ss:$8 sps:$4 sm:$0xff]  }
 0x3d3   : > { %4488 = vset.pattern.permute.xlu1 %v5035_v14  ;;  %2583 = vperm.xlu0 %4487, %v6782_v17   ;;  %v4657_v14 = vld [vmem:[%s7316_s6 + $0x2e0] ss:$8 sps:$4 sm:$0xff]  }
 0x3d4   : > { %1899 = vmatpush1.bf16.msra.mxu0 %v7454_v48  ;;  %2340 = vmatpush1.bf16.msra.mxu1 %v4591_v26  ;;  %v4651_v26 = vld [vmem:[%s7316_s6 + $0x2d0] ss:$8 sps:$4 sm:$0xff]  }
 0x3d5   : > { %1900 = vmatprep.subr.bf16.mxu0 %v1857_v33  ;;  %v4584_v33 = vld [vmem:[%s7316_s6 + $0x74] ss:$8 sps:$4 sm:$0xff]   ;;  %2711 = vmatprep.subr.bf16.mxu1 %v4599_v39  ;;  %v4654_v39 = vld [vmem:[%s7316_s6 + $0x250] ss:$8 sps:$4 sm:$0xff]  }
 0x3d6   : > { %2385 = vperm.xlu1 %4488, %v6774_v50  }
 0x3d7   : > { %4491 = vset.pattern.permute.xlu0 %v5037_v40 }
 0x3d8   : > { %1901 = vmatpush1.bf16.msra.mxu0 %v7455_v51  ;;  %2765 = vperm.xlu0 %4491, %v6759_v49  }
 0x3d9   : > { %4094 = vmatprep.subr.msk.bf16.mxu0 %vm1101_vm2, %v1859_v28 }
 0x3da   : > { %2389 = vperm.xlu1 %4488, %v6782_v17  }
 0x3dc   : > { %1903 = vmatpush1.bf16.msra.mxu0 %v1873_v46  ;;  %2773 = vperm.xlu0 %4491, %v6774_v50  }
 0x3dd   : > { %1950 = vmatprep.subr.bf16.mxu0 %v1926_v9  ;;  %v4594_v9 = vld [vmem:[%s7316_s6 + $0x120] ss:$8 sps:$4 sm:$0xff]  }
 0x3de   : > { %4489 = vset.pattern.permute.xlu1 %v5037_v40 }
 0x3df   : > { %1911 = vmatmul.mubr.bf16.vlgmr.msra.gmra.mrb[28].mxu0 %v4535_v4  ;;  %2769 = vperm.xlu1 %4489, %v6766_v52  }
 0x3e0   : > { %1951 = vmatpush1.bf16.msra.mxu0 %v4993_v8  ;;  %1982 = vmatprep.mubr.bf16.mxu0 %v7456_v61  ;;  %v4597_v8 = vld [vmem:[%s7316_s6 + $0x1b0] ss:$8 sps:$4 sm:$0xff]  }
 0x3e3   : > { %4490 = vset.pattern.permute.xlu1 %v5036_v35  ;;  %v4662_v35 = vld [vmem:[%s7316_s6 + $0x264] ss:$8 sps:$4 sm:$0xff]  }
 0x3e4   : > { %2579 = vperm.xlu1 %4490, %v6774_v50  }
 0x3e8   : > { %4492 = vset.pattern.permute.xlu1 %v5038_v15 }
 0x3e9   : > { %2959 = vperm.xlu1 %4492, %v6759_v49  }
 0x3ed   : > { %2963 = vperm.xlu1 %4492, %v6766_v52  }
 0x3f1   : > { %4493 = vset.pattern.permute.xlu1 %v5037_v40  ;;  %v4665_v40 = vld [vmem:[%s7316_s6 + $0x2f4] ss:$8 sps:$4 sm:$0xff]  }
 0x3f2   : > { %2777 = vperm.xlu1 %4493, %v6782_v17  }
 0x4b2   : > { %v1912_v53 = vpop.f32.mrb[28].mxu0 }
 0x4b3   : > { %v1914_v20 = vpop.f32.mrb[29].mxu0 }
 0x4b4   : > { %v1916_v59 = vpop.f32.mrb[30].mxu0 }
 0x4b5   : > { %v1921_v55 = vpack.c.bf16 %v1916_v59, %v1912_v53  ;;  %v1918_v34 = vpop.f32.mrb[31].mxu0  ;;  %v4612_v53 = vld [vmem:[%s7316_s6 + $0x150] ss:$8 sps:$4 sm:$0xff]   ;;  %v4620_v59 = vld [vmem:[%s7316_s6 + $0x164] ss:$8 sps:$4 sm:$0xff]  }
 0x4b6   : > { %v1922_v24 = vpack.c.bf16 %v1918_v34, %v1914_v20  ;;  %v4615_v20 = vld [vmem:[%s7316_s6 + $0x1e0] ss:$8 sps:$4 sm:$0xff]  }
 0x4b7   : > { %v4618_v34 = vld [vmem:[%s7316_s6 + $0x160] ss:$8 sps:$4 sm:$0xff]  }
 0x4b8   : > { %1924 = vst.msk [vmem:[#allocation2 + $0x18] sm:$0xff] %vm487_vm0, %v1922_v24  ;;  %v4621_v24 = vld [vmem:[%s7316_s6 + $0x1f0] ss:$8 sps:$4 sm:$0xff]  }
 0x4bf   : > { %v1928_v45 = vld [vmem:[#allocation2 + $0x18] sm:$0xff] }
 0x4c0   : > { %1952 = vmatprep.subr.bf16.mxu0 %v1928_v45  ;;  %v4629_v45 = vld [vmem:[%s7316_s6 + $0x204] ss:$8 sps:$4 sm:$0xff]  }
 0x4c1   : > { %1953 = vmatpush1.bf16.msra.mxu0 %v1921_v55  ;;  %v4623_v55 = vld [vmem:[%s7316_s6 + $0x1f4] ss:$8 sps:$4 sm:$0xff]  }
 0x4c2   : > { %2125 = vmatprep.subr.bf16.mxu0 %v4551_v31  ;;  %v4626_v31 = vld [vmem:[%s7316_s6 + $0x174] ss:$8 sps:$4 sm:$0xff]  }
 0x4c4   : > { %4098 = vmatmul.mubr.msk.bf16.vlgmr.msra.gmra.mrb[32].mxu0 %vm1943_vm3, %v4538_v5  ;;  %v4624_v5 = vld [vmem:[%s7316_s6 + $0x170] ss:$8 sps:$4 sm:$0xff]  }
 0x4c5   : > { %1992 = vmatprep.mubr.bf16.mxu0 %v7456_v61  ;;  %2126 = vmatpush1.bf16.msra.mxu0 %v4549_v19  ;;  %v4627_v19 = vld [vmem:[%s7316_s6 + $0x200] ss:$8 sps:$4 sm:$0xff]  }
 0x4c6   : > { %2127 = vmatprep.subr.bf16.mxu0 %v4554_v63  ;;  %v4632_v63 = vld [vmem:[%s7316_s6 + $0x184] ss:$8 sps:$4 sm:$0xff]  }
 0x4c9   : > { %2128 = vmatpush1.bf16.msra.mxu0 %v4552_v3  ;;  %v4635_v3 = vld [vmem:[%s7316_s6 + $0x214] ss:$8 sps:$4 sm:$0xff]  }
 0x4ca   : > { %2129 = vmatprep.subr.bf16.mxu0 %v4560_v29  ;;  %v5039_v29 = vmov 5  }
 0x4cb   : > { %4494 = vset.pattern.permute.xlu1 %v5039_v29  ;;  %4495 = vset.pattern.permute.xlu0 %v5039_v29 }
 0x4cc   : > { %4099 = vmatmul.mubr.msk.bf16.gmra.mrb[36].mxu0 %vm1943_vm3, %v4539_v54  ;;  %3153 = vperm.xlu1 %4494, %v6759_v49   ;;  %v4630_v54 = vld [vmem:[%s7316_s6 + $0x180] ss:$8 sps:$4 sm:$0xff]  }
 0x4cd   : > { %2130 = vmatpush1.bf16.msra.mxu0 %v4558_v22  ;;  %3157 = vperm.xlu0 %4495, %v6766_v52   ;;  %v4633_v22 = vld [vmem:[%s7316_s6 + $0x210] ss:$8 sps:$4 sm:$0xff]  }
 0x4ce   : > { %2131 = vmatprep.subr.bf16.mxu0 %v4563_v58  ;;  %v4638_v58 = vld [vmem:[%s7316_s6 + $0x194] ss:$8 sps:$4 sm:$0xff]  }
 0x4d0   : > { %4496 = vset.pattern.permute.xlu1 %v5038_v15  ;;  %v4668_v15 = vld [vmem:[%s7316_s6 + $0x274] ss:$8 sps:$4 sm:$0xff]  }
 0x4d1   : > { %2132 = vmatpush1.bf16.msra.mxu0 %v4561_v36  ;;  %v4641_v36 = vld [vmem:[%s7316_s6 + $0x224] ss:$8 sps:$4 sm:$0xff]   ;;  %3165 = vperm.xlu0 %4495, %v6782_v17  }
 0x4d2   : > { %2133 = vmatprep.subr.bf16.mxu0 %v4566_v16  ;;  %v4636_v16 = vld [vmem:[%s7316_s6 + $0x190] ss:$8 sps:$4 sm:$0xff]   ;;  %2967 = vperm.xlu1 %4496, %v6774_v50  }
 0x4d5   : > { %2134 = vmatpush1.bf16.msra.mxu0 %v4564_v10  ;;  %v4639_v10 = vld [vmem:[%s7316_s6 + $0x220] ss:$8 sps:$4 sm:$0xff]  }
 0x4d6   : > { %2135 = vmatprep.subr.bf16.mxu0 %v4572_v12  ;;  %v4644_v12 = vld [vmem:[%s7316_s6 + $0x1a4] ss:$8 sps:$4 sm:$0xff]   ;;  %2971 = vperm.xlu1 %4496, %v6782_v17  }
 0x4d9   : > { %2136 = vmatpush1.bf16.msra.mxu0 %v4570_v0  ;;  %v4647_v0 = vld [vmem:[%s7316_s6 + $0x234] ss:$8 sps:$4 sm:$0xff]  }
 0x4da   : > { %2137 = vmatprep.subr.bf16.mxu0 %v4578_v6  ;;  %v5040_v6 = vmov 6  }
 0x4db   : > { %4499 = vset.pattern.permute.xlu0 %v5040_v6  ;;  %4497 = vset.pattern.permute.xlu1 %v5040_v6 }
 0x4dc   : > { %3347 = vperm.xlu0 %4499, %v6759_v49   ;;  %3351 = vperm.xlu1 %4497, %v6766_v52  }
 0x4dd   : > { %2138 = vmatpush1.bf16.msra.mxu0 %v4576_v30  ;;  %v4642_v30 = vld [vmem:[%s7316_s6 + $0x1a0] ss:$8 sps:$4 sm:$0xff]  }
 0x4de   : > { %2139 = vmatprep.subr.bf16.mxu0 %v4584_v33  ;;  %v4645_v33 = vld [vmem:[%s7316_s6 + $0x230] ss:$8 sps:$4 sm:$0xff]  }
 0x4e0   : > { %3355 = vperm.xlu0 %4499, %v6774_v50   ;;  %4498 = vset.pattern.permute.xlu1 %v5039_v29  ;;  %v4708_v29 = vld [vmem:[%s7316_s6 + $0x370] ss:$8 sps:$4 sm:$0xff]  }
 0x4e1   : > { %2140 = vmatpush1.bf16.msra.mxu0 %v4582_v2  ;;  %v4650_v2 = vld [vmem:[%s7316_s6 + $0x244] ss:$8 sps:$4 sm:$0xff]   ;;  %3161 = vperm.xlu1 %4498, %v6774_v50  }
 0x4e2   : > { %2141 = vmatprep.subr.bf16.mxu0 %v4590_v62  ;;  %v4648_v62 = vld [vmem:[%s7316_s6 + $0x240] ss:$8 sps:$4 sm:$0xff]  }
 0x4e5   : > { %2142 = vmatpush1.bf16.msra.mxu0 %v4588_v56  ;;  %v4653_v56 = vld [vmem:[%s7316_s6 + $0x2d4] ss:$8 sps:$4 sm:$0xff]  }
 0x4e6   : > { %2517 = vmatprep.subr.bf16.mxu0 %v4596_v37  ;;  %v4659_v37 = vld [vmem:[%s7316_s6 + $0x2e4] ss:$8 sps:$4 sm:$0xff]  }
 0x597   : > { %v1984_v25 = vpop.f32.mrb[32].mxu0 }
 0x598   : > { %v1986_v48 = vpop.f32.mrb[33].mxu0 }
 0x599   : > { %v1988_v28 = vpop.f32.mrb[34].mxu0 }
 0x59a   : > { %v6794_v51 = vpack.c.bf16 %v1988_v28, %v1984_v25  ;;  %v1990_v46 = vpop.f32.mrb[35].mxu0  ;;  %v5041_v25 = vmov 8   ;;  %v4663_v28 = vld [vmem:[%s7316_s6 + $0x2f0] ss:$8 sps:$4 sm:$0xff]  }
 0x59b   : > { %v6797_v4 = vpack.c.bf16 %v1990_v46, %v1986_v48  ;;  %4503 = vset.pattern.permute.xlu0 %v5041_v25  ;;  %v4660_v48 = vld [vmem:[%s7316_s6 + $0x260] ss:$8 sps:$4 sm:$0xff]   ;;  %v4671_v46 = vld [vmem:[%s7316_s6 + $0x304] ss:$8 sps:$4 sm:$0xff]  }
 0x59c   : > { %3739 = vperm.xlu0 %4503, %v6766_v52  }
 0x59d   : > { %4118 = vmatprep.mubr.msk.bf16.mxu0 %vm487_vm0, %v6797_v4  ;;  %4156 = vmatprep.mubr.msk.bf16.mxu1 %vm487_vm0, %v6797_v4 }
 0x59e   : > { %2158 = vmatmul.mubr.bf16.vlgmr.msra.gmra.mrb[40].mxu0 %v6794_v51  ;;  %2356 = vmatmul.mubr.bf16.vlgmr.msra.gmra.mrb[80].mxu1 %v6794_v51 }
 0x59f   : > { %2518 = vmatpush1.bf16.msra.mxu0 %v4594_v9  ;;  %2712 = vmatpush1.bf16.msra.mxu1 %v4597_v8  ;;  %v1994_v41 = vpop.f32.mrb[36].mxu0  ;;  %v4666_v9 = vld [vmem:[%s7316_s6 + $0x270] ss:$8 sps:$4 sm:$0xff]   ;;  %v4669_v8 = vld [vmem:[%s7316_s6 + $0x300] ss:$8 sps:$4 sm:$0xff]  }
 0x5a0   : > { %v1996_v27 = vpop.f32.mrb[37].mxu0  ;;  %2519 = vmatprep.subr.bf16.mxu0 %v4602_v44  ;;  %2713 = vmatprep.subr.bf16.mxu1 %v4605_v1  ;;  %v4674_v44 = vld [vmem:[%s7316_s6 + $0x284] ss:$8 sps:$4 sm:$0xff]   ;;  %v4677_v1 = vld [vmem:[%s7316_s6 + $0x314] ss:$8 sps:$4 sm:$0xff]  }
 0x5a1   : > { %v1998_v21 = vpop.f32.mrb[38].mxu0  ;;  %3743 = vperm.xlu0 %4503, %v6774_v50  }
 0x5a2   : > { %v6831_v42 = vpack.c.bf16 %v1998_v21, %v1994_v41  ;;  %v2000_v60 = vpop.f32.mrb[39].mxu0  ;;  %v4672_v41 = vld [vmem:[%s7316_s6 + $0x280] ss:$8 sps:$4 sm:$0xff]  }
 0x5a3   : > { %v6833_v32 = vpack.c.bf16 %v2000_v60, %v1996_v27  ;;  %2520 = vmatpush1.bf16.msra.mxu0 %v4600_v7  ;;  %2714 = vmatpush1.bf16.msra.mxu1 %v4603_v47  ;;  %v4675_v7 = vld [vmem:[%s7316_s6 + $0x310] ss:$8 sps:$4 sm:$0xff]   ;;  %v4680_v47 = vld [vmem:[%s7316_s6 + $0x294] ss:$8 sps:$4 sm:$0xff]   ;;  %v4683_v27 = vld [vmem:[%s7316_s6 + $0x324] ss:$8 sps:$4 sm:$0xff]  }
 0x5a4   : > { %2521 = vmatprep.subr.bf16.mxu0 %v4608_v18  ;;  %2715 = vmatprep.subr.bf16.mxu1 %v4611_v57  ;;  %v5042_v18 = vmov 7   ;;  %v4678_v57 = vld [vmem:[%s7316_s6 + $0x290] ss:$8 sps:$4 sm:$0xff]   ;;  %v4681_v21 = vld [vmem:[%s7316_s6 + $0x320] ss:$8 sps:$4 sm:$0xff]  }
 0x5a5   : > { %4119 = vmatprep.mubr.msk.bf16.mxu0 %vm487_vm0, %v6833_v32  ;;  %4157 = vmatprep.mubr.msk.bf16.mxu1 %vm487_vm0, %v6833_v32  ;;  %v4686_v60 = vld [vmem:[%s7316_s6 + $0x2a4] ss:$8 sps:$4 sm:$0xff]  }
 0x5a6   : > { %2168 = vmatmul.mubr.bf16.gmra.mrb[44].mxu0 %v6831_v42  ;;  %2366 = vmatmul.mubr.bf16.gmra.mrb[84].mxu1 %v6831_v42 }
 0x5a7   : > { %2522 = vmatpush1.bf16.msra.mxu0 %v4606_v13  ;;  %2716 = vmatpush1.bf16.msra.mxu1 %v4609_v38  ;;  %v4689_v13 = vld [vmem:[%s7316_s6 + $0x334] ss:$8 sps:$4 sm:$0xff]   ;;  %v4684_v38 = vld [vmem:[%s7316_s6 + $0x2a0] ss:$8 sps:$4 sm:$0xff]  }
 0x5a8   : > { %4194 = vmatprep.mubr.msk.bf16.mxu0 %vm487_vm0, %v6797_v4  ;;  %4232 = vmatprep.mubr.msk.bf16.mxu1 %vm487_vm0, %v6797_v4 }
 0x5a9   : > { %2523 = vmatprep.subr.bf16.mxu0 %v4614_v23  ;;  %2717 = vmatprep.subr.bf16.mxu1 %v4617_v43  ;;  %v4687_v23 = vld [vmem:[%s7316_s6 + $0x330] ss:$8 sps:$4 sm:$0xff]   ;;  %v4692_v43 = vld [vmem:[%s7316_s6 + $0x2b4] ss:$8 sps:$4 sm:$0xff]  }
 0x5aa   : > { %4500 = vset.pattern.permute.xlu1 %v5042_v18 }
 0x5ab   : > { %2524 = vmatpush1.bf16.msra.mxu0 %v4612_v53  ;;  %2718 = vmatpush1.bf16.msra.mxu1 %v4615_v20  ;;  %v4695_v53 = vld [vmem:[%s7316_s6 + $0x344] ss:$8 sps:$4 sm:$0xff]   ;;  %v4690_v20 = vld [vmem:[%s7316_s6 + $0x2b0] ss:$8 sps:$4 sm:$0xff]  }
 0x5ac   : > { %2525 = vmatprep.subr.bf16.mxu0 %v4620_v59  ;;  %2719 = vmatprep.subr.bf16.mxu1 %v4623_v55  ;;  %v4693_v59 = vld [vmem:[%s7316_s6 + $0x340] ss:$8 sps:$4 sm:$0xff]   ;;  %v4698_v55 = vld [vmem:[%s7316_s6 + $0x2c4] ss:$8 sps:$4 sm:$0xff]  }
 0x5ad   : > { %3541 = vperm.xlu1 %4500, %v6759_v49  }
 0x5af   : > { %2526 = vmatpush1.bf16.msra.mxu0 %v4618_v34  ;;  %2720 = vmatpush1.bf16.msra.mxu1 %v4621_v24  ;;  %v4696_v34 = vld [vmem:[%s7316_s6 + $0x2c0] ss:$8 sps:$4 sm:$0xff]   ;;  %v4699_v24 = vld [vmem:[%s7316_s6 + $0x350] ss:$8 sps:$4 sm:$0xff]  }
 0x5b0   : > { %2527 = vmatprep.subr.bf16.mxu0 %v4626_v31  ;;  %2721 = vmatprep.subr.bf16.mxu1 %v4629_v45  ;;  %v4704_v31 = vld [vmem:[%s7316_s6 + $0x364] ss:$8 sps:$4 sm:$0xff]   ;;  %v4707_v45 = vld [vmem:[%s7316_s6 + $0x3f4] ss:$8 sps:$4 sm:$0xff]  }
 0x5b1   : > { %3545 = vperm.xlu1 %4500, %v6766_v52   ;;  %v4701_v52 = vld [vmem:[%s7316_s6 + $0x354] ss:$8 sps:$4 sm:$0xff]  }
 0x5b3   : > { %2528 = vmatpush1.bf16.msra.mxu0 %v4624_v5  ;;  %2722 = vmatpush1.bf16.msra.mxu1 %v4627_v19  ;;  %v4702_v5 = vld [vmem:[%s7316_s6 + $0x360] ss:$8 sps:$4 sm:$0xff]   ;;  %v4705_v19 = vld [vmem:[%s7316_s6 + $0x3f0] ss:$8 sps:$4 sm:$0xff]  }
 0x5b4   : > { %2529 = vmatprep.subr.bf16.mxu0 %v4632_v63  ;;  %2723 = vmatprep.subr.bf16.mxu1 %v4635_v3  ;;  %v4710_v63 = vld [vmem:[%s7316_s6 + $0x374] ss:$8 sps:$4 sm:$0xff]   ;;  %v4713_v3 = vld [vmem:[%s7316_s6 + $0x404] ss:$8 sps:$4 sm:$0xff]  }
 0x5b5   : > { %4501 = vset.pattern.permute.xlu1 %v5040_v6  ;;  %v4731_v6 = vld [vmem:[%s7316_s6 + $0x434] ss:$8 sps:$4 sm:$0xff]  }
 0x5b6   : > { %3359 = vperm.xlu1 %4501, %v6782_v17  }
 0x5b7   : > { %2530 = vmatpush1.bf16.msra.mxu0 %v4630_v54  ;;  %2724 = vmatpush1.bf16.msra.mxu1 %v4633_v22  ;;  %v4716_v54 = vld [vmem:[%s7316_s6 + $0x384] ss:$8 sps:$4 sm:$0xff]   ;;  %v4719_v22 = vld [vmem:[%s7316_s6 + $0x414] ss:$8 sps:$4 sm:$0xff]  }
 0x5b8   : > { %2531 = vmatprep.subr.bf16.mxu0 %v4638_v58  ;;  %2725 = vmatprep.subr.bf16.mxu1 %v4641_v36  ;;  %v4714_v58 = vld [vmem:[%s7316_s6 + $0x380] ss:$8 sps:$4 sm:$0xff]   ;;  %v4717_v36 = vld [vmem:[%s7316_s6 + $0x410] ss:$8 sps:$4 sm:$0xff]  }
 0x5ba   : > { %4502 = vset.pattern.permute.xlu1 %v5041_v25 }
 0x5bb   : > { %2532 = vmatpush1.bf16.msra.mxu0 %v4636_v16  ;;  %2726 = vmatpush1.bf16.msra.mxu1 %v4639_v10  ;;  %v4722_v16 = vld [vmem:[%s7316_s6 + $0x394] ss:$8 sps:$4 sm:$0xff]   ;;  %v4720_v10 = vld [vmem:[%s7316_s6 + $0x390] ss:$8 sps:$4 sm:$0xff]  }
 0x5bc   : > { %2533 = vmatprep.subr.bf16.mxu0 %v4644_v12  ;;  %2727 = vmatprep.subr.bf16.mxu1 %v4647_v0  ;;  %v4723_v12 = vld [vmem:[%s7316_s6 + $0x420] ss:$8 sps:$4 sm:$0xff]   ;;  %v4728_v0 = vld [vmem:[%s7316_s6 + $0x3a4] ss:$8 sps:$4 sm:$0xff]  }
 0x5bd   : > { %3735 = vperm.xlu1 %4502, %v6759_v49   ;;  %v4711_v49 = vld [vmem:[%s7316_s6 + $0x400] ss:$8 sps:$4 sm:$0xff]  }
 0x5bf   : > { %2534 = vmatpush1.bf16.msra.mxu0 %v4642_v30  ;;  %2728 = vmatpush1.bf16.msra.mxu1 %v4645_v33  ;;  %v4726_v30 = vld [vmem:[%s7316_s6 + $0x3a0] ss:$8 sps:$4 sm:$0xff]   ;;  %v4729_v33 = vld [vmem:[%s7316_s6 + $0x430] ss:$8 sps:$4 sm:$0xff]  }
 0x5c0   : > { %2905 = vmatprep.subr.bf16.mxu0 %v4650_v2  ;;  %3099 = vmatprep.subr.bf16.mxu1 %v4653_v56  ;;  %v4734_v2 = vld [vmem:[%s7316_s6 + $0x3b4] ss:$8 sps:$4 sm:$0xff]   ;;  %v4737_v56 = vld [vmem:[%s7316_s6 + $0x444] ss:$8 sps:$4 sm:$0xff]  }
 0x5c1   : > { %4504 = vset.pattern.permute.xlu1 %v5042_v18  ;;  %v4770_v18 = vld [vmem:[%s7316_s6 + $0x4c4] ss:$8 sps:$4 sm:$0xff]  }
 0x5c2   : > { %2550 = vmatmul.mubr.bf16.vlgmr.msra.gmra.mrb[48].mxu0 %v6794_v51  ;;  %2744 = vmatmul.mubr.bf16.vlgmr.msra.gmra.mrb[88].mxu1 %v6794_v51 }
 0x5c3   : > { %4195 = vmatprep.mubr.msk.bf16.mxu0 %vm487_vm0, %v6833_v32  ;;  %4233 = vmatprep.mubr.msk.bf16.mxu1 %vm487_vm0, %v6833_v32 }
 0x5c4   : > { %2906 = vmatpush1.bf16.msra.mxu0 %v4648_v62  ;;  %3100 = vmatpush1.bf16.msra.mxu1 %v4651_v26  ;;  %v4732_v62 = vld [vmem:[%s7316_s6 + $0x3b0] ss:$8 sps:$4 sm:$0xff]   ;;  %v4735_v26 = vld [vmem:[%s7316_s6 + $0x440] ss:$8 sps:$4 sm:$0xff]  }
 0x5c5   : > { %2907 = vmatprep.subr.bf16.mxu0 %v4656_v11  ;;  %3101 = vmatprep.subr.bf16.mxu1 %v4659_v37  ;;  %v4740_v11 = vld [vmem:[%s7316_s6 + $0x3c4] ss:$8 sps:$4 sm:$0xff]   ;;  %v4738_v37 = vld [vmem:[%s7316_s6 + $0x3c0] ss:$8 sps:$4 sm:$0xff]  }
 0x5c6   : > { %3549 = vperm.xlu1 %4504, %v6774_v50   ;;  %v4725_v50 = vld [vmem:[%s7316_s6 + $0x424] ss:$8 sps:$4 sm:$0xff]  }
 0x5c8   : > { %2908 = vmatpush1.bf16.msra.mxu0 %v4654_v39  ;;  %3102 = vmatpush1.bf16.msra.mxu1 %v4657_v14  ;;  %v4741_v39 = vld [vmem:[%s7316_s6 + $0x450] ss:$8 sps:$4 sm:$0xff]   ;;  %v4746_v14 = vld [vmem:[%s7316_s6 + $0x3d4] ss:$8 sps:$4 sm:$0xff]  }
 0x5c9   : > { %2909 = vmatprep.subr.bf16.mxu0 %v4662_v35  ;;  %3103 = vmatprep.subr.bf16.mxu1 %v4665_v40  ;;  %v4749_v35 = vld [vmem:[%s7316_s6 + $0x464] ss:$8 sps:$4 sm:$0xff]   ;;  %v4744_v40 = vld [vmem:[%s7316_s6 + $0x3d0] ss:$8 sps:$4 sm:$0xff]  }
 0x5ca   : > { %2560 = vmatmul.mubr.bf16.gmra.mrb[52].mxu0 %v6831_v42  ;;  %2754 = vmatmul.mubr.bf16.gmra.mrb[92].mxu1 %v6831_v42 }
 0x5cb   : > { %4270 = vmatprep.mubr.msk.bf16.mxu0 %vm487_vm0, %v6797_v4  ;;  %4308 = vmatprep.mubr.msk.bf16.mxu1 %vm487_vm0, %v6797_v4 }
 0x5cc   : > { %2910 = vmatpush1.bf16.msra.mxu0 %v4660_v48  ;;  %3104 = vmatpush1.bf16.msra.mxu1 %v4663_v28  ;;  %v4752_v48 = vld [vmem:[%s7316_s6 + $0x3e4] ss:$8 sps:$4 sm:$0xff]   ;;  %v4755_v28 = vld [vmem:[%s7316_s6 + $0x474] ss:$8 sps:$4 sm:$0xff]  }
 0x5cd   : > { %2911 = vmatprep.subr.bf16.mxu0 %v4668_v15  ;;  %3105 = vmatprep.subr.bf16.mxu1 %v4671_v46  ;;  %v4750_v15 = vld [vmem:[%s7316_s6 + $0x3e0] ss:$8 sps:$4 sm:$0xff]   ;;  %v4753_v46 = vld [vmem:[%s7316_s6 + $0x470] ss:$8 sps:$4 sm:$0xff]  }
 0x5ce   : > { %3553 = vperm.xlu1 %4504, %v6782_v17  }
 0x5d0   : > { %2912 = vmatpush1.bf16.msra.mxu0 %v4666_v9  ;;  %3106 = vmatpush1.bf16.msra.mxu1 %v4669_v8  ;;  %v4758_v9 = vld [vmem:[%s7316_s6 + $0x484] ss:$8 sps:$4 sm:$0xff]   ;;  %v4756_v8 = vld [vmem:[%s7316_s6 + $0x480] ss:$8 sps:$4 sm:$0xff]  }
 0x5d1   : > { %2913 = vmatprep.subr.bf16.mxu0 %v4674_v44  ;;  %3107 = vmatprep.subr.bf16.mxu1 %v4677_v1  ;;  %v4761_v44 = vld [vmem:[%s7316_s6 + $0x494] ss:$8 sps:$4 sm:$0xff]   ;;  %v4759_v1 = vld [vmem:[%s7316_s6 + $0x490] ss:$8 sps:$4 sm:$0xff]  }
 0x5d2   : > { %4505 = vset.pattern.permute.xlu1 %v5041_v25  ;;  %v4747_v25 = vld [vmem:[%s7316_s6 + $0x460] ss:$8 sps:$4 sm:$0xff]  }
 0x5d3   : > { %3747 = vperm.xlu1 %4505, %v6782_v17   ;;  %v4743_v17 = vld [vmem:[%s7316_s6 + $0x454] ss:$8 sps:$4 sm:$0xff]  }
 0x5d4   : > { %2914 = vmatpush1.bf16.msra.mxu0 %v4672_v41  ;;  %3108 = vmatpush1.bf16.msra.mxu1 %v4675_v7  ;;  %v4764_v41 = vld [vmem:[%s7316_s6 + $0x4a4] ss:$8 sps:$4 sm:$0xff]   ;;  %v4762_v7 = vld [vmem:[%s7316_s6 + $0x4a0] ss:$8 sps:$4 sm:$0xff]  }
 0x5d5   : > { %2915 = vmatprep.subr.bf16.mxu0 %v4680_v47  ;;  %3109 = vmatprep.subr.bf16.mxu1 %v4683_v27  ;;  %v4767_v47 = vld [vmem:[%s7316_s6 + $0x4b4] ss:$8 sps:$4 sm:$0xff]   ;;  %v4765_v27 = vld [vmem:[%s7316_s6 + $0x4b0] ss:$8 sps:$4 sm:$0xff]  }
 0x5d8   : > { %2916 = vmatpush1.bf16.msra.mxu0 %v4678_v57  ;;  %3110 = vmatpush1.bf16.msra.mxu1 %v4681_v21  ;;  %v4768_v57 = vld [vmem:[%s7316_s6 + $0x4c0] ss:$8 sps:$4 sm:$0xff]   ;;  %v4771_v21 = vld [vmem:[%s7316_s6 + $0x4d0] ss:$8 sps:$4 sm:$0xff]  }
 0x5d9   : > { %2917 = vmatprep.subr.bf16.mxu0 %v4686_v60  ;;  %3111 = vmatprep.subr.bf16.mxu1 %v4689_v13  ;;  %v4776_v60 = vld [vmem:[%s7316_s6 + $0x4e4] ss:$8 sps:$4 sm:$0xff]   ;;  %v4774_v13 = vld [vmem:[%s7316_s6 + $0x4e0] ss:$8 sps:$4 sm:$0xff]  }
 0x5dc   : > { %2918 = vmatpush1.bf16.msra.mxu0 %v4684_v38  ;;  %3112 = vmatpush1.bf16.msra.mxu1 %v4687_v23  ;;  %v4779_v38 = vld [vmem:[%s7316_s6 + $0x4f4] ss:$8 sps:$4 sm:$0xff]   ;;  %v4777_v23 = vld [vmem:[%s7316_s6 + $0x4f0] ss:$8 sps:$4 sm:$0xff]  }
 0x5dd   : > { %2919 = vmatprep.subr.bf16.mxu0 %v4692_v43  ;;  %3113 = vmatprep.subr.bf16.mxu1 %v4695_v53  ;;  %v4782_v43 = vld [vmem:[%s7316_s6 + $0x504] ss:$8 sps:$4 sm:$0xff]   ;;  %v4780_v53 = vld [vmem:[%s7316_s6 + $0x500] ss:$8 sps:$4 sm:$0xff]  }
 0x5e0   : > { %2920 = vmatpush1.bf16.msra.mxu0 %v4690_v20  ;;  %3114 = vmatpush1.bf16.msra.mxu1 %v4693_v59  ;;  %v2378_v20 = vpop.permute.xlu1 %2377 }
 0x5e1   : > { %2921 = vmatprep.subr.bf16.mxu0 %v4698_v55  ;;  %3115 = vmatprep.subr.bf16.mxu1 %v4701_v52  ;;  %v2181_v52 = vpop.permute.xlu0 %2180 }
 0x5e4   : > { %2922 = vmatpush1.bf16.msra.mxu0 %v4696_v34  ;;  %3116 = vmatpush1.bf16.msra.mxu1 %v4699_v24  ;;  %v2382_v59 = vpop.permute.xlu1 %2381 }
 0x5e5   : > { %3293 = vmatprep.subr.bf16.mxu0 %v4704_v31  ;;  %3487 = vmatprep.subr.bf16.mxu1 %v4707_v45  ;;  %v2186_v24 = vpop.permute.xlu0 %2185 }
 0x5e7   : > { %2938 = vmatmul.mubr.bf16.vlgmr.msra.gmra.mrb[56].mxu0 %v6794_v51  ;;  %3132 = vmatmul.mubr.bf16.vlgmr.msra.gmra.mrb[96].mxu1 %v6794_v51 }
 0x5e8   : > { %4271 = vmatprep.mubr.msk.bf16.mxu0 %vm487_vm0, %v6833_v32  ;;  %4309 = vmatprep.mubr.msk.bf16.mxu1 %vm487_vm0, %v6833_v32  ;;  %v7262_v55 = vpop.permute.xlu1 %2575 }
 0x5e9   : > { %3294 = vmatpush1.bf16.msra.mxu0 %v4702_v5  ;;  %3488 = vmatpush1.bf16.msra.mxu1 %v4705_v19 }
 0x5ea   : > { %3295 = vmatprep.subr.bf16.mxu0 %v4710_v63  ;;  %3489 = vmatprep.subr.bf16.mxu1 %v4713_v3 }
 0x5ec   : > { %v2191_v34 = vpop.permute.xlu1 %2190 }
 0x5ed   : > { %3296 = vmatpush1.bf16.msra.mxu0 %v4708_v29  ;;  %3490 = vmatpush1.bf16.msra.mxu1 %v4711_v49 }
 0x5ee   : > { %3297 = vmatprep.subr.bf16.mxu0 %v4716_v54  ;;  %3491 = vmatprep.subr.bf16.mxu1 %v4719_v22 }
 0x5ef   : > { %2948 = vmatmul.mubr.bf16.gmra.mrb[60].mxu0 %v6831_v42  ;;  %3142 = vmatmul.mubr.bf16.gmra.mrb[100].mxu1 %v6831_v42 }
 0x5f0   : > { %4346 = vmatprep.mubr.msk.bf16.mxu0 %vm487_vm0, %v6797_v4  ;;  %4384 = vmatprep.mubr.msk.bf16.mxu1 %vm487_vm0, %v6797_v4  ;;  %v2386_v31 = vpop.permute.xlu1 %2385 }
 0x5f1   : > { %3298 = vmatpush1.bf16.msra.mxu0 %v4714_v58  ;;  %3492 = vmatpush1.bf16.msra.mxu1 %v4717_v36 }
 0x5f2   : > { %3299 = vmatprep.subr.bf16.mxu0 %v4722_v16  ;;  %3493 = vmatprep.subr.bf16.mxu1 %v4725_v50 }
 0x5f5   : > { %3300 = vmatpush1.bf16.msra.mxu0 %v4720_v10  ;;  %3494 = vmatpush1.bf16.msra.mxu1 %v4723_v12 }
 0x5f6   : > { %3301 = vmatprep.subr.bf16.mxu0 %v4728_v0  ;;  %3495 = vmatprep.subr.bf16.mxu1 %v4731_v6 }
 0x5f9   : > { %3302 = vmatpush1.bf16.msra.mxu0 %v4726_v30  ;;  %3496 = vmatpush1.bf16.msra.mxu1 %v4729_v33  ;;  %v2196_v30 = vpop.permute.xlu0 %2195  ;;  %v2390_v33 = vpop.permute.xlu1 %2389 }
 0x5fa   : > { %3303 = vmatprep.subr.bf16.mxu0 %v4734_v2  ;;  %3497 = vmatprep.subr.bf16.mxu1 %v4737_v56 }
 0x5fd   : > { %3304 = vmatpush1.bf16.msra.mxu0 %v4732_v62  ;;  %3498 = vmatpush1.bf16.msra.mxu1 %v4735_v26 }
 0x5fe   : > { %3305 = vmatprep.subr.bf16.mxu0 %v4740_v11  ;;  %3499 = vmatprep.subr.bf16.mxu1 %v4743_v17 }
 0x601   : > { %3306 = vmatpush1.bf16.msra.mxu0 %v4738_v37  ;;  %3500 = vmatpush1.bf16.msra.mxu1 %v4741_v39 }
 0x602   : > { %3307 = vmatprep.subr.bf16.mxu0 %v4746_v14  ;;  %3501 = vmatprep.subr.bf16.mxu1 %v4749_v35 }
 0x605   : > { %3308 = vmatpush1.bf16.msra.mxu0 %v4744_v40  ;;  %3502 = vmatpush1.bf16.msra.mxu1 %v4747_v25 }
 0x606   : > { %3309 = vmatprep.subr.bf16.mxu0 %v4752_v48  ;;  %3503 = vmatprep.subr.bf16.mxu1 %v4755_v28 }
 0x609   : > { %3310 = vmatpush1.bf16.msra.mxu0 %v4750_v15  ;;  %3504 = vmatpush1.bf16.msra.mxu1 %v4753_v46 }
 0x60a   : > { %3681 = vmatprep.subr.bf16.mxu0 %v4758_v9 }
 0x60c   : > { %3326 = vmatmul.mubr.bf16.vlgmr.msra.gmra.mrb[64].mxu0 %v6794_v51  ;;  %3520 = vmatmul.mubr.bf16.vlgmr.msra.gmra.mrb[104].mxu1 %v6794_v51 }
 0x60d   : > { %4347 = vmatprep.mubr.msk.bf16.mxu0 %vm487_vm0, %v6833_v32  ;;  %4385 = vmatprep.mubr.msk.bf16.mxu1 %vm487_vm0, %v6833_v32 }
 0x60e   : > { %3682 = vmatpush1.bf16.msra.mxu0 %v4756_v8 }
 0x60f   : > { %3683 = vmatprep.subr.bf16.mxu0 %v4761_v44 }
 0x612   : > { %3684 = vmatpush1.bf16.msra.mxu0 %v4759_v1 }
 0x613   : > { %3685 = vmatprep.subr.bf16.mxu0 %v4764_v41  ;;  %v2770_v41 = vpop.permute.xlu1 %2769 }
 0x614   : > { %3336 = vmatmul.mubr.bf16.gmra.mrb[68].mxu0 %v6831_v42  ;;  %3530 = vmatmul.mubr.bf16.gmra.mrb[108].mxu1 %v6831_v42 }
 0x615   : > { %4422 = vmatprep.mubr.msk.bf16.mxu0 %vm487_vm0, %v6797_v4  ;;  %v4773_v4 = vld [vmem:[%s7316_s6 + $0x4d4] ss:$8 sps:$4 sm:$0xff]  }
 0x616   : > { %3686 = vmatpush1.bf16.msra.mxu0 %v4762_v7  ;;  %v2572_v7 = vpop.permute.xlu0 %2571 }
 0x617   : > { %3687 = vmatprep.subr.bf16.mxu0 %v4767_v47  ;;  %v2580_v47 = vpop.permute.xlu1 %2579 }
 0x61a   : > { %3688 = vmatpush1.bf16.msra.mxu0 %v4765_v27  ;;  %v2584_v27 = vpop.permute.xlu0 %2583 }
 0x61b   : > { %3689 = vmatprep.subr.bf16.mxu0 %v4770_v18  ;;  %v7264_v18 = vpop.permute.xlu1 %2959 }
 0x61e   : > { %3690 = vmatpush1.bf16.msra.mxu0 %v4768_v57  ;;  %v2766_v57 = vpop.permute.xlu0 %2765 }
 0x61f   : > { %3691 = vmatprep.subr.bf16.mxu0 %v4773_v4  ;;  %v7266_v4 = vpop.permute.xlu1 %2963 }
 0x622   : > { %3692 = vmatpush1.bf16.msra.mxu0 %v4771_v21 }
 0x623   : > { %3693 = vmatprep.subr.bf16.mxu0 %v4776_v60 }
 0x626   : > { %3694 = vmatpush1.bf16.msra.mxu0 %v4774_v13 }
 0x627   : > { %3695 = vmatprep.subr.bf16.mxu0 %v4779_v38 }
 0x62a   : > { %3696 = vmatpush1.bf16.msra.mxu0 %v4777_v23 }
 0x62b   : > { %3697 = vmatprep.subr.bf16.mxu0 %v4782_v43 }
 0x62e   : > { %3698 = vmatpush1.bf16.msra.mxu0 %v4780_v53 }
 0x631   : > { %3714 = vmatmul.mubr.bf16.vlgmr.msra.gmra.mrb[72].mxu0 %v6794_v51 }
 0x632   : > { %4423 = vmatprep.mubr.msk.bf16.mxu0 %vm487_vm0, %v6833_v32 }
 0x639   : > { %3724 = vmatmul.mubr.bf16.gmra.mrb[76].mxu0 %v6831_v42 }
 0x63a   : > { %3822 = vmatprep.mubr.bf16.mxu0 %v7456_v61 }
 0x671   : > { %v2159_v45 = vpop.f32.mrb[40].mxu0  ;;  %v2357_v5 = vpop.f32.mrb[80].mxu1 }
 0x672   : > { %v2198_v19 = vmul.f32 %v2181_v52, %v2159_v45  ;;  %v2392_v63 = vmul.f32 %v2378_v20, %v2357_v5  ;;  %v2161_v51 = vpop.f32.mrb[41].mxu0  ;;  %v2359_v3 = vpop.f32.mrb[81].mxu1 }
 0x673   : > { %v2199_v29 = vmul.f32 %v2181_v52, %v2161_v51  ;;  %v2393_v32 = vmul.f32 %v2378_v20, %v2359_v3  ;;  %v2163_v49 = vpop.f32.mrb[42].mxu0  ;;  %v2361_v42 = vpop.f32.mrb[82].mxu1 }
 0x674   : > { %v2400_v54 = vadd.f32 %v2392_v63, %v2198_v19  ;;  %v2200_v22 = vmul.f32 %v2186_v24, %v2163_v49  ;;  %v2394_v58 = vmul.f32 %v2382_v59, %v2361_v42  ;;  %v2165_v36 = vpop.f32.mrb[43].mxu0  ;;  %v2363_v16 = vpop.f32.mrb[83].mxu1 }
 0x675   : > { %v2401_v50 = vadd.f32 %v2393_v32, %v2199_v29  ;;  %v2201_v10 = vmul.f32 %v2186_v24, %v2165_v36  ;;  %v2395_v12 = vmul.f32 %v2382_v59, %v2363_v16 }
 0x676   : > { %v2402_v0 = vadd.f32 %v2394_v58, %v2200_v22  ;;  %v2774_v22 = vpop.permute.xlu0 %2773  ;;  %v2778_v58 = vpop.permute.xlu1 %2777 }
 0x677   : > { %v2403_v6 = vadd.f32 %v2395_v12, %v2201_v10 }
 0x679   : > { %v2169_v2 = vpop.f32.mrb[44].mxu0  ;;  %v2367_v56 = vpop.f32.mrb[84].mxu1 }
 0x67a   : > { %v2202_v62 = vmul.f32 %v2191_v34, %v2169_v2  ;;  %v2396_v26 = vmul.f32 %v2386_v31, %v2367_v56  ;;  %v2171_v11 = vpop.f32.mrb[45].mxu0  ;;  %v2369_v17 = vpop.f32.mrb[85].mxu1 }
 0x67b   : > { %v2203_v37 = vmul.f32 %v2191_v34, %v2171_v11  ;;  %v2397_v39 = vmul.f32 %v2386_v31, %v2369_v17  ;;  %v2173_v14 = vpop.f32.mrb[46].mxu0  ;;  %v2371_v35 = vpop.f32.mrb[86].mxu1 }
 0x67c   : > { %v2404_v40 = vadd.f32 %v2396_v26, %v2202_v62  ;;  %v2204_v25 = vmul.f32 %v2196_v30, %v2173_v14  ;;  %v2398_v48 = vmul.f32 %v2390_v33, %v2371_v35  ;;  %v2175_v28 = vpop.f32.mrb[47].mxu0  ;;  %v2373_v15 = vpop.f32.mrb[87].mxu1 }
 0x67d   : > { %v2405_v46 = vadd.f32 %v2397_v39, %v2203_v37  ;;  %v2205_v9 = vmul.f32 %v2196_v30, %v2175_v28  ;;  %v2399_v8 = vmul.f32 %v2390_v33, %v2373_v15 }
 0x67e   : > { %v2406_v44 = vadd.f32 %v2398_v48, %v2204_v25 }
 0x67f   : > { %v2407_v1 = vadd.f32 %v2399_v8, %v2205_v9  ;;  %v3154_v9 = vpop.permute.xlu1 %3153 }
 0x683   : > { %v2968_v8 = vpop.permute.xlu1 %2967 }
 0x695   : > { %v2551_v21 = vpop.f32.mrb[48].mxu0  ;;  %v2745_v60 = vpop.f32.mrb[88].mxu1 }
 0x696   : > { %v2586_v13 = vmul.f32 %v2572_v7, %v2551_v21  ;;  %v2553_v38 = vpop.f32.mrb[49].mxu0  ;;  %v2747_v23 = vpop.f32.mrb[89].mxu1  ;;  %v2780_v52 = vmul.f32 %v2766_v57, %v2745_v60 }
 0x697   : > { %v2587_v43 = vmul.f32 %v2572_v7, %v2553_v38  ;;  %v2555_v53 = vpop.f32.mrb[50].mxu0  ;;  %v2749_v20 = vpop.f32.mrb[90].mxu1  ;;  %v2781_v5 = vmul.f32 %v2766_v57, %v2747_v23 }
 0x698   : > { %v2594_v59 = vadd.f32 %v2586_v13, %v2400_v54  ;;  %v2588_v34 = vmul.f32 %v7262_v55, %v2555_v53  ;;  %v2557_v24 = vpop.f32.mrb[51].mxu0  ;;  %v2751_v31 = vpop.f32.mrb[91].mxu1  ;;  %v2782_v3 = vmul.f32 %v2770_v41, %v2749_v20 }
 0x699   : > { %v2595_v45 = vadd.f32 %v2587_v43, %v2401_v50  ;;  %v2589_v19 = vmul.f32 %v7262_v55, %v2557_v24  ;;  %v2783_v49 = vmul.f32 %v2770_v41, %v2751_v31  ;;  %v2972_v41 = vpop.permute.xlu1 %2971  ;;  %v3158_v7 = vpop.permute.xlu0 %3157 }
 0x69a   : > { %v2788_v63 = vadd.f32 %v2780_v52, %v2594_v59  ;;  %v2596_v51 = vadd.f32 %v2588_v34, %v2402_v0 }
 0x69b   : > { %v2789_v29 = vadd.f32 %v2781_v5, %v2595_v45  ;;  %v2597_v32 = vadd.f32 %v2589_v19, %v2403_v6 }
 0x69c   : > { %v2790_v42 = vadd.f32 %v2782_v3, %v2596_v51 }
 0x69d   : > { %v2791_v36 = vadd.f32 %v2783_v49, %v2597_v32  ;;  %v2561_v54 = vpop.f32.mrb[52].mxu0  ;;  %v2755_v16 = vpop.f32.mrb[92].mxu1 }
 0x69e   : > { %v2590_v10 = vmul.f32 %v2580_v47, %v2561_v54  ;;  %v2563_v12 = vpop.f32.mrb[53].mxu0  ;;  %v2757_v30 = vpop.f32.mrb[93].mxu1  ;;  %v2784_v55 = vmul.f32 %v2774_v22, %v2755_v16 }
 0x69f   : > { %v2591_v33 = vmul.f32 %v2580_v47, %v2563_v12  ;;  %v2565_v50 = vpop.f32.mrb[54].mxu0  ;;  %v2759_v2 = vpop.f32.mrb[94].mxu1  ;;  %v2785_v6 = vmul.f32 %v2774_v22, %v2757_v30 }
 0x6a0   : > { %v2598_v56 = vadd.f32 %v2590_v10, %v2404_v40  ;;  %v2592_v62 = vmul.f32 %v2584_v27, %v2565_v50  ;;  %v2567_v0 = vpop.f32.mrb[55].mxu0  ;;  %v2761_v26 = vpop.f32.mrb[95].mxu1  ;;  %v2786_v14 = vmul.f32 %v2778_v58, %v2759_v2 }
 0x6a1   : > { %v2599_v11 = vadd.f32 %v2591_v33, %v2405_v46  ;;  %v2593_v17 = vmul.f32 %v2584_v27, %v2567_v0  ;;  %v2787_v48 = vmul.f32 %v2778_v58, %v2761_v26  ;;  %v7270_v40 = vpop.permute.xlu1 %3351  ;;  %v3166_v3 = vpop.permute.xlu0 %3165 }
 0x6a2   : > { %v2792_v37 = vadd.f32 %v2784_v55, %v2598_v56  ;;  %v2600_v39 = vadd.f32 %v2592_v62, %v2406_v44 }
 0x6a3   : > { %v2793_v35 = vadd.f32 %v2785_v6, %v2599_v11  ;;  %v2601_v25 = vadd.f32 %v2593_v17, %v2407_v1 }
 0x6a4   : > { %v2794_v28 = vadd.f32 %v2786_v14, %v2600_v39 }
 0x6a5   : > { %v2795_v15 = vadd.f32 %v2787_v48, %v2601_v25 }
 0x6ba   : > { %v2939_v47 = vpop.f32.mrb[56].mxu0  ;;  %v3133_v57 = vpop.f32.mrb[96].mxu1 }
 0x6bb   : > { %v2974_v46 = vmul.f32 %v7264_v18, %v2939_v47  ;;  %v2941_v21 = vpop.f32.mrb[57].mxu0  ;;  %v3135_v27 = vpop.f32.mrb[97].mxu1  ;;  %v3168_v38 = vmul.f32 %v3154_v9, %v3133_v57 }
 0x6bc   : > { %v2975_v44 = vmul.f32 %v7264_v18, %v2941_v21  ;;  %v2943_v60 = vpop.f32.mrb[58].mxu0  ;;  %v3137_v13 = vpop.f32.mrb[98].mxu1  ;;  %v3169_v59 = vmul.f32 %v3154_v9, %v3135_v27 }
 0x6bd   : > { %v2982_v1 = vadd.f32 %v2974_v46, %v2788_v63  ;;  %v2976_v23 = vmul.f32 %v7266_v4, %v2943_v60  ;;  %v2945_v43 = vpop.f32.mrb[59].mxu0  ;;  %v3139_v53 = vpop.f32.mrb[99].mxu1  ;;  %v3170_v31 = vmul.f32 %v3158_v7, %v3137_v13 }
 0x6be   : > { %v2983_v20 = vadd.f32 %v2975_v44, %v2789_v29  ;;  %v2977_v52 = vmul.f32 %v7266_v4, %v2945_v43  ;;  %v3171_v19 = vmul.f32 %v3158_v7, %v3139_v53  ;;  %v3162_v18 = vpop.permute.xlu1 %3161 }
 0x6bf   : > { %v3176_v34 = vadd.f32 %v3168_v38, %v2982_v1  ;;  %v2984_v24 = vadd.f32 %v2976_v23, %v2790_v42 }
 0x6c0   : > { %v3177_v45 = vadd.f32 %v3169_v59, %v2983_v20  ;;  %v2985_v5 = vadd.f32 %v2977_v52, %v2791_v36 }
 0x6c1   : > { %v3178_v51 = vadd.f32 %v3170_v31, %v2984_v24 }
 0x6c2   : > { %v3179_v32 = vadd.f32 %v3171_v19, %v2985_v5  ;;  %v2949_v63 = vpop.f32.mrb[60].mxu0  ;;  %v3143_v49 = vpop.f32.mrb[100].mxu1 }
 0x6c3   : > { %v2978_v22 = vmul.f32 %v2968_v8, %v2949_v63  ;;  %v2951_v58 = vpop.f32.mrb[61].mxu0  ;;  %v3145_v54 = vpop.f32.mrb[101].mxu1  ;;  %v3172_v4 = vmul.f32 %v3162_v18, %v3143_v49 }
 0x6c4   : > { %v2979_v16 = vmul.f32 %v2968_v8, %v2951_v58  ;;  %v2953_v29 = vpop.f32.mrb[62].mxu0  ;;  %v3147_v10 = vpop.f32.mrb[102].mxu1  ;;  %v3173_v36 = vmul.f32 %v3162_v18, %v3145_v54 }
 0x6c5   : > { %v2986_v12 = vadd.f32 %v2978_v22, %v2792_v37  ;;  %v2980_v30 = vmul.f32 %v2972_v41, %v2953_v29  ;;  %v2955_v42 = vpop.f32.mrb[63].mxu0  ;;  %v3149_v33 = vpop.f32.mrb[103].mxu1  ;;  %v3174_v0 = vmul.f32 %v3166_v3, %v3147_v10 }
 0x6c6   : > { %v2987_v50 = vadd.f32 %v2979_v16, %v2793_v35  ;;  %v2981_v2 = vmul.f32 %v2972_v41, %v2955_v42  ;;  %v3542_v56 = vpop.permute.xlu1 %3541  ;;  %v3175_v6 = vmul.f32 %v3166_v3, %v3149_v33  ;;  %v3348_v37 = vpop.permute.xlu0 %3347 }
 0x6c7   : > { %v3180_v55 = vadd.f32 %v3172_v4, %v2986_v12  ;;  %v2988_v62 = vadd.f32 %v2980_v30, %v2794_v28 }
 0x6c8   : > { %v3181_v26 = vadd.f32 %v3173_v36, %v2987_v50  ;;  %v2989_v11 = vadd.f32 %v2981_v2, %v2795_v15 }
 0x6c9   : > { %v3182_v17 = vadd.f32 %v3174_v0, %v2988_v62 }
 0x6ca   : > { %v3183_v39 = vadd.f32 %v3175_v6, %v2989_v11  ;;  %v3546_v14 = vpop.permute.xlu1 %3545  ;;  %v3356_v24 = vpop.permute.xlu0 %3355 }
 0x6ce   : > { %v3360_v25 = vpop.permute.xlu1 %3359  ;;  %v3740_v62 = vpop.permute.xlu0 %3739 }
 0x6d2   : > { %v3736_v48 = vpop.permute.xlu1 %3735 }
 0x6d6   : > { %v3550_v9 = vpop.permute.xlu1 %3549 }
 0x6da   : > { %v3554_v5 = vpop.permute.xlu1 %3553 }
 0x6df   : > { %v3327_v8 = vpop.f32.mrb[64].mxu0  ;;  %v3521_v7 = vpop.f32.mrb[104].mxu1 }
 0x6e0   : > { %v3362_v47 = vmul.f32 %v3348_v37, %v3327_v8  ;;  %v3329_v35 = vpop.f32.mrb[65].mxu0  ;;  %v3523_v57 = vpop.f32.mrb[105].mxu1  ;;  %v3556_v27 = vmul.f32 %v3542_v56, %v3521_v7 }
 0x6e1   : > { %v3363_v41 = vmul.f32 %v3348_v37, %v3329_v35  ;;  %v3331_v46 = vpop.f32.mrb[66].mxu0  ;;  %v3525_v21 = vpop.f32.mrb[106].mxu1  ;;  %v3557_v1 = vmul.f32 %v3542_v56, %v3523_v57 }
 0x6e2   : > { %v3370_v28 = vadd.f32 %v3362_v47, %v3176_v34  ;;  %v3364_v15 = vmul.f32 %v7270_v40, %v3331_v46  ;;  %v3333_v44 = vpop.f32.mrb[67].mxu0  ;;  %v3527_v60 = vpop.f32.mrb[107].mxu1  ;;  %v3558_v53 = vmul.f32 %v3546_v14, %v3525_v21 }
 0x6e3   : > { %v3371_v13 = vadd.f32 %v3363_v41, %v3177_v45  ;;  %v3365_v38 = vmul.f32 %v7270_v40, %v3333_v44  ;;  %v3559_v52 = vmul.f32 %v3546_v14, %v3527_v60  ;;  %v3744_v47 = vpop.permute.xlu0 %3743 }
 0x6e4   : > { %v3564_v23 = vadd.f32 %v3556_v27, %v3370_v28  ;;  %v3372_v43 = vadd.f32 %v3364_v15, %v3178_v51 }
 0x6e5   : > { %v3565_v20 = vadd.f32 %v3557_v1, %v3371_v13  ;;  %v3373_v59 = vadd.f32 %v3365_v38, %v3179_v32 }
 0x6e6   : > { %v3566_v31 = vadd.f32 %v3558_v53, %v3372_v43  ;;  %v4783_v53 = vld [vmem:[%s7315_s5] sm:$0xff]  }
 0x6e7   : > { %v3567_v19 = vadd.f32 %v3559_v52, %v3373_v59  ;;  %v3337_v34 = vpop.f32.mrb[68].mxu0  ;;  %v3531_v18 = vpop.f32.mrb[108].mxu1 }
 0x6e8   : > { %v3366_v3 = vmul.f32 %v3356_v24, %v3337_v34  ;;  %v3339_v63 = vpop.f32.mrb[69].mxu0  ;;  %v3533_v49 = vpop.f32.mrb[109].mxu1  ;;  %v3560_v40 = vmul.f32 %v3550_v9, %v3531_v18 }
 0x6e9   : > { %v3367_v22 = vmul.f32 %v3356_v24, %v3339_v63  ;;  %v3341_v45 = vpop.f32.mrb[70].mxu0  ;;  %v3535_v58 = vpop.f32.mrb[110].mxu1  ;;  %v3561_v32 = vmul.f32 %v3550_v9, %v3533_v49 }
 0x6ea   : > { %v3374_v54 = vadd.f32 %v3366_v3, %v3180_v55  ;;  %v3368_v16 = vmul.f32 %v3360_v25, %v3341_v45  ;;  %v3343_v51 = vpop.f32.mrb[71].mxu0  ;;  %v3537_v29 = vpop.f32.mrb[111].mxu1  ;;  %v3562_v42 = vmul.f32 %v3554_v5, %v3535_v58 }
 0x6eb   : > { %v3375_v10 = vadd.f32 %v3367_v22, %v3181_v26  ;;  %v3369_v12 = vmul.f32 %v3360_v25, %v3343_v51  ;;  %v3563_v36 = vmul.f32 %v3554_v5, %v3537_v29 }
 0x6ec   : > { %v3568_v4 = vadd.f32 %v3560_v40, %v3374_v54  ;;  %v3376_v30 = vadd.f32 %v3368_v16, %v3182_v17 }
 0x6ed   : > { %v3569_v33 = vadd.f32 %v3561_v32, %v3375_v10  ;;  %v3377_v50 = vadd.f32 %v3369_v12, %v3183_v39  ;;  %v3748_v39 = vpop.permute.xlu1 %3747 }
 0x6ee   : > { %v3570_v2 = vadd.f32 %v3562_v42, %v3376_v30 }
 0x6ef   : > { %v3571_v56 = vadd.f32 %v3563_v36, %v3377_v50 }
 0x704   : > { %v3715_v0 = vpop.f32.mrb[72].mxu0 }
 0x705   : > { %v3750_v11 = vmul.f32 %v3736_v48, %v3715_v0  ;;  %v3717_v6 = vpop.f32.mrb[73].mxu0 }
 0x706   : > { %v3751_v55 = vmul.f32 %v3736_v48, %v3717_v6  ;;  %v3719_v14 = vpop.f32.mrb[74].mxu0 }
 0x707   : > { %v3758_v37 = vadd.f32 %v3750_v11, %v3564_v23  ;;  %v3752_v8 = vmul.f32 %v3740_v62, %v3719_v14  ;;  %v3721_v7 = vpop.f32.mrb[75].mxu0 }
 0x708   : > { %v3759_v26 = vadd.f32 %v3751_v55, %v3565_v20  ;;  %v3753_v9 = vmul.f32 %v3740_v62, %v3721_v7  ;;  %v4784_v20 = vld [vmem:[%s7315_s5 + $0x8] sm:$0xff]  }
 0x709   : > { %v3760_v25 = vadd.f32 %v3752_v8, %v3566_v31 }
 0x70a   : > { %v3761_v17 = vadd.f32 %v3753_v9, %v3567_v19 }
 0x70b   : > { %v3770_v35 = vpack.c.bf16 %v3760_v25, %v3758_v37 }
 0x70c   : > { %v3725_v57 = vpop.f32.mrb[76].mxu0  ;;  %v3771_v41 = vpack.c.bf16 %v3761_v17, %v3759_v26 }
 0x70d   : > { %v3754_v46 = vmul.f32 %v3744_v47, %v3725_v57  ;;  %v3727_v21 = vpop.f32.mrb[77].mxu0 }
 0x70e   : > { %v3755_v28 = vmul.f32 %v3744_v47, %v3727_v21  ;;  %v3729_v27 = vpop.f32.mrb[78].mxu0  ;;  %3790 = vmatprep.subr.bf16.mxu0 %v3771_v41 }
 0x70f   : > { %v3762_v15 = vadd.f32 %v3754_v46, %v3568_v4  ;;  %v3756_v48 = vmul.f32 %v3748_v39, %v3729_v27  ;;  %v3731_v44 = vpop.f32.mrb[79].mxu0  ;;  %3791 = vmatpush1.bf16.msra.mxu0 %v3770_v35 }
 0x710   : > { %v3763_v60 = vadd.f32 %v3755_v28, %v3569_v33  ;;  %v3757_v13 = vmul.f32 %v3748_v39, %v3731_v44 }
 0x711   : > { %v3764_v1 = vadd.f32 %v3756_v48, %v3570_v2 }
 0x712   : > { %v3765_v38 = vadd.f32 %v3757_v13, %v3571_v56 }
 0x713   : > { %v3772_v23 = vpack.c.bf16 %v3764_v1, %v3762_v15 }
 0x714   : > { %v3773_v43 = vpack.c.bf16 %v3765_v38, %v3763_v60 }
 0x716   : > { %3792 = vmatprep.subr.bf16.mxu0 %v3773_v43 }
 0x717   : > { %3793 = vmatpush1.bf16.msra.mxu0 %v3772_v23 }
 0x71a   : > { %4426 = vmatmul.mubr.msk.bf16.vlgmr.msra.gmra.mrb[80].mxu0 %vm1943_vm3, %v4783_v53 }
 0x71b   : > { %3832 = vmatprep.mubr.bf16.mxu0 %v7456_v61 }
 0x722   : > { %4427 = vmatmul.mubr.msk.bf16.gmra.mrb[84].mxu0 %vm1943_vm3, %v4784_v20 }
 0x7ed   : > { %v3824_v59 = vpop.f32.mrb[80].mxu0 }
 0x7ee   : > { %3843 = vst [vmem:[%s382_s10] sm:$0xff] %v3824_v59  ;;  %v3826_v52 = vpop.f32.mrb[81].mxu0 }
 0x7ef   : > { %3844 = vst.msk [vmem:[%s382_s10 + $0x8] sm:$0xff] %vm487_vm0, %v3826_v52  ;;  %v3828_v24 = vpop.f32.mrb[82].mxu0 }
 0x7f0   : > { %3845 = vst [vmem:[%s382_s10 + $0x10] sm:$0xff] %v3828_v24  ;;  %v3830_v31 = vpop.f32.mrb[83].mxu0 }
 0x7f1   : > { %3846 = vst.msk [vmem:[%s382_s10 + $0x18] sm:$0xff] %vm487_vm0, %v3830_v31 }
 0x7f5   : > { %v3834_v61 = vpop.f32.mrb[84].mxu0 }
 0x7f6   : > { %3847 = vst [vmem:[%s382_s10 + $0x20] sm:$0xff] %v3834_v61  ;;  %v3836_v5 = vpop.f32.mrb[85].mxu0 }
 0x7f7   : > { %3848 = vst.msk [vmem:[%s382_s10 + $0x28] sm:$0xff] %vm487_vm0, %v3836_v5  ;;  %v3838_v19 = vpop.f32.mrb[86].mxu0 }
 0x7f8   : > { %3849 = vst [vmem:[%s382_s10 + $0x30] sm:$0xff] %v3838_v19  ;;  %v3840_v34 = vpop.f32.mrb[87].mxu0 }
 0x7f9   : > { %3850 = vst.msk [vmem:[%s382_s10 + $0x38] sm:$0xff] %vm487_vm0, %v3840_v34 }
 0x7fa PF: > { %s17_s28 = sadd.s32 1, %s5032_s28   ;;  %s7457_s24 = smov %s5024_s26 }
 0x7fb   : > { %p14_p7 = scmp.ge.s32.totalorder %s17_s28, 6   ;;  %s7458_s25 = smov %s5028_s27 }
 0x7fc   : > { %s7459_s26 = smov %s7462_s29  ;;  %s7460_s27 = smov %s7466_s30 }
 0x7fd   :  { %16 = sbr.rel (!%p14_p7) target bundleno = 3 (0x3), region = 95 }

</bundles_post_ra>
